<compile_context>
chip_gen: v7x
topology: tpu7x:2x2x1
jax: 0.10.0
libtpu: 0.0.40
codegen_flags: <defaults>
</compile_context>

<pallas_src>
import math
import random

import jax
import jax.numpy as jnp
from jax import lax
from jax.experimental import pallas as pl
from jax.experimental.pallas import tpu as pltpu

# ---- small, module-consistent config ----
INPUT_DIM = 32     # encoder (src) vocab size
OUTPUT_DIM = 32    # decoder (trg) vocab size == decoder.output_dim
EMB_DIM = 32
HID_DIM = 32       # encoder.hidden_dim == decoder.hidden_dim
N_LAYERS = 2       # encoder.n_layers == decoder.n_layers
BATCH = 8
SRC_LEN = 6
TRG_LEN = 8
OUT_PAD = 128      # lane-dense padded logits width (multiple of 128)
_NEG = -1.0e30     # bias on padded logit lanes (never wins the argmax, sliced off afterwards)

_VMEM = pltpu.MemorySpace.VMEM
_SMEM = pltpu.MemorySpace.SMEM


# ---------------- fused encoder+decoder kernel ----------------

def _make_seq2seq_kernel(n_layers, hid, in_vocab, out_vocab, out_pad,
                         src_len, trg_len, batch):
    def kernel(force_ref, src_ref, trg_ref, enc_emb_ref, dec_emb_ref, *refs):
        # refs = enc (w_ih_t, w_hh_t, b) * L, dec (w_ih_t, w_hh_t, b) * L, fc_w, fc_b, out_ref
        f32 = jnp.float32
        bf16 = jnp.bfloat16

        # ---- load all weights once (loop-invariant; whole set fits in the vreg file) ----
        enc_w_ih = [refs[3 * l + 0][...] for l in range(n_layers)]   # bf16 (in, 4H)
        enc_w_hh = [refs[3 * l + 1][...] for l in range(n_layers)]   # bf16 (H, 4H)
        enc_b = [refs[3 * l + 2][...] for l in range(n_layers)]      # f32  (1, 4H)
        off = 3 * n_layers
        dec_w_ih = [refs[off + 3 * l + 0][...] for l in range(n_layers)]
        dec_w_hh = [refs[off + 3 * l + 1][...] for l in range(n_layers)]
        dec_b = [refs[off + 3 * l + 2][...] for l in range(n_layers)]
        fc_w = refs[2 * off][...]          # bf16 (H, OUT_PAD)
        fc_b = refs[2 * off + 1][...]      # f32  (1, OUT_PAD), padded lanes = -1e30
        out_ref = refs[2 * off + 2]        # f32  (T, B, OUT_PAD)

        enc_emb = enc_emb_ref[...]         # bf16 (in_vocab, E)
        dec_emb = dec_emb_ref[...]         # bf16 (out_vocab, E)

        # ---- loop-invariant iotas / masks (JAX does not CSE broadcast_in_dim) ----
        gate_lane = lax.broadcasted_iota(jnp.int32, (batch, 4 * hid), 1)
        is_g = jnp.logical_and(gate_lane >= 2 * hid, gate_lane < 3 * hid)
        col_dec = lax.broadcasted_iota(jnp.int32, (batch, out_vocab), 1)
        col_pad_f = lax.broadcasted_iota(jnp.int32, (batch, out_pad), 1).astype(f32)

        def gate_update(gates, c):
            # One EUP pass on the full (B,4H) vreg: tanh(x) == 2*sigmoid(2x) - 1.
            g2 = jnp.where(is_g, gates + gates, gates)
            sig = jax.nn.sigmoid(g2)
            act = jnp.where(is_g, sig + sig - 1.0, sig)
            i = act[:, 0:hid]
            f = act[:, hid:2 * hid]
            g = act[:, 2 * hid:3 * hid]
            o = act[:, 3 * hid:4 * hid]
            c_new = f * c + i * g
            h_new = o * jnp.tanh(c_new)
            return h_new, c_new

        def cell(x, h, c, w_ih, w_hh, b):
            gates = (jnp.dot(x.astype(bf16), w_ih, preferred_element_type=f32)
                     + jnp.dot(h.astype(bf16), w_hh, preferred_element_type=f32)
                     + b)
            return gate_update(gates, c)

        def cell_pre(xproj, h, c, w_hh, b):
            # layer-0 encoder cell: input projection precomputed outside the serial loop
            gates = xproj + jnp.dot(h.astype(bf16), w_hh, preferred_element_type=f32) + b
            return gate_update(gates, c)

        # ================= encoder =================
        sb = src_len * batch
        col_src = lax.broadcasted_iota(jnp.int32, (sb, in_vocab), 1)
        onehot_src = (col_src == src_ref[...]).astype(bf16)                     # (S*B, Vin)
        x_all = jnp.dot(onehot_src, enc_emb, preferred_element_type=f32)        # (S*B, E)
        xp0_all = jnp.dot(x_all.astype(bf16), enc_w_ih[0],
                          preferred_element_type=f32)                           # (S*B, 4H)

        h = [jnp.zeros((batch, hid), f32) for _ in range(n_layers)]
        c = [jnp.zeros((batch, hid), f32) for _ in range(n_layers)]
        for t in range(src_len):
            h[0], c[0] = cell_pre(xp0_all[t * batch:(t + 1) * batch],
                                  h[0], c[0], enc_w_hh[0], enc_b[0])
            x = h[0]
            for l in range(1, n_layers):
                h[l], c[l] = cell(x, h[l], c[l], enc_w_ih[l], enc_w_hh[l], enc_b[l])
                x = h[l]

        # ================= decoder (state h/c carries over in-register) =================
        out_ref[0] = jnp.zeros((batch, out_pad), f32)      # outputs[0] stays zeros (as in PyTorch)
        inp_tok = trg_ref[:, 0:1]                          # (B, 1) int32

        for t in range(1, trg_len):
            # embedding lookup as one-hot @ table (MXU); values bf16-rounded (matmul operand anyway)
            onehot = (col_dec == inp_tok).astype(bf16)                           # (B, Vout)
            x = jnp.dot(onehot, dec_emb, preferred_element_type=f32)             # (B, E)

            for l in range(n_layers):
                h[l], c[l] = cell(x, h[l], c[l], dec_w_ih[l], dec_w_hh[l], dec_b[l])
                x = h[l]

            logits = (jnp.dot(x.astype(bf16), fc_w, preferred_element_type=f32)
                      + fc_b)                                                    # (B, OUT_PAD)
            out_ref[t] = logits                                                  # lane-dense store

            # argmax with lowest-index tie-break (padded lanes sit at -1e30, never selected)
            m = jnp.max(logits, axis=1, keepdims=True)
            top1 = jnp.min(jnp.where(logits == m, col_pad_f, float(out_pad)),
                           axis=1, keepdims=True).astype(jnp.int32)              # (B, 1)

            f_t = force_ref[t]                                                   # scalar 0/1 from SMEM
            inp_tok = f_t * trg_ref[:, t:t + 1] + (1 - f_t) * top1

    return kernel


# ---------------- model forward (mirrors Seq2Seq.forward) ----------------

def _seq2seq_forward(params, src, trg, force):
    src_len, batch = src.shape
    trg_len, _ = trg.shape

    args = [force.astype(jnp.int32),
            src.reshape(src_len * batch, 1).astype(jnp.int32),   # t-major token column
            trg.T.astype(jnp.int32),                             # (B, T): per-step (B,1) columns
            params["enc"]["embedding"],
            params["dec"]["embedding"]]
    for lp in params["enc"]["lstm"]:
        args += [lp["w_ih_t"], lp["w_hh_t"], lp["b"]]
    for lp in params["dec"]["lstm"]:
        args += [lp["w_ih_t"], lp["w_hh_t"], lp["b"]]
    args += [params["dec"]["fc_w_t"], params["dec"]["fc_b"]]

    in_specs = ([pl.BlockSpec(memory_space=_SMEM)]
                + [pl.BlockSpec(memory_space=_VMEM)] * (len(args) - 1))

    out_padded = pl.pallas_call(
        _make_seq2seq_kernel(N_LAYERS, HID_DIM, INPUT_DIM, OUTPUT_DIM, OUT_PAD,
                             src_len, trg_len, batch),
        out_shape=jax.ShapeDtypeStruct((trg_len, batch, OUT_PAD), jnp.float32),
        in_specs=in_specs,
        out_specs=pl.BlockSpec(memory_space=_VMEM),
    )(*args)
    return out_padded[:, :, :OUTPUT_DIM]                          # (T, B, V)


seq2seq_forward = jax.jit(_seq2seq_forward)


# ---------------- parameter init (deterministic, PyTorch-equivalent math) ----------------

def init_lstm_params(key, input_size, hidden_dim, n_layers):
    layers = []
    k = 1.0 / math.sqrt(hidden_dim)
    for l in range(n_layers):
        in_size = input_size if l == 0 else hidden_dim
        key, k1, k2, k3, k4 = jax.random.split(key, 5)
        w_ih = jax.random.uniform(k1, (4 * hidden_dim, in_size), jnp.float32, -k, k)
        w_hh = jax.random.uniform(k2, (4 * hidden_dim, hidden_dim), jnp.float32, -k, k)
        b_ih = jax.random.uniform(k3, (4 * hidden_dim,), jnp.float32, -k, k)
        b_hh = jax.random.uniform(k4, (4 * hidden_dim,), jnp.float32, -k, k)
        layers.append({
            # MXU operands stored as bf16 transposes; bias stays f32 (gate order i,f,g,o)
            "w_ih_t": w_ih.T.astype(jnp.bfloat16),          # (in, 4H)
            "w_hh_t": w_hh.T.astype(jnp.bfloat16),          # (H, 4H)
            "b": (b_ih + b_hh).reshape(1, -1),               # (1, 4H) f32
        })
    return layers, key


def init_params(key):
    key, ke, kd, kf1, kf2 = jax.random.split(key, 5)
    enc_emb = jax.random.normal(ke, (INPUT_DIM, EMB_DIM), jnp.float32)
    dec_emb = jax.random.normal(kd, (OUTPUT_DIM, EMB_DIM), jnp.float32)
    enc_lstm, key = init_lstm_params(key, EMB_DIM, HID_DIM, N_LAYERS)
    dec_lstm, key = init_lstm_params(key, EMB_DIM, HID_DIM, N_LAYERS)
    kf = 1.0 / math.sqrt(HID_DIM)
    fc_w = jax.random.uniform(kf1, (OUTPUT_DIM, HID_DIM), jnp.float32, -kf, kf)
    fc_b = jax.random.uniform(kf2, (OUTPUT_DIM,), jnp.float32, -kf, kf)
    # fc_out padded to 128 output lanes: zero weights + -1e30 bias on padded lanes
    fc_w_t_pad = jnp.zeros((HID_DIM, OUT_PAD), jnp.float32).at[:, :OUTPUT_DIM].set(fc_w.T)
    fc_b_pad = jnp.full((1, OUT_PAD), _NEG, jnp.float32).at[0, :OUTPUT_DIM].set(fc_b)
    return {
        "enc": {"embedding": enc_emb.astype(jnp.bfloat16), "lstm": enc_lstm},
        "dec": {"embedding": dec_emb.astype(jnp.bfloat16), "lstm": dec_lstm,
                "fc_w_t": fc_w_t_pad.astype(jnp.bfloat16), "fc_b": fc_b_pad},
    }


def make_force_mask(py_rng, trg_len, teacher_forcing_ratio):
    """Host-side stand-in for `random.random() < ratio` per decode step; passed as a traced
    array so jit does not bake the decisions into the compiled graph."""
    mask = [0]  # slot 0 unused (loop starts at t=1)
    for _ in range(1, trg_len):
        mask.append(1 if py_rng.random() < teacher_forcing_ratio else 0)
    return jnp.asarray(mask, dtype=jnp.int32)


if __name__ == "__main__":
    params = init_params(jax.random.PRNGKey(0))

    ksrc, ktrg = jax.random.split(jax.random.PRNGKey(1))
    src = jax.random.randint(ksrc, (SRC_LEN, BATCH), 0, INPUT_DIM, dtype=jnp.int32)
    trg = jax.random.randint(ktrg, (TRG_LEN, BATCH), 0, OUTPUT_DIM, dtype=jnp.int32)

    # deterministic stand-in for Python's random.random() teacher forcing
    py_rng = random.Random(0)
    force = make_force_mask(py_rng, TRG_LEN, teacher_forcing_ratio=0.5)

    out = seq2seq_forward(params, src, trg, force)
    out = jax.block_until_ready(out)
    assert out.shape == (TRG_LEN, BATCH, OUTPUT_DIM)
    assert bool(jnp.all(out[0] == 0.0))
    print("KERNEL_OK")
</pallas_src>

<mosaic_0001>
module attributes {stable_mosaic.version = 11 : i64} {
  func.func @kernel(%arg0: memref<8xi32, #tpu.memory_space<smem>>, %arg1: memref<48x1xi32, #tpu.memory_space<vmem>>, %arg2: memref<8x8xi32, #tpu.memory_space<vmem>>, %arg3: memref<32x32xbf16, #tpu.memory_space<vmem>>, %arg4: memref<32x32xbf16, #tpu.memory_space<vmem>>, %arg5: memref<32x128xbf16, #tpu.memory_space<vmem>>, %arg6: memref<32x128xbf16, #tpu.memory_space<vmem>>, %arg7: memref<1x128xf32, #tpu.memory_space<vmem>>, %arg8: memref<32x128xbf16, #tpu.memory_space<vmem>>, %arg9: memref<32x128xbf16, #tpu.memory_space<vmem>>, %arg10: memref<1x128xf32, #tpu.memory_space<vmem>>, %arg11: memref<32x128xbf16, #tpu.memory_space<vmem>>, %arg12: memref<32x128xbf16, #tpu.memory_space<vmem>>, %arg13: memref<1x128xf32, #tpu.memory_space<vmem>>, %arg14: memref<32x128xbf16, #tpu.memory_space<vmem>>, %arg15: memref<32x128xbf16, #tpu.memory_space<vmem>>, %arg16: memref<1x128xf32, #tpu.memory_space<vmem>>, %arg17: memref<32x128xbf16, #tpu.memory_space<vmem>>, %arg18: memref<1x128xf32, #tpu.memory_space<vmem>>, %arg19: memref<8x8x128xf32, #tpu.memory_space<vmem>>) attributes {dimension_semantics = [], scalar_prefetch = 0 : i64, scratch_operands = 0 : i64, tpu.core_type = #tpu.core_type<tc>} {
    %c0 = arith.constant 0 : index
    %c0_0 = arith.constant 0 : index
    %0 = vector.load %arg5[%c0, %c0_0] : memref<32x128xbf16, #tpu.memory_space<vmem>>, vector<32x128xbf16>
    %c0_1 = arith.constant 0 : index
    %c0_2 = arith.constant 0 : index
    %1 = vector.load %arg8[%c0_1, %c0_2] : memref<32x128xbf16, #tpu.memory_space<vmem>>, vector<32x128xbf16>
    %c0_3 = arith.constant 0 : index
    %c0_4 = arith.constant 0 : index
    %2 = vector.load %arg6[%c0_3, %c0_4] : memref<32x128xbf16, #tpu.memory_space<vmem>>, vector<32x128xbf16>
    %c0_5 = arith.constant 0 : index
    %c0_6 = arith.constant 0 : index
    %3 = vector.load %arg9[%c0_5, %c0_6] : memref<32x128xbf16, #tpu.memory_space<vmem>>, vector<32x128xbf16>
    %c0_7 = arith.constant 0 : index
    %c0_8 = arith.constant 0 : index
    %4 = vector.load %arg7[%c0_7, %c0_8] : memref<1x128xf32, #tpu.memory_space<vmem>>, vector<1x128xf32>
    %c0_9 = arith.constant 0 : index
    %c0_10 = arith.constant 0 : index
    %5 = vector.load %arg10[%c0_9, %c0_10] : memref<1x128xf32, #tpu.memory_space<vmem>>, vector<1x128xf32>
    %c0_11 = arith.constant 0 : index
    %c0_12 = arith.constant 0 : index
    %6 = vector.load %arg11[%c0_11, %c0_12] : memref<32x128xbf16, #tpu.memory_space<vmem>>, vector<32x128xbf16>
    %c0_13 = arith.constant 0 : index
    %c0_14 = arith.constant 0 : index
    %7 = vector.load %arg14[%c0_13, %c0_14] : memref<32x128xbf16, #tpu.memory_space<vmem>>, vector<32x128xbf16>
    %c0_15 = arith.constant 0 : index
    %c0_16 = arith.constant 0 : index
    %8 = vector.load %arg12[%c0_15, %c0_16] : memref<32x128xbf16, #tpu.memory_space<vmem>>, vector<32x128xbf16>
    %c0_17 = arith.constant 0 : index
    %c0_18 = arith.constant 0 : index
    %9 = vector.load %arg15[%c0_17, %c0_18] : memref<32x128xbf16, #tpu.memory_space<vmem>>, vector<32x128xbf16>
    %c0_19 = arith.constant 0 : index
    %c0_20 = arith.constant 0 : index
    %10 = vector.load %arg13[%c0_19, %c0_20] : memref<1x128xf32, #tpu.memory_space<vmem>>, vector<1x128xf32>
    %c0_21 = arith.constant 0 : index
    %c0_22 = arith.constant 0 : index
    %11 = vector.load %arg16[%c0_21, %c0_22] : memref<1x128xf32, #tpu.memory_space<vmem>>, vector<1x128xf32>
    %c0_23 = arith.constant 0 : index
    %c0_24 = arith.constant 0 : index
    %12 = vector.load %arg17[%c0_23, %c0_24] : memref<32x128xbf16, #tpu.memory_space<vmem>>, vector<32x128xbf16>
    %c0_25 = arith.constant 0 : index
    %c0_26 = arith.constant 0 : index
    %13 = vector.load %arg18[%c0_25, %c0_26] : memref<1x128xf32, #tpu.memory_space<vmem>>, vector<1x128xf32>
    %c0_27 = arith.constant 0 : index
    %c0_28 = arith.constant 0 : index
    %14 = vector.load %arg3[%c0_27, %c0_28] : memref<32x32xbf16, #tpu.memory_space<vmem>>, vector<32x32xbf16>
    %c0_29 = arith.constant 0 : index
    %c0_30 = arith.constant 0 : index
    %15 = vector.load %arg4[%c0_29, %c0_30] : memref<32x32xbf16, #tpu.memory_space<vmem>>, vector<32x32xbf16>
    %16 = tpu.iota {dimensions = array<i32: 1>} : vector<8x128xi32>
    %c64_i32 = arith.constant 64 : i32
    %17 = vector.broadcast %c64_i32 : i32 to vector<8x128xi32>
    %18 = arith.cmpi sge, %16, %17 : vector<8x128xi32>
    %c96_i32 = arith.constant 96 : i32
    %19 = vector.broadcast %c96_i32 : i32 to vector<8x128xi32>
    %20 = arith.cmpi slt, %16, %19 : vector<8x128xi32>
    %21 = arith.andi %18, %20 : vector<8x128xi1>
    %22 = tpu.iota {dimensions = array<i32: 1>} : vector<8x32xi32>
    %23 = tpu.iota {dimensions = array<i32: 1>} : vector<8x128xi32>
    %24 = arith.sitofp %23 : vector<8x128xi32> to vector<8x128xf32>
    %25 = tpu.iota {dimensions = array<i32: 1>} : vector<48x32xi32>
    %c0_31 = arith.constant 0 : index
    %c0_32 = arith.constant 0 : index
    %26 = vector.load %arg1[%c0_31, %c0_32] : memref<48x1xi32, #tpu.memory_space<vmem>>, vector<48x1xi32>
    %27 = vector.broadcast %26 : vector<48x1xi32> to vector<48x32xi32>
    %28 = arith.cmpi eq, %25, %27 : vector<48x32xi32>
    %29 = arith.extui %28 : vector<48x32xi1> to vector<48x32xi32>
    %30 = arith.sitofp %29 : vector<48x32xi32> to vector<48x32xf32>
    %31 = arith.truncf %30 : vector<48x32xf32> to vector<48x32xbf16>
    %cst = arith.constant dense<0.000000e+00> : vector<48x32xf32>
    %32 = tpu.matmul %31, %14, %cst {dimension_numbers = #tpu.dot_dimension_numbers<[1], [0], [0], [1], [0, 0, 1, 1], [], []>} : vector<48x32xbf16>, vector<32x32xbf16>, vector<48x32xf32> -> vector<48x32xf32>
    %33 = arith.truncf %32 : vector<48x32xf32> to vector<48x32xbf16>
    %cst_33 = arith.constant dense<0.000000e+00> : vector<48x128xf32>
    %34 = tpu.matmul %33, %0, %cst_33 {dimension_numbers = #tpu.dot_dimension_numbers<[1], [0], [0], [1], [0, 0, 1, 1], [], []>} : vector<48x32xbf16>, vector<32x128xbf16>, vector<48x128xf32> -> vector<48x128xf32>
    %cst_34 = arith.constant 0.000000e+00 : f32
    %35 = vector.broadcast %cst_34 : f32 to vector<8x32xf32>
    %cst_35 = arith.constant 0.000000e+00 : f32
    %36 = vector.broadcast %cst_35 : f32 to vector<8x32xf32>
    %cst_36 = arith.constant 0.000000e+00 : f32
    %37 = vector.broadcast %cst_36 : f32 to vector<8x32xf32>
    %cst_37 = arith.constant 0.000000e+00 : f32
    %38 = vector.broadcast %cst_37 : f32 to vector<8x32xf32>
    %39 = vector.extract_strided_slice %34 {offsets = [0, 0], sizes = [8, 128], strides = [1, 1]} : vector<48x128xf32> to vector<8x128xf32>
    %40 = arith.truncf %35 : vector<8x32xf32> to vector<8x32xbf16>
    %cst_38 = arith.constant dense<0.000000e+00> : vector<8x128xf32>
    %41 = tpu.matmul %40, %2, %cst_38 {dimension_numbers = #tpu.dot_dimension_numbers<[1], [0], [0], [1], [0, 0, 1, 1], [], []>} : vector<8x32xbf16>, vector<32x128xbf16>, vector<8x128xf32> -> vector<8x128xf32>
    %42 = arith.addf %39, %41 : vector<8x128xf32>
    %43 = vector.broadcast %4 : vector<1x128xf32> to vector<8x128xf32>
    %44 = arith.addf %42, %43 : vector<8x128xf32>
    %45 = arith.addf %44, %44 : vector<8x128xf32>
    %46 = arith.select %21, %45, %44 : vector<8x128xi1>, vector<8x128xf32>
    %47 = arith.negf %46 : vector<8x128xf32>
    %48 = math.exp %47 : vector<8x128xf32>
    %cst_39 = arith.constant 1.000000e+00 : f32
    %49 = vector.broadcast %cst_39 : f32 to vector<8x128xf32>
    %50 = arith.addf %49, %48 : vector<8x128xf32>
    %51 = arith.divf %49, %50 : vector<8x128xf32>
    %52 = arith.addf %51, %51 : vector<8x128xf32>
    %cst_40 = arith.constant 1.000000e+00 : f32
    %53 = vector.broadcast %cst_40 : f32 to vector<8x128xf32>
    %54 = arith.subf %52, %53 : vector<8x128xf32>
    %55 = arith.select %21, %54, %51 : vector<8x128xi1>, vector<8x128xf32>
    %56 = vector.extract_strided_slice %55 {offsets = [0, 0], sizes = [8, 32], strides = [1, 1]} : vector<8x128xf32> to vector<8x32xf32>
    %57 = vector.extract_strided_slice %55 {offsets = [0, 32], sizes = [8, 32], strides = [1, 1]} : vector<8x128xf32> to vector<8x32xf32>
    %58 = vector.extract_strided_slice %55 {offsets = [0, 64], sizes = [8, 32], strides = [1, 1]} : vector<8x128xf32> to vector<8x32xf32>
    %59 = vector.extract_strided_slice %55 {offsets = [0, 96], sizes = [8, 32], strides = [1, 1]} : vector<8x128xf32> to vector<8x32xf32>
    %60 = arith.mulf %57, %37 : vector<8x32xf32>
    %61 = arith.mulf %56, %58 : vector<8x32xf32>
    %62 = arith.addf %60, %61 : vector<8x32xf32>
    %63 = math.tanh %62 : vector<8x32xf32>
    %64 = arith.mulf %59, %63 : vector<8x32xf32>
    %65 = arith.truncf %64 : vector<8x32xf32> to vector<8x32xbf16>
    %cst_41 = arith.constant dense<0.000000e+00> : vector<8x128xf32>
    %66 = tpu.matmul %65, %1, %cst_41 {dimension_numbers = #tpu.dot_dimension_numbers<[1], [0], [0], [1], [0, 0, 1, 1], [], []>} : vector<8x32xbf16>, vector<32x128xbf16>, vector<8x128xf32> -> vector<8x128xf32>
    %67 = arith.truncf %36 : vector<8x32xf32> to vector<8x32xbf16>
    %cst_42 = arith.constant dense<0.000000e+00> : vector<8x128xf32>
    %68 = tpu.matmul %67, %3, %cst_42 {dimension_numbers = #tpu.dot_dimension_numbers<[1], [0], [0], [1], [0, 0, 1, 1], [], []>} : vector<8x32xbf16>, vector<32x128xbf16>, vector<8x128xf32> -> vector<8x128xf32>
    %69 = arith.addf %66, %68 : vector<8x128xf32>
    %70 = vector.broadcast %5 : vector<1x128xf32> to vector<8x128xf32>
    %71 = arith.addf %69, %70 : vector<8x128xf32>
    %72 = arith.addf %71, %71 : vector<8x128xf32>
    %73 = arith.select %21, %72, %71 : vector<8x128xi1>, vector<8x128xf32>
    %74 = arith.negf %73 : vector<8x128xf32>
    %75 = math.exp %74 : vector<8x128xf32>
    %cst_43 = arith.constant 1.000000e+00 : f32
    %76 = vector.broadcast %cst_43 : f32 to vector<8x128xf32>
    %77 = arith.addf %76, %75 : vector<8x128xf32>
    %78 = arith.divf %76, %77 : vector<8x128xf32>
    %79 = arith.addf %78, %78 : vector<8x128xf32>
    %cst_44 = arith.constant 1.000000e+00 : f32
    %80 = vector.broadcast %cst_44 : f32 to vector<8x128xf32>
    %81 = arith.subf %79, %80 : vector<8x128xf32>
    %82 = arith.select %21, %81, %78 : vector<8x128xi1>, vector<8x128xf32>
    %83 = vector.extract_strided_slice %82 {offsets = [0, 0], sizes = [8, 32], strides = [1, 1]} : vector<8x128xf32> to vector<8x32xf32>
    %84 = vector.extract_strided_slice %82 {offsets = [0, 32], sizes = [8, 32], strides = [1, 1]} : vector<8x128xf32> to vector<8x32xf32>
    %85 = vector.extract_strided_slice %82 {offsets = [0, 64], sizes = [8, 32], strides = [1, 1]} : vector<8x128xf32> to vector<8x32xf32>
    %86 = vector.extract_strided_slice %82 {offsets = [0, 96], sizes = [8, 32], strides = [1, 1]} : vector<8x128xf32> to vector<8x32xf32>
    %87 = arith.mulf %84, %38 : vector<8x32xf32>
    %88 = arith.mulf %83, %85 : vector<8x32xf32>
    %89 = arith.addf %87, %88 : vector<8x32xf32>
    %90 = math.tanh %89 : vector<8x32xf32>
    %91 = arith.mulf %86, %90 : vector<8x32xf32>
    %92 = vector.extract_strided_slice %34 {offsets = [8, 0], sizes = [8, 128], strides = [1, 1]} : vector<48x128xf32> to vector<8x128xf32>
    %93 = arith.truncf %64 : vector<8x32xf32> to vector<8x32xbf16>
    %cst_45 = arith.constant dense<0.000000e+00> : vector<8x128xf32>
    %94 = tpu.matmul %93, %2, %cst_45 {dimension_numbers = #tpu.dot_dimension_numbers<[1], [0], [0], [1], [0, 0, 1, 1], [], []>} : vector<8x32xbf16>, vector<32x128xbf16>, vector<8x128xf32> -> vector<8x128xf32>
    %95 = arith.addf %92, %94 : vector<8x128xf32>
    %96 = vector.broadcast %4 : vector<1x128xf32> to vector<8x128xf32>
    %97 = arith.addf %95, %96 : vector<8x128xf32>
    %98 = arith.addf %97, %97 : vector<8x128xf32>
    %99 = arith.select %21, %98, %97 : vector<8x128xi1>, vector<8x128xf32>
    %100 = arith.negf %99 : vector<8x128xf32>
    %101 = math.exp %100 : vector<8x128xf32>
    %cst_46 = arith.constant 1.000000e+00 : f32
    %102 = vector.broadcast %cst_46 : f32 to vector<8x128xf32>
    %103 = arith.addf %102, %101 : vector<8x128xf32>
    %104 = arith.divf %102, %103 : vector<8x128xf32>
    %105 = arith.addf %104, %104 : vector<8x128xf32>
    %cst_47 = arith.constant 1.000000e+00 : f32
    %106 = vector.broadcast %cst_47 : f32 to vector<8x128xf32>
    %107 = arith.subf %105, %106 : vector<8x128xf32>
    %108 = arith.select %21, %107, %104 : vector<8x128xi1>, vector<8x128xf32>
    %109 = vector.extract_strided_slice %108 {offsets = [0, 0], sizes = [8, 32], strides = [1, 1]} : vector<8x128xf32> to vector<8x32xf32>
    %110 = vector.extract_strided_slice %108 {offsets = [0, 32], sizes = [8, 32], strides = [1, 1]} : vector<8x128xf32> to vector<8x32xf32>
    %111 = vector.extract_strided_slice %108 {offsets = [0, 64], sizes = [8, 32], strides = [1, 1]} : vector<8x128xf32> to vector<8x32xf32>
    %112 = vector.extract_strided_slice %108 {offsets = [0, 96], sizes = [8, 32], strides = [1, 1]} : vector<8x128xf32> to vector<8x32xf32>
    %113 = arith.mulf %110, %62 : vector<8x32xf32>
    %114 = arith.mulf %109, %111 : vector<8x32xf32>
    %115 = arith.addf %113, %114 : vector<8x32xf32>
    %116 = math.tanh %115 : vector<8x32xf32>
    %117 = arith.mulf %112, %116 : vector<8x32xf32>
    %118 = arith.truncf %117 : vector<8x32xf32> to vector<8x32xbf16>
    %cst_48 = arith.constant dense<0.000000e+00> : vector<8x128xf32>
    %119 = tpu.matmul %118, %1, %cst_48 {dimension_numbers = #tpu.dot_dimension_numbers<[1], [0], [0], [1], [0, 0, 1, 1], [], []>} : vector<8x32xbf16>, vector<32x128xbf16>, vector<8x128xf32> -> vector<8x128xf32>
    %120 = arith.truncf %91 : vector<8x32xf32> to vector<8x32xbf16>
    %cst_49 = arith.constant dense<0.000000e+00> : vector<8x128xf32>
    %121 = tpu.matmul %120, %3, %cst_49 {dimension_numbers = #tpu.dot_dimension_numbers<[1], [0], [0], [1], [0, 0, 1, 1], [], []>} : vector<8x32xbf16>, vector<32x128xbf16>, vector<8x128xf32> -> vector<8x128xf32>
    %122 = arith.addf %119, %121 : vector<8x128xf32>
    %123 = vector.broadcast %5 : vector<1x128xf32> to vector<8x128xf32>
    %124 = arith.addf %122, %123 : vector<8x128xf32>
    %125 = arith.addf %124, %124 : vector<8x128xf32>
    %126 = arith.select %21, %125, %124 : vector<8x128xi1>, vector<8x128xf32>
    %127 = arith.negf %126 : vector<8x128xf32>
    %128 = math.exp %127 : vector<8x128xf32>
    %cst_50 = arith.constant 1.000000e+00 : f32
    %129 = vector.broadcast %cst_50 : f32 to vector<8x128xf32>
    %130 = arith.addf %129, %128 : vector<8x128xf32>
    %131 = arith.divf %129, %130 : vector<8x128xf32>
    %132 = arith.addf %131, %131 : vector<8x128xf32>
    %cst_51 = arith.constant 1.000000e+00 : f32
    %133 = vector.broadcast %cst_51 : f32 to vector<8x128xf32>
    %134 = arith.subf %132, %133 : vector<8x128xf32>
    %135 = arith.select %21, %134, %131 : vector<8x128xi1>, vector<8x128xf32>
    %136 = vector.extract_strided_slice %135 {offsets = [0, 0], sizes = [8, 32], strides = [1, 1]} : vector<8x128xf32> to vector<8x32xf32>
    %137 = vector.extract_strided_slice %135 {offsets = [0, 32], sizes = [8, 32], strides = [1, 1]} : vector<8x128xf32> to vector<8x32xf32>
    %138 = vector.extract_strided_slice %135 {offsets = [0, 64], sizes = [8, 32], strides = [1, 1]} : vector<8x128xf32> to vector<8x32xf32>
    %139 = vector.extract_strided_slice %135 {offsets = [0, 96], sizes = [8, 32], strides = [1, 1]} : vector<8x128xf32> to vector<8x32xf32>
    %140 = arith.mulf %137, %89 : vector<8x32xf32>
    %141 = arith.mulf %136, %138 : vector<8x32xf32>
    %142 = arith.addf %140, %141 : vector<8x32xf32>
    %143 = math.tanh %142 : vector<8x32xf32>
    %144 = arith.mulf %139, %143 : vector<8x32xf32>
    %145 = vector.extract_strided_slice %34 {offsets = [16, 0], sizes = [8, 128], strides = [1, 1]} : vector<48x128xf32> to vector<8x128xf32>
    %146 = arith.truncf %117 : vector<8x32xf32> to vector<8x32xbf16>
    %cst_52 = arith.constant dense<0.000000e+00> : vector<8x128xf32>
    %147 = tpu.matmul %146, %2, %cst_52 {dimension_numbers = #tpu.dot_dimension_numbers<[1], [0], [0], [1], [0, 0, 1, 1], [], []>} : vector<8x32xbf16>, vector<32x128xbf16>, vector<8x128xf32> -> vector<8x128xf32>
    %148 = arith.addf %145, %147 : vector<8x128xf32>
    %149 = vector.broadcast %4 : vector<1x128xf32> to vector<8x128xf32>
    %150 = arith.addf %148, %149 : vector<8x128xf32>
    %151 = arith.addf %150, %150 : vector<8x128xf32>
    %152 = arith.select %21, %151, %150 : vector<8x128xi1>, vector<8x128xf32>
    %153 = arith.negf %152 : vector<8x128xf32>
    %154 = math.exp %153 : vector<8x128xf32>
    %cst_53 = arith.constant 1.000000e+00 : f32
    %155 = vector.broadcast %cst_53 : f32 to vector<8x128xf32>
    %156 = arith.addf %155, %154 : vector<8x128xf32>
    %157 = arith.divf %155, %156 : vector<8x128xf32>
    %158 = arith.addf %157, %157 : vector<8x128xf32>
    %cst_54 = arith.constant 1.000000e+00 : f32
    %159 = vector.broadcast %cst_54 : f32 to vector<8x128xf32>
    %160 = arith.subf %158, %159 : vector<8x128xf32>
    %161 = arith.select %21, %160, %157 : vector<8x128xi1>, vector<8x128xf32>
    %162 = vector.extract_strided_slice %161 {offsets = [0, 0], sizes = [8, 32], strides = [1, 1]} : vector<8x128xf32> to vector<8x32xf32>
    %163 = vector.extract_strided_slice %161 {offsets = [0, 32], sizes = [8, 32], strides = [1, 1]} : vector<8x128xf32> to vector<8x32xf32>
    %164 = vector.extract_strided_slice %161 {offsets = [0, 64], sizes = [8, 32], strides = [1, 1]} : vector<8x128xf32> to vector<8x32xf32>
    %165 = vector.extract_strided_slice %161 {offsets = [0, 96], sizes = [8, 32], strides = [1, 1]} : vector<8x128xf32> to vector<8x32xf32>
    %166 = arith.mulf %163, %115 : vector<8x32xf32>
    %167 = arith.mulf %162, %164 : vector<8x32xf32>
    %168 = arith.addf %166, %167 : vector<8x32xf32>
    %169 = math.tanh %168 : vector<8x32xf32>
    %170 = arith.mulf %165, %169 : vector<8x32xf32>
    %171 = arith.truncf %170 : vector<8x32xf32> to vector<8x32xbf16>
    %cst_55 = arith.constant dense<0.000000e+00> : vector<8x128xf32>
    %172 = tpu.matmul %171, %1, %cst_55 {dimension_numbers = #tpu.dot_dimension_numbers<[1], [0], [0], [1], [0, 0, 1, 1], [], []>} : vector<8x32xbf16>, vector<32x128xbf16>, vector<8x128xf32> -> vector<8x128xf32>
    %173 = arith.truncf %144 : vector<8x32xf32> to vector<8x32xbf16>
    %cst_56 = arith.constant dense<0.000000e+00> : vector<8x128xf32>
    %174 = tpu.matmul %173, %3, %cst_56 {dimension_numbers = #tpu.dot_dimension_numbers<[1], [0], [0], [1], [0, 0, 1, 1], [], []>} : vector<8x32xbf16>, vector<32x128xbf16>, vector<8x128xf32> -> vector<8x128xf32>
    %175 = arith.addf %172, %174 : vector<8x128xf32>
    %176 = vector.broadcast %5 : vector<1x128xf32> to vector<8x128xf32>
    %177 = arith.addf %175, %176 : vector<8x128xf32>
    %178 = arith.addf %177, %177 : vector<8x128xf32>
    %179 = arith.select %21, %178, %177 : vector<8x128xi1>, vector<8x128xf32>
    %180 = arith.negf %179 : vector<8x128xf32>
    %181 = math.exp %180 : vector<8x128xf32>
    %cst_57 = arith.constant 1.000000e+00 : f32
    %182 = vector.broadcast %cst_57 : f32 to vector<8x128xf32>
    %183 = arith.addf %182, %181 : vector<8x128xf32>
    %184 = arith.divf %182, %183 : vector<8x128xf32>
    %185 = arith.addf %184, %184 : vector<8x128xf32>
    %cst_58 = arith.constant 1.000000e+00 : f32
    %186 = vector.broadcast %cst_58 : f32 to vector<8x128xf32>
    %187 = arith.subf %185, %186 : vector<8x128xf32>
    %188 = arith.select %21, %187, %184 : vector<8x128xi1>, vector<8x128xf32>
    %189 = vector.extract_strided_slice %188 {offsets = [0, 0], sizes = [8, 32], strides = [1, 1]} : vector<8x128xf32> to vector<8x32xf32>
    %190 = vector.extract_strided_slice %188 {offsets = [0, 32], sizes = [8, 32], strides = [1, 1]} : vector<8x128xf32> to vector<8x32xf32>
    %191 = vector.extract_strided_slice %188 {offsets = [0, 64], sizes = [8, 32], strides = [1, 1]} : vector<8x128xf32> to vector<8x32xf32>
    %192 = vector.extract_strided_slice %188 {offsets = [0, 96], sizes = [8, 32], strides = [1, 1]} : vector<8x128xf32> to vector<8x32xf32>
    %193 = arith.mulf %190, %142 : vector<8x32xf32>
    %194 = arith.mulf %189, %191 : vector<8x32xf32>
    %195 = arith.addf %193, %194 : vector<8x32xf32>
    %196 = math.tanh %195 : vector<8x32xf32>
    %197 = arith.mulf %192, %196 : vector<8x32xf32>
    %198 = vector.extract_strided_slice %34 {offsets = [24, 0], sizes = [8, 128], strides = [1, 1]} : vector<48x128xf32> to vector<8x128xf32>
    %199 = arith.truncf %170 : vector<8x32xf32> to vector<8x32xbf16>
    %cst_59 = arith.constant dense<0.000000e+00> : vector<8x128xf32>
    %200 = tpu.matmul %199, %2, %cst_59 {dimension_numbers = #tpu.dot_dimension_numbers<[1], [0], [0], [1], [0, 0, 1, 1], [], []>} : vector<8x32xbf16>, vector<32x128xbf16>, vector<8x128xf32> -> vector<8x128xf32>
    %201 = arith.addf %198, %200 : vector<8x128xf32>
    %202 = vector.broadcast %4 : vector<1x128xf32> to vector<8x128xf32>
    %203 = arith.addf %201, %202 : vector<8x128xf32>
    %204 = arith.addf %203, %203 : vector<8x128xf32>
    %205 = arith.select %21, %204, %203 : vector<8x128xi1>, vector<8x128xf32>
    %206 = arith.negf %205 : vector<8x128xf32>
    %207 = math.exp %206 : vector<8x128xf32>
    %cst_60 = arith.constant 1.000000e+00 : f32
    %208 = vector.broadcast %cst_60 : f32 to vector<8x128xf32>
    %209 = arith.addf %208, %207 : vector<8x128xf32>
    %210 = arith.divf %208, %209 : vector<8x128xf32>
    %211 = arith.addf %210, %210 : vector<8x128xf32>
    %cst_61 = arith.constant 1.000000e+00 : f32
    %212 = vector.broadcast %cst_61 : f32 to vector<8x128xf32>
    %213 = arith.subf %211, %212 : vector<8x128xf32>
    %214 = arith.select %21, %213, %210 : vector<8x128xi1>, vector<8x128xf32>
    %215 = vector.extract_strided_slice %214 {offsets = [0, 0], sizes = [8, 32], strides = [1, 1]} : vector<8x128xf32> to vector<8x32xf32>
    %216 = vector.extract_strided_slice %214 {offsets = [0, 32], sizes = [8, 32], strides = [1, 1]} : vector<8x128xf32> to vector<8x32xf32>
    %217 = vector.extract_strided_slice %214 {offsets = [0, 64], sizes = [8, 32], strides = [1, 1]} : vector<8x128xf32> to vector<8x32xf32>
    %218 = vector.extract_strided_slice %214 {offsets = [0, 96], sizes = [8, 32], strides = [1, 1]} : vector<8x128xf32> to vector<8x32xf32>
    %219 = arith.mulf %216, %168 : vector<8x32xf32>
    %220 = arith.mulf %215, %217 : vector<8x32xf32>
    %221 = arith.addf %219, %220 : vector<8x32xf32>
    %222 = math.tanh %221 : vector<8x32xf32>
    %223 = arith.mulf %218, %222 : vector<8x32xf32>
    %224 = arith.truncf %223 : vector<8x32xf32> to vector<8x32xbf16>
    %cst_62 = arith.constant dense<0.000000e+00> : vector<8x128xf32>
    %225 = tpu.matmul %224, %1, %cst_62 {dimension_numbers = #tpu.dot_dimension_numbers<[1], [0], [0], [1], [0, 0, 1, 1], [], []>} : vector<8x32xbf16>, vector<32x128xbf16>, vector<8x128xf32> -> vector<8x128xf32>
    %226 = arith.truncf %197 : vector<8x32xf32> to vector<8x32xbf16>
    %cst_63 = arith.constant dense<0.000000e+00> : vector<8x128xf32>
    %227 = tpu.matmul %226, %3, %cst_63 {dimension_numbers = #tpu.dot_dimension_numbers<[1], [0], [0], [1], [0, 0, 1, 1], [], []>} : vector<8x32xbf16>, vector<32x128xbf16>, vector<8x128xf32> -> vector<8x128xf32>
    %228 = arith.addf %225, %227 : vector<8x128xf32>
    %229 = vector.broadcast %5 : vector<1x128xf32> to vector<8x128xf32>
    %230 = arith.addf %228, %229 : vector<8x128xf32>
    %231 = arith.addf %230, %230 : vector<8x128xf32>
    %232 = arith.select %21, %231, %230 : vector<8x128xi1>, vector<8x128xf32>
    %233 = arith.negf %232 : vector<8x128xf32>
    %234 = math.exp %233 : vector<8x128xf32>
    %cst_64 = arith.constant 1.000000e+00 : f32
    %235 = vector.broadcast %cst_64 : f32 to vector<8x128xf32>
    %236 = arith.addf %235, %234 : vector<8x128xf32>
    %237 = arith.divf %235, %236 : vector<8x128xf32>
    %238 = arith.addf %237, %237 : vector<8x128xf32>
    %cst_65 = arith.constant 1.000000e+00 : f32
    %239 = vector.broadcast %cst_65 : f32 to vector<8x128xf32>
    %240 = arith.subf %238, %239 : vector<8x128xf32>
    %241 = arith.select %21, %240, %237 : vector<8x128xi1>, vector<8x128xf32>
    %242 = vector.extract_strided_slice %241 {offsets = [0, 0], sizes = [8, 32], strides = [1, 1]} : vector<8x128xf32> to vector<8x32xf32>
    %243 = vector.extract_strided_slice %241 {offsets = [0, 32], sizes = [8, 32], strides = [1, 1]} : vector<8x128xf32> to vector<8x32xf32>
    %244 = vector.extract_strided_slice %241 {offsets = [0, 64], sizes = [8, 32], strides = [1, 1]} : vector<8x128xf32> to vector<8x32xf32>
    %245 = vector.extract_strided_slice %241 {offsets = [0, 96], sizes = [8, 32], strides = [1, 1]} : vector<8x128xf32> to vector<8x32xf32>
    %246 = arith.mulf %243, %195 : vector<8x32xf32>
    %247 = arith.mulf %242, %244 : vector<8x32xf32>
    %248 = arith.addf %246, %247 : vector<8x32xf32>
    %249 = math.tanh %248 : vector<8x32xf32>
    %250 = arith.mulf %245, %249 : vector<8x32xf32>
    %251 = vector.extract_strided_slice %34 {offsets = [32, 0], sizes = [8, 128], strides = [1, 1]} : vector<48x128xf32> to vector<8x128xf32>
    %252 = arith.truncf %223 : vector<8x32xf32> to vector<8x32xbf16>
    %cst_66 = arith.constant dense<0.000000e+00> : vector<8x128xf32>
    %253 = tpu.matmul %252, %2, %cst_66 {dimension_numbers = #tpu.dot_dimension_numbers<[1], [0], [0], [1], [0, 0, 1, 1], [], []>} : vector<8x32xbf16>, vector<32x128xbf16>, vector<8x128xf32> -> vector<8x128xf32>
    %254 = arith.addf %251, %253 : vector<8x128xf32>
    %255 = vector.broadcast %4 : vector<1x128xf32> to vector<8x128xf32>
    %256 = arith.addf %254, %255 : vector<8x128xf32>
    %257 = arith.addf %256, %256 : vector<8x128xf32>
    %258 = arith.select %21, %257, %256 : vector<8x128xi1>, vector<8x128xf32>
    %259 = arith.negf %258 : vector<8x128xf32>
    %260 = math.exp %259 : vector<8x128xf32>
    %cst_67 = arith.constant 1.000000e+00 : f32
    %261 = vector.broadcast %cst_67 : f32 to vector<8x128xf32>
    %262 = arith.addf %261, %260 : vector<8x128xf32>
    %263 = arith.divf %261, %262 : vector<8x128xf32>
    %264 = arith.addf %263, %263 : vector<8x128xf32>
    %cst_68 = arith.constant 1.000000e+00 : f32
    %265 = vector.broadcast %cst_68 : f32 to vector<8x128xf32>
    %266 = arith.subf %264, %265 : vector<8x128xf32>
    %267 = arith.select %21, %266, %263 : vector<8x128xi1>, vector<8x128xf32>
    %268 = vector.extract_strided_slice %267 {offsets = [0, 0], sizes = [8, 32], strides = [1, 1]} : vector<8x128xf32> to vector<8x32xf32>
    %269 = vector.extract_strided_slice %267 {offsets = [0, 32], sizes = [8, 32], strides = [1, 1]} : vector<8x128xf32> to vector<8x32xf32>
    %270 = vector.extract_strided_slice %267 {offsets = [0, 64], sizes = [8, 32], strides = [1, 1]} : vector<8x128xf32> to vector<8x32xf32>
    %271 = vector.extract_strided_slice %267 {offsets = [0, 96], sizes = [8, 32], strides = [1, 1]} : vector<8x128xf32> to vector<8x32xf32>
    %272 = arith.mulf %269, %221 : vector<8x32xf32>
    %273 = arith.mulf %268, %270 : vector<8x32xf32>
    %274 = arith.addf %272, %273 : vector<8x32xf32>
    %275 = math.tanh %274 : vector<8x32xf32>
    %276 = arith.mulf %271, %275 : vector<8x32xf32>
    %277 = arith.truncf %276 : vector<8x32xf32> to vector<8x32xbf16>
    %cst_69 = arith.constant dense<0.000000e+00> : vector<8x128xf32>
    %278 = tpu.matmul %277, %1, %cst_69 {dimension_numbers = #tpu.dot_dimension_numbers<[1], [0], [0], [1], [0, 0, 1, 1], [], []>} : vector<8x32xbf16>, vector<32x128xbf16>, vector<8x128xf32> -> vector<8x128xf32>
    %279 = arith.truncf %250 : vector<8x32xf32> to vector<8x32xbf16>
    %cst_70 = arith.constant dense<0.000000e+00> : vector<8x128xf32>
    %280 = tpu.matmul %279, %3, %cst_70 {dimension_numbers = #tpu.dot_dimension_numbers<[1], [0], [0], [1], [0, 0, 1, 1], [], []>} : vector<8x32xbf16>, vector<32x128xbf16>, vector<8x128xf32> -> vector<8x128xf32>
    %281 = arith.addf %278, %280 : vector<8x128xf32>
    %282 = vector.broadcast %5 : vector<1x128xf32> to vector<8x128xf32>
    %283 = arith.addf %281, %282 : vector<8x128xf32>
    %284 = arith.addf %283, %283 : vector<8x128xf32>
    %285 = arith.select %21, %284, %283 : vector<8x128xi1>, vector<8x128xf32>
    %286 = arith.negf %285 : vector<8x128xf32>
    %287 = math.exp %286 : vector<8x128xf32>
    %cst_71 = arith.constant 1.000000e+00 : f32
    %288 = vector.broadcast %cst_71 : f32 to vector<8x128xf32>
    %289 = arith.addf %288, %287 : vector<8x128xf32>
    %290 = arith.divf %288, %289 : vector<8x128xf32>
    %291 = arith.addf %290, %290 : vector<8x128xf32>
    %cst_72 = arith.constant 1.000000e+00 : f32
    %292 = vector.broadcast %cst_72 : f32 to vector<8x128xf32>
    %293 = arith.subf %291, %292 : vector<8x128xf32>
    %294 = arith.select %21, %293, %290 : vector<8x128xi1>, vector<8x128xf32>
    %295 = vector.extract_strided_slice %294 {offsets = [0, 0], sizes = [8, 32], strides = [1, 1]} : vector<8x128xf32> to vector<8x32xf32>
    %296 = vector.extract_strided_slice %294 {offsets = [0, 32], sizes = [8, 32], strides = [1, 1]} : vector<8x128xf32> to vector<8x32xf32>
    %297 = vector.extract_strided_slice %294 {offsets = [0, 64], sizes = [8, 32], strides = [1, 1]} : vector<8x128xf32> to vector<8x32xf32>
    %298 = vector.extract_strided_slice %294 {offsets = [0, 96], sizes = [8, 32], strides = [1, 1]} : vector<8x128xf32> to vector<8x32xf32>
    %299 = arith.mulf %296, %248 : vector<8x32xf32>
    %300 = arith.mulf %295, %297 : vector<8x32xf32>
    %301 = arith.addf %299, %300 : vector<8x32xf32>
    %302 = math.tanh %301 : vector<8x32xf32>
    %303 = arith.mulf %298, %302 : vector<8x32xf32>
    %304 = vector.extract_strided_slice %34 {offsets = [40, 0], sizes = [8, 128], strides = [1, 1]} : vector<48x128xf32> to vector<8x128xf32>
    %305 = arith.truncf %276 : vector<8x32xf32> to vector<8x32xbf16>
    %cst_73 = arith.constant dense<0.000000e+00> : vector<8x128xf32>
    %306 = tpu.matmul %305, %2, %cst_73 {dimension_numbers = #tpu.dot_dimension_numbers<[1], [0], [0], [1], [0, 0, 1, 1], [], []>} : vector<8x32xbf16>, vector<32x128xbf16>, vector<8x128xf32> -> vector<8x128xf32>
    %307 = arith.addf %304, %306 : vector<8x128xf32>
    %308 = vector.broadcast %4 : vector<1x128xf32> to vector<8x128xf32>
    %309 = arith.addf %307, %308 : vector<8x128xf32>
    %310 = arith.addf %309, %309 : vector<8x128xf32>
    %311 = arith.select %21, %310, %309 : vector<8x128xi1>, vector<8x128xf32>
    %312 = arith.negf %311 : vector<8x128xf32>
    %313 = math.exp %312 : vector<8x128xf32>
    %cst_74 = arith.constant 1.000000e+00 : f32
    %314 = vector.broadcast %cst_74 : f32 to vector<8x128xf32>
    %315 = arith.addf %314, %313 : vector<8x128xf32>
    %316 = arith.divf %314, %315 : vector<8x128xf32>
    %317 = arith.addf %316, %316 : vector<8x128xf32>
    %cst_75 = arith.constant 1.000000e+00 : f32
    %318 = vector.broadcast %cst_75 : f32 to vector<8x128xf32>
    %319 = arith.subf %317, %318 : vector<8x128xf32>
    %320 = arith.select %21, %319, %316 : vector<8x128xi1>, vector<8x128xf32>
    %321 = vector.extract_strided_slice %320 {offsets = [0, 0], sizes = [8, 32], strides = [1, 1]} : vector<8x128xf32> to vector<8x32xf32>
    %322 = vector.extract_strided_slice %320 {offsets = [0, 32], sizes = [8, 32], strides = [1, 1]} : vector<8x128xf32> to vector<8x32xf32>
    %323 = vector.extract_strided_slice %320 {offsets = [0, 64], sizes = [8, 32], strides = [1, 1]} : vector<8x128xf32> to vector<8x32xf32>
    %324 = vector.extract_strided_slice %320 {offsets = [0, 96], sizes = [8, 32], strides = [1, 1]} : vector<8x128xf32> to vector<8x32xf32>
    %325 = arith.mulf %322, %274 : vector<8x32xf32>
    %326 = arith.mulf %321, %323 : vector<8x32xf32>
    %327 = arith.addf %325, %326 : vector<8x32xf32>
    %328 = math.tanh %327 : vector<8x32xf32>
    %329 = arith.mulf %324, %328 : vector<8x32xf32>
    %330 = arith.truncf %329 : vector<8x32xf32> to vector<8x32xbf16>
    %cst_76 = arith.constant dense<0.000000e+00> : vector<8x128xf32>
    %331 = tpu.matmul %330, %1, %cst_76 {dimension_numbers = #tpu.dot_dimension_numbers<[1], [0], [0], [1], [0, 0, 1, 1], [], []>} : vector<8x32xbf16>, vector<32x128xbf16>, vector<8x128xf32> -> vector<8x128xf32>
    %332 = arith.truncf %303 : vector<8x32xf32> to vector<8x32xbf16>
    %cst_77 = arith.constant dense<0.000000e+00> : vector<8x128xf32>
    %333 = tpu.matmul %332, %3, %cst_77 {dimension_numbers = #tpu.dot_dimension_numbers<[1], [0], [0], [1], [0, 0, 1, 1], [], []>} : vector<8x32xbf16>, vector<32x128xbf16>, vector<8x128xf32> -> vector<8x128xf32>
    %334 = arith.addf %331, %333 : vector<8x128xf32>
    %335 = vector.broadcast %5 : vector<1x128xf32> to vector<8x128xf32>
    %336 = arith.addf %334, %335 : vector<8x128xf32>
    %337 = arith.addf %336, %336 : vector<8x128xf32>
    %338 = arith.select %21, %337, %336 : vector<8x128xi1>, vector<8x128xf32>
    %339 = arith.negf %338 : vector<8x128xf32>
    %340 = math.exp %339 : vector<8x128xf32>
    %cst_78 = arith.constant 1.000000e+00 : f32
    %341 = vector.broadcast %cst_78 : f32 to vector<8x128xf32>
    %342 = arith.addf %341, %340 : vector<8x128xf32>
    %343 = arith.divf %341, %342 : vector<8x128xf32>
    %344 = arith.addf %343, %343 : vector<8x128xf32>
    %cst_79 = arith.constant 1.000000e+00 : f32
    %345 = vector.broadcast %cst_79 : f32 to vector<8x128xf32>
    %346 = arith.subf %344, %345 : vector<8x128xf32>
    %347 = arith.select %21, %346, %343 : vector<8x128xi1>, vector<8x128xf32>
    %348 = vector.extract_strided_slice %347 {offsets = [0, 0], sizes = [8, 32], strides = [1, 1]} : vector<8x128xf32> to vector<8x32xf32>
    %349 = vector.extract_strided_slice %347 {offsets = [0, 32], sizes = [8, 32], strides = [1, 1]} : vector<8x128xf32> to vector<8x32xf32>
    %350 = vector.extract_strided_slice %347 {offsets = [0, 64], sizes = [8, 32], strides = [1, 1]} : vector<8x128xf32> to vector<8x32xf32>
    %351 = vector.extract_strided_slice %347 {offsets = [0, 96], sizes = [8, 32], strides = [1, 1]} : vector<8x128xf32> to vector<8x32xf32>
    %352 = arith.mulf %349, %301 : vector<8x32xf32>
    %353 = arith.mulf %348, %350 : vector<8x32xf32>
    %354 = arith.addf %352, %353 : vector<8x32xf32>
    %355 = math.tanh %354 : vector<8x32xf32>
    %356 = arith.mulf %351, %355 : vector<8x32xf32>
    %cst_80 = arith.constant 0.000000e+00 : f32
    %357 = vector.broadcast %cst_80 : f32 to vector<8x128xf32>
    %c0_81 = arith.constant 0 : index
    %c0_82 = arith.constant 0 : index
    %c0_83 = arith.constant 0 : index
    %358 = vector.load %arg19[%c0_81, %c0_82, %c0_83] : memref<8x8x128xf32, #tpu.memory_space<vmem>>, vector<1x8x128xf32>
    %359 = vector.shape_cast %358 : vector<1x8x128xf32> to vector<8x128xf32>
    %360 = vector.shape_cast %357 : vector<8x128xf32> to vector<1x8x128xf32>
    tpu.vector_store %arg19[%c0_81, %c0_82, %c0_83], %360 {strides = array<i32>} : memref<8x8x128xf32, #tpu.memory_space<vmem>>, vector<1x8x128xf32>,
    %c0_84 = arith.constant 0 : index
    %c0_85 = arith.constant 0 : index
    %361 = vector.load %arg2[%c0_84, %c0_85] : memref<8x8xi32, #tpu.memory_space<vmem>>, vector<8x1xi32>
    %362 = vector.broadcast %361 : vector<8x1xi32> to vector<8x32xi32>
    %363 = arith.cmpi eq, %22, %362 : vector<8x32xi32>
    %364 = arith.extui %363 : vector<8x32xi1> to vector<8x32xi32>
    %365 = arith.sitofp %364 : vector<8x32xi32> to vector<8x32xf32>
    %366 = arith.truncf %365 : vector<8x32xf32> to vector<8x32xbf16>
    %cst_86 = arith.constant dense<0.000000e+00> : vector<8x32xf32>
    %367 = tpu.matmul %366, %15, %cst_86 {dimension_numbers = #tpu.dot_dimension_numbers<[1], [0], [0], [1], [0, 0, 1, 1], [], []>} : vector<8x32xbf16>, vector<32x32xbf16>, vector<8x32xf32> -> vector<8x32xf32>
    %368 = arith.truncf %367 : vector<8x32xf32> to vector<8x32xbf16>
    %cst_87 = arith.constant dense<0.000000e+00> : vector<8x128xf32>
    %369 = tpu.matmul %368, %6, %cst_87 {dimension_numbers = #tpu.dot_dimension_numbers<[1], [0], [0], [1], [0, 0, 1, 1], [], []>} : vector<8x32xbf16>, vector<32x128xbf16>, vector<8x128xf32> -> vector<8x128xf32>
    %370 = arith.truncf %329 : vector<8x32xf32> to vector<8x32xbf16>
    %cst_88 = arith.constant dense<0.000000e+00> : vector<8x128xf32>
    %371 = tpu.matmul %370, %8, %cst_88 {dimension_numbers = #tpu.dot_dimension_numbers<[1], [0], [0], [1], [0, 0, 1, 1], [], []>} : vector<8x32xbf16>, vector<32x128xbf16>, vector<8x128xf32> -> vector<8x128xf32>
    %372 = arith.addf %369, %371 : vector<8x128xf32>
    %373 = vector.broadcast %10 : vector<1x128xf32> to vector<8x128xf32>
    %374 = arith.addf %372, %373 : vector<8x128xf32>
    %375 = arith.addf %374, %374 : vector<8x128xf32>
    %376 = arith.select %21, %375, %374 : vector<8x128xi1>, vector<8x128xf32>
    %377 = arith.negf %376 : vector<8x128xf32>
    %378 = math.exp %377 : vector<8x128xf32>
    %cst_89 = arith.constant 1.000000e+00 : f32
    %379 = vector.broadcast %cst_89 : f32 to vector<8x128xf32>
    %380 = arith.addf %379, %378 : vector<8x128xf32>
    %381 = arith.divf %379, %380 : vector<8x128xf32>
    %382 = arith.addf %381, %381 : vector<8x128xf32>
    %cst_90 = arith.constant 1.000000e+00 : f32
    %383 = vector.broadcast %cst_90 : f32 to vector<8x128xf32>
    %384 = arith.subf %382, %383 : vector<8x128xf32>
    %385 = arith.select %21, %384, %381 : vector<8x128xi1>, vector<8x128xf32>
    %386 = vector.extract_strided_slice %385 {offsets = [0, 0], sizes = [8, 32], strides = [1, 1]} : vector<8x128xf32> to vector<8x32xf32>
    %387 = vector.extract_strided_slice %385 {offsets = [0, 32], sizes = [8, 32], strides = [1, 1]} : vector<8x128xf32> to vector<8x32xf32>
    %388 = vector.extract_strided_slice %385 {offsets = [0, 64], sizes = [8, 32], strides = [1, 1]} : vector<8x128xf32> to vector<8x32xf32>
    %389 = vector.extract_strided_slice %385 {offsets = [0, 96], sizes = [8, 32], strides = [1, 1]} : vector<8x128xf32> to vector<8x32xf32>
    %390 = arith.mulf %387, %327 : vector<8x32xf32>
    %391 = arith.mulf %386, %388 : vector<8x32xf32>
    %392 = arith.addf %390, %391 : vector<8x32xf32>
    %393 = math.tanh %392 : vector<8x32xf32>
    %394 = arith.mulf %389, %393 : vector<8x32xf32>
    %395 = arith.truncf %394 : vector<8x32xf32> to vector<8x32xbf16>
    %cst_91 = arith.constant dense<0.000000e+00> : vector<8x128xf32>
    %396 = tpu.matmul %395, %7, %cst_91 {dimension_numbers = #tpu.dot_dimension_numbers<[1], [0], [0], [1], [0, 0, 1, 1], [], []>} : vector<8x32xbf16>, vector<32x128xbf16>, vector<8x128xf32> -> vector<8x128xf32>
    %397 = arith.truncf %356 : vector<8x32xf32> to vector<8x32xbf16>
    %cst_92 = arith.constant dense<0.000000e+00> : vector<8x128xf32>
    %398 = tpu.matmul %397, %9, %cst_92 {dimension_numbers = #tpu.dot_dimension_numbers<[1], [0], [0], [1], [0, 0, 1, 1], [], []>} : vector<8x32xbf16>, vector<32x128xbf16>, vector<8x128xf32> -> vector<8x128xf32>
    %399 = arith.addf %396, %398 : vector<8x128xf32>
    %400 = vector.broadcast %11 : vector<1x128xf32> to vector<8x128xf32>
    %401 = arith.addf %399, %400 : vector<8x128xf32>
    %402 = arith.addf %401, %401 : vector<8x128xf32>
    %403 = arith.select %21, %402, %401 : vector<8x128xi1>, vector<8x128xf32>
    %404 = arith.negf %403 : vector<8x128xf32>
    %405 = math.exp %404 : vector<8x128xf32>
    %cst_93 = arith.constant 1.000000e+00 : f32
    %406 = vector.broadcast %cst_93 : f32 to vector<8x128xf32>
    %407 = arith.addf %406, %405 : vector<8x128xf32>
    %408 = arith.divf %406, %407 : vector<8x128xf32>
    %409 = arith.addf %408, %408 : vector<8x128xf32>
    %cst_94 = arith.constant 1.000000e+00 : f32
    %410 = vector.broadcast %cst_94 : f32 to vector<8x128xf32>
    %411 = arith.subf %409, %410 : vector<8x128xf32>
    %412 = arith.select %21, %411, %408 : vector<8x128xi1>, vector<8x128xf32>
    %413 = vector.extract_strided_slice %412 {offsets = [0, 0], sizes = [8, 32], strides = [1, 1]} : vector<8x128xf32> to vector<8x32xf32>
    %414 = vector.extract_strided_slice %412 {offsets = [0, 32], sizes = [8, 32], strides = [1, 1]} : vector<8x128xf32> to vector<8x32xf32>
    %415 = vector.extract_strided_slice %412 {offsets = [0, 64], sizes = [8, 32], strides = [1, 1]} : vector<8x128xf32> to vector<8x32xf32>
    %416 = vector.extract_strided_slice %412 {offsets = [0, 96], sizes = [8, 32], strides = [1, 1]} : vector<8x128xf32> to vector<8x32xf32>
    %417 = arith.mulf %414, %354 : vector<8x32xf32>
    %418 = arith.mulf %413, %415 : vector<8x32xf32>
    %419 = arith.addf %417, %418 : vector<8x32xf32>
    %420 = math.tanh %419 : vector<8x32xf32>
    %421 = arith.mulf %416, %420 : vector<8x32xf32>
    %422 = arith.truncf %421 : vector<8x32xf32> to vector<8x32xbf16>
    %cst_95 = arith.constant dense<0.000000e+00> : vector<8x128xf32>
    %423 = tpu.matmul %422, %12, %cst_95 {dimension_numbers = #tpu.dot_dimension_numbers<[1], [0], [0], [1], [0, 0, 1, 1], [], []>} : vector<8x32xbf16>, vector<32x128xbf16>, vector<8x128xf32> -> vector<8x128xf32>
    %424 = vector.broadcast %13 : vector<1x128xf32> to vector<8x128xf32>
    %425 = arith.addf %423, %424 : vector<8x128xf32>
    %c1 = arith.constant 1 : index
    %c0_96 = arith.constant 0 : index
    %c0_97 = arith.constant 0 : index
    %426 = vector.load %arg19[%c1, %c0_96, %c0_97] : memref<8x8x128xf32, #tpu.memory_space<vmem>>, vector<1x8x128xf32>
    %427 = vector.shape_cast %426 : vector<1x8x128xf32> to vector<8x128xf32>
    %428 = vector.shape_cast %425 : vector<8x128xf32> to vector<1x8x128xf32>
    tpu.vector_store %arg19[%c1, %c0_96, %c0_97], %428 {strides = array<i32>} : memref<8x8x128xf32, #tpu.memory_space<vmem>>, vector<1x8x128xf32>,
    %cst_98 = arith.constant dense<0xFF800000> : vector<8xf32>
    %429 = vector.multi_reduction <maximumf>, %425, %cst_98 [1] : vector<8x128xf32> to vector<8xf32>
    %430 = vector.shape_cast %429 : vector<8xf32> to vector<8x1xf32>
    %431 = vector.broadcast %430 : vector<8x1xf32> to vector<8x128xf32>
    %432 = arith.cmpf oeq, %425, %431 : vector<8x128xf32>
    %cst_99 = arith.constant 1.280000e+02 : f32
    %433 = vector.broadcast %cst_99 : f32 to vector<8x128xf32>
    %434 = arith.select %432, %24, %433 : vector<8x128xi1>, vector<8x128xf32>
    %cst_100 = arith.constant dense<0x7F800000> : vector<8xf32>
    %435 = vector.multi_reduction <minimumf>, %434, %cst_100 [1] : vector<8x128xf32> to vector<8xf32>
    %436 = vector.shape_cast %435 : vector<8xf32> to vector<8x1xf32>
    %437 = arith.fptosi %436 : vector<8x1xf32> to vector<8x1xi32>
    %c1_101 = arith.constant 1 : index
    %438 = memref.load %arg0[%c1_101] : memref<8xi32, #tpu.memory_space<smem>>
    %c0_102 = arith.constant 0 : index
    %c1_103 = arith.constant 1 : index
    %439 = vector.load %arg2[%c0_102, %c1_103] : memref<8x8xi32, #tpu.memory_space<vmem>>, vector<8x1xi32>
    %440 = vector.broadcast %438 : i32 to vector<8x1xi32>
    %441 = arith.muli %440, %439 : vector<8x1xi32>
    %c1_i32 = arith.constant 1 : i32
    %442 = arith.subi %c1_i32, %438 : i32
    %443 = vector.broadcast %442 : i32 to vector<8x1xi32>
    %444 = arith.muli %443, %437 : vector<8x1xi32>
    %445 = arith.addi %441, %444 : vector<8x1xi32>
    %446 = vector.broadcast %445 : vector<8x1xi32> to vector<8x32xi32>
    %447 = arith.cmpi eq, %22, %446 : vector<8x32xi32>
    %448 = arith.extui %447 : vector<8x32xi1> to vector<8x32xi32>
    %449 = arith.sitofp %448 : vector<8x32xi32> to vector<8x32xf32>
    %450 = arith.truncf %449 : vector<8x32xf32> to vector<8x32xbf16>
    %cst_104 = arith.constant dense<0.000000e+00> : vector<8x32xf32>
    %451 = tpu.matmul %450, %15, %cst_104 {dimension_numbers = #tpu.dot_dimension_numbers<[1], [0], [0], [1], [0, 0, 1, 1], [], []>} : vector<8x32xbf16>, vector<32x32xbf16>, vector<8x32xf32> -> vector<8x32xf32>
    %452 = arith.truncf %451 : vector<8x32xf32> to vector<8x32xbf16>
    %cst_105 = arith.constant dense<0.000000e+00> : vector<8x128xf32>
    %453 = tpu.matmul %452, %6, %cst_105 {dimension_numbers = #tpu.dot_dimension_numbers<[1], [0], [0], [1], [0, 0, 1, 1], [], []>} : vector<8x32xbf16>, vector<32x128xbf16>, vector<8x128xf32> -> vector<8x128xf32>
    %454 = arith.truncf %394 : vector<8x32xf32> to vector<8x32xbf16>
    %cst_106 = arith.constant dense<0.000000e+00> : vector<8x128xf32>
    %455 = tpu.matmul %454, %8, %cst_106 {dimension_numbers = #tpu.dot_dimension_numbers<[1], [0], [0], [1], [0, 0, 1, 1], [], []>} : vector<8x32xbf16>, vector<32x128xbf16>, vector<8x128xf32> -> vector<8x128xf32>
    %456 = arith.addf %453, %455 : vector<8x128xf32>
    %457 = vector.broadcast %10 : vector<1x128xf32> to vector<8x128xf32>
    %458 = arith.addf %456, %457 : vector<8x128xf32>
    %459 = arith.addf %458, %458 : vector<8x128xf32>
    %460 = arith.select %21, %459, %458 : vector<8x128xi1>, vector<8x128xf32>
    %461 = arith.negf %460 : vector<8x128xf32>
    %462 = math.exp %461 : vector<8x128xf32>
    %cst_107 = arith.constant 1.000000e+00 : f32
    %463 = vector.broadcast %cst_107 : f32 to vector<8x128xf32>
    %464 = arith.addf %463, %462 : vector<8x128xf32>
    %465 = arith.divf %463, %464 : vector<8x128xf32>
    %466 = arith.addf %465, %465 : vector<8x128xf32>
    %cst_108 = arith.constant 1.000000e+00 : f32
    %467 = vector.broadcast %cst_108 : f32 to vector<8x128xf32>
    %468 = arith.subf %466, %467 : vector<8x128xf32>
    %469 = arith.select %21, %468, %465 : vector<8x128xi1>, vector<8x128xf32>
    %470 = vector.extract_strided_slice %469 {offsets = [0, 0], sizes = [8, 32], strides = [1, 1]} : vector<8x128xf32> to vector<8x32xf32>
    %471 = vector.extract_strided_slice %469 {offsets = [0, 32], sizes = [8, 32], strides = [1, 1]} : vector<8x128xf32> to vector<8x32xf32>
    %472 = vector.extract_strided_slice %469 {offsets = [0, 64], sizes = [8, 32], strides = [1, 1]} : vector<8x128xf32> to vector<8x32xf32>
    %473 = vector.extract_strided_slice %469 {offsets = [0, 96], sizes = [8, 32], strides = [1, 1]} : vector<8x128xf32> to vector<8x32xf32>
    %474 = arith.mulf %471, %392 : vector<8x32xf32>
    %475 = arith.mulf %470, %472 : vector<8x32xf32>
    %476 = arith.addf %474, %475 : vector<8x32xf32>
    %477 = math.tanh %476 : vector<8x32xf32>
    %478 = arith.mulf %473, %477 : vector<8x32xf32>
    %479 = arith.truncf %478 : vector<8x32xf32> to vector<8x32xbf16>
    %cst_109 = arith.constant dense<0.000000e+00> : vector<8x128xf32>
    %480 = tpu.matmul %479, %7, %cst_109 {dimension_numbers = #tpu.dot_dimension_numbers<[1], [0], [0], [1], [0, 0, 1, 1], [], []>} : vector<8x32xbf16>, vector<32x128xbf16>, vector<8x128xf32> -> vector<8x128xf32>
    %481 = arith.truncf %421 : vector<8x32xf32> to vector<8x32xbf16>
    %cst_110 = arith.constant dense<0.000000e+00> : vector<8x128xf32>
    %482 = tpu.matmul %481, %9, %cst_110 {dimension_numbers = #tpu.dot_dimension_numbers<[1], [0], [0], [1], [0, 0, 1, 1], [], []>} : vector<8x32xbf16>, vector<32x128xbf16>, vector<8x128xf32> -> vector<8x128xf32>
    %483 = arith.addf %480, %482 : vector<8x128xf32>
    %484 = vector.broadcast %11 : vector<1x128xf32> to vector<8x128xf32>
    %485 = arith.addf %483, %484 : vector<8x128xf32>
    %486 = arith.addf %485, %485 : vector<8x128xf32>
    %487 = arith.select %21, %486, %485 : vector<8x128xi1>, vector<8x128xf32>
    %488 = arith.negf %487 : vector<8x128xf32>
    %489 = math.exp %488 : vector<8x128xf32>
    %cst_111 = arith.constant 1.000000e+00 : f32
    %490 = vector.broadcast %cst_111 : f32 to vector<8x128xf32>
    %491 = arith.addf %490, %489 : vector<8x128xf32>
    %492 = arith.divf %490, %491 : vector<8x128xf32>
    %493 = arith.addf %492, %492 : vector<8x128xf32>
    %cst_112 = arith.constant 1.000000e+00 : f32
    %494 = vector.broadcast %cst_112 : f32 to vector<8x128xf32>
    %495 = arith.subf %493, %494 : vector<8x128xf32>
    %496 = arith.select %21, %495, %492 : vector<8x128xi1>, vector<8x128xf32>
    %497 = vector.extract_strided_slice %496 {offsets = [0, 0], sizes = [8, 32], strides = [1, 1]} : vector<8x128xf32> to vector<8x32xf32>
    %498 = vector.extract_strided_slice %496 {offsets = [0, 32], sizes = [8, 32], strides = [1, 1]} : vector<8x128xf32> to vector<8x32xf32>
    %499 = vector.extract_strided_slice %496 {offsets = [0, 64], sizes = [8, 32], strides = [1, 1]} : vector<8x128xf32> to vector<8x32xf32>
    %500 = vector.extract_strided_slice %496 {offsets = [0, 96], sizes = [8, 32], strides = [1, 1]} : vector<8x128xf32> to vector<8x32xf32>
    %501 = arith.mulf %498, %419 : vector<8x32xf32>
    %502 = arith.mulf %497, %499 : vector<8x32xf32>
    %503 = arith.addf %501, %502 : vector<8x32xf32>
    %504 = math.tanh %503 : vector<8x32xf32>
    %505 = arith.mulf %500, %504 : vector<8x32xf32>
    %506 = arith.truncf %505 : vector<8x32xf32> to vector<8x32xbf16>
    %cst_113 = arith.constant dense<0.000000e+00> : vector<8x128xf32>
    %507 = tpu.matmul %506, %12, %cst_113 {dimension_numbers = #tpu.dot_dimension_numbers<[1], [0], [0], [1], [0, 0, 1, 1], [], []>} : vector<8x32xbf16>, vector<32x128xbf16>, vector<8x128xf32> -> vector<8x128xf32>
    %508 = vector.broadcast %13 : vector<1x128xf32> to vector<8x128xf32>
    %509 = arith.addf %507, %508 : vector<8x128xf32>
    %c2 = arith.constant 2 : index
    %c0_114 = arith.constant 0 : index
    %c0_115 = arith.constant 0 : index
    %510 = vector.load %arg19[%c2, %c0_114, %c0_115] : memref<8x8x128xf32, #tpu.memory_space<vmem>>, vector<1x8x128xf32>
    %511 = vector.shape_cast %510 : vector<1x8x128xf32> to vector<8x128xf32>
    %512 = vector.shape_cast %509 : vector<8x128xf32> to vector<1x8x128xf32>
    tpu.vector_store %arg19[%c2, %c0_114, %c0_115], %512 {strides = array<i32>} : memref<8x8x128xf32, #tpu.memory_space<vmem>>, vector<1x8x128xf32>,
    %cst_116 = arith.constant dense<0xFF800000> : vector<8xf32>
    %513 = vector.multi_reduction <maximumf>, %509, %cst_116 [1] : vector<8x128xf32> to vector<8xf32>
    %514 = vector.shape_cast %513 : vector<8xf32> to vector<8x1xf32>
    %515 = vector.broadcast %514 : vector<8x1xf32> to vector<8x128xf32>
    %516 = arith.cmpf oeq, %509, %515 : vector<8x128xf32>
    %cst_117 = arith.constant 1.280000e+02 : f32
    %517 = vector.broadcast %cst_117 : f32 to vector<8x128xf32>
    %518 = arith.select %516, %24, %517 : vector<8x128xi1>, vector<8x128xf32>
    %cst_118 = arith.constant dense<0x7F800000> : vector<8xf32>
    %519 = vector.multi_reduction <minimumf>, %518, %cst_118 [1] : vector<8x128xf32> to vector<8xf32>
    %520 = vector.shape_cast %519 : vector<8xf32> to vector<8x1xf32>
    %521 = arith.fptosi %520 : vector<8x1xf32> to vector<8x1xi32>
    %c2_119 = arith.constant 2 : index
    %522 = memref.load %arg0[%c2_119] : memref<8xi32, #tpu.memory_space<smem>>
    %c0_120 = arith.constant 0 : index
    %c2_121 = arith.constant 2 : index
    %523 = vector.load %arg2[%c0_120, %c2_121] : memref<8x8xi32, #tpu.memory_space<vmem>>, vector<8x1xi32>
    %524 = vector.broadcast %522 : i32 to vector<8x1xi32>
    %525 = arith.muli %524, %523 : vector<8x1xi32>
    %c1_i32_122 = arith.constant 1 : i32
    %526 = arith.subi %c1_i32_122, %522 : i32
    %527 = vector.broadcast %526 : i32 to vector<8x1xi32>
    %528 = arith.muli %527, %521 : vector<8x1xi32>
    %529 = arith.addi %525, %528 : vector<8x1xi32>
    %530 = vector.broadcast %529 : vector<8x1xi32> to vector<8x32xi32>
    %531 = arith.cmpi eq, %22, %530 : vector<8x32xi32>
    %532 = arith.extui %531 : vector<8x32xi1> to vector<8x32xi32>
    %533 = arith.sitofp %532 : vector<8x32xi32> to vector<8x32xf32>
    %534 = arith.truncf %533 : vector<8x32xf32> to vector<8x32xbf16>
    %cst_123 = arith.constant dense<0.000000e+00> : vector<8x32xf32>
    %535 = tpu.matmul %534, %15, %cst_123 {dimension_numbers = #tpu.dot_dimension_numbers<[1], [0], [0], [1], [0, 0, 1, 1], [], []>} : vector<8x32xbf16>, vector<32x32xbf16>, vector<8x32xf32> -> vector<8x32xf32>
    %536 = arith.truncf %535 : vector<8x32xf32> to vector<8x32xbf16>
    %cst_124 = arith.constant dense<0.000000e+00> : vector<8x128xf32>
    %537 = tpu.matmul %536, %6, %cst_124 {dimension_numbers = #tpu.dot_dimension_numbers<[1], [0], [0], [1], [0, 0, 1, 1], [], []>} : vector<8x32xbf16>, vector<32x128xbf16>, vector<8x128xf32> -> vector<8x128xf32>
    %538 = arith.truncf %478 : vector<8x32xf32> to vector<8x32xbf16>
    %cst_125 = arith.constant dense<0.000000e+00> : vector<8x128xf32>
    %539 = tpu.matmul %538, %8, %cst_125 {dimension_numbers = #tpu.dot_dimension_numbers<[1], [0], [0], [1], [0, 0, 1, 1], [], []>} : vector<8x32xbf16>, vector<32x128xbf16>, vector<8x128xf32> -> vector<8x128xf32>
    %540 = arith.addf %537, %539 : vector<8x128xf32>
    %541 = vector.broadcast %10 : vector<1x128xf32> to vector<8x128xf32>
    %542 = arith.addf %540, %541 : vector<8x128xf32>
    %543 = arith.addf %542, %542 : vector<8x128xf32>
    %544 = arith.select %21, %543, %542 : vector<8x128xi1>, vector<8x128xf32>
    %545 = arith.negf %544 : vector<8x128xf32>
    %546 = math.exp %545 : vector<8x128xf32>
    %cst_126 = arith.constant 1.000000e+00 : f32
    %547 = vector.broadcast %cst_126 : f32 to vector<8x128xf32>
    %548 = arith.addf %547, %546 : vector<8x128xf32>
    %549 = arith.divf %547, %548 : vector<8x128xf32>
    %550 = arith.addf %549, %549 : vector<8x128xf32>
    %cst_127 = arith.constant 1.000000e+00 : f32
    %551 = vector.broadcast %cst_127 : f32 to vector<8x128xf32>
    %552 = arith.subf %550, %551 : vector<8x128xf32>
    %553 = arith.select %21, %552, %549 : vector<8x128xi1>, vector<8x128xf32>
    %554 = vector.extract_strided_slice %553 {offsets = [0, 0], sizes = [8, 32], strides = [1, 1]} : vector<8x128xf32> to vector<8x32xf32>
    %555 = vector.extract_strided_slice %553 {offsets = [0, 32], sizes = [8, 32], strides = [1, 1]} : vector<8x128xf32> to vector<8x32xf32>
    %556 = vector.extract_strided_slice %553 {offsets = [0, 64], sizes = [8, 32], strides = [1, 1]} : vector<8x128xf32> to vector<8x32xf32>
    %557 = vector.extract_strided_slice %553 {offsets = [0, 96], sizes = [8, 32], strides = [1, 1]} : vector<8x128xf32> to vector<8x32xf32>
    %558 = arith.mulf %555, %476 : vector<8x32xf32>
    %559 = arith.mulf %554, %556 : vector<8x32xf32>
    %560 = arith.addf %558, %559 : vector<8x32xf32>
    %561 = math.tanh %560 : vector<8x32xf32>
    %562 = arith.mulf %557, %561 : vector<8x32xf32>
    %563 = arith.truncf %562 : vector<8x32xf32> to vector<8x32xbf16>
    %cst_128 = arith.constant dense<0.000000e+00> : vector<8x128xf32>
    %564 = tpu.matmul %563, %7, %cst_128 {dimension_numbers = #tpu.dot_dimension_numbers<[1], [0], [0], [1], [0, 0, 1, 1], [], []>} : vector<8x32xbf16>, vector<32x128xbf16>, vector<8x128xf32> -> vector<8x128xf32>
    %565 = arith.truncf %505 : vector<8x32xf32> to vector<8x32xbf16>
    %cst_129 = arith.constant dense<0.000000e+00> : vector<8x128xf32>
    %566 = tpu.matmul %565, %9, %cst_129 {dimension_numbers = #tpu.dot_dimension_numbers<[1], [0], [0], [1], [0, 0, 1, 1], [], []>} : vector<8x32xbf16>, vector<32x128xbf16>, vector<8x128xf32> -> vector<8x128xf32>
    %567 = arith.addf %564, %566 : vector<8x128xf32>
    %568 = vector.broadcast %11 : vector<1x128xf32> to vector<8x128xf32>
    %569 = arith.addf %567, %568 : vector<8x128xf32>
    %570 = arith.addf %569, %569 : vector<8x128xf32>
    %571 = arith.select %21, %570, %569 : vector<8x128xi1>, vector<8x128xf32>
    %572 = arith.negf %571 : vector<8x128xf32>
    %573 = math.exp %572 : vector<8x128xf32>
    %cst_130 = arith.constant 1.000000e+00 : f32
    %574 = vector.broadcast %cst_130 : f32 to vector<8x128xf32>
    %575 = arith.addf %574, %573 : vector<8x128xf32>
    %576 = arith.divf %574, %575 : vector<8x128xf32>
    %577 = arith.addf %576, %576 : vector<8x128xf32>
    %cst_131 = arith.constant 1.000000e+00 : f32
    %578 = vector.broadcast %cst_131 : f32 to vector<8x128xf32>
    %579 = arith.subf %577, %578 : vector<8x128xf32>
    %580 = arith.select %21, %579, %576 : vector<8x128xi1>, vector<8x128xf32>
    %581 = vector.extract_strided_slice %580 {offsets = [0, 0], sizes = [8, 32], strides = [1, 1]} : vector<8x128xf32> to vector<8x32xf32>
    %582 = vector.extract_strided_slice %580 {offsets = [0, 32], sizes = [8, 32], strides = [1, 1]} : vector<8x128xf32> to vector<8x32xf32>
    %583 = vector.extract_strided_slice %580 {offsets = [0, 64], sizes = [8, 32], strides = [1, 1]} : vector<8x128xf32> to vector<8x32xf32>
    %584 = vector.extract_strided_slice %580 {offsets = [0, 96], sizes = [8, 32], strides = [1, 1]} : vector<8x128xf32> to vector<8x32xf32>
    %585 = arith.mulf %582, %503 : vector<8x32xf32>
    %586 = arith.mulf %581, %583 : vector<8x32xf32>
    %587 = arith.addf %585, %586 : vector<8x32xf32>
    %588 = math.tanh %587 : vector<8x32xf32>
    %589 = arith.mulf %584, %588 : vector<8x32xf32>
    %590 = arith.truncf %589 : vector<8x32xf32> to vector<8x32xbf16>
    %cst_132 = arith.constant dense<0.000000e+00> : vector<8x128xf32>
    %591 = tpu.matmul %590, %12, %cst_132 {dimension_numbers = #tpu.dot_dimension_numbers<[1], [0], [0], [1], [0, 0, 1, 1], [], []>} : vector<8x32xbf16>, vector<32x128xbf16>, vector<8x128xf32> -> vector<8x128xf32>
    %592 = vector.broadcast %13 : vector<1x128xf32> to vector<8x128xf32>
    %593 = arith.addf %591, %592 : vector<8x128xf32>
    %c3 = arith.constant 3 : index
    %c0_133 = arith.constant 0 : index
    %c0_134 = arith.constant 0 : index
    %594 = vector.load %arg19[%c3, %c0_133, %c0_134] : memref<8x8x128xf32, #tpu.memory_space<vmem>>, vector<1x8x128xf32>
    %595 = vector.shape_cast %594 : vector<1x8x128xf32> to vector<8x128xf32>
    %596 = vector.shape_cast %593 : vector<8x128xf32> to vector<1x8x128xf32>
    tpu.vector_store %arg19[%c3, %c0_133, %c0_134], %596 {strides = array<i32>} : memref<8x8x128xf32, #tpu.memory_space<vmem>>, vector<1x8x128xf32>,
    %cst_135 = arith.constant dense<0xFF800000> : vector<8xf32>
    %597 = vector.multi_reduction <maximumf>, %593, %cst_135 [1] : vector<8x128xf32> to vector<8xf32>
    %598 = vector.shape_cast %597 : vector<8xf32> to vector<8x1xf32>
    %599 = vector.broadcast %598 : vector<8x1xf32> to vector<8x128xf32>
    %600 = arith.cmpf oeq, %593, %599 : vector<8x128xf32>
    %cst_136 = arith.constant 1.280000e+02 : f32
    %601 = vector.broadcast %cst_136 : f32 to vector<8x128xf32>
    %602 = arith.select %600, %24, %601 : vector<8x128xi1>, vector<8x128xf32>
    %cst_137 = arith.constant dense<0x7F800000> : vector<8xf32>
    %603 = vector.multi_reduction <minimumf>, %602, %cst_137 [1] : vector<8x128xf32> to vector<8xf32>
    %604 = vector.shape_cast %603 : vector<8xf32> to vector<8x1xf32>
    %605 = arith.fptosi %604 : vector<8x1xf32> to vector<8x1xi32>
    %c3_138 = arith.constant 3 : index
    %606 = memref.load %arg0[%c3_138] : memref<8xi32, #tpu.memory_space<smem>>
    %c0_139 = arith.constant 0 : index
    %c3_140 = arith.constant 3 : index
    %607 = vector.load %arg2[%c0_139, %c3_140] : memref<8x8xi32, #tpu.memory_space<vmem>>, vector<8x1xi32>
    %608 = vector.broadcast %606 : i32 to vector<8x1xi32>
    %609 = arith.muli %608, %607 : vector<8x1xi32>
    %c1_i32_141 = arith.constant 1 : i32
    %610 = arith.subi %c1_i32_141, %606 : i32
    %611 = vector.broadcast %610 : i32 to vector<8x1xi32>
    %612 = arith.muli %611, %605 : vector<8x1xi32>
    %613 = arith.addi %609, %612 : vector<8x1xi32>
    %614 = vector.broadcast %613 : vector<8x1xi32> to vector<8x32xi32>
    %615 = arith.cmpi eq, %22, %614 : vector<8x32xi32>
    %616 = arith.extui %615 : vector<8x32xi1> to vector<8x32xi32>
    %617 = arith.sitofp %616 : vector<8x32xi32> to vector<8x32xf32>
    %618 = arith.truncf %617 : vector<8x32xf32> to vector<8x32xbf16>
    %cst_142 = arith.constant dense<0.000000e+00> : vector<8x32xf32>
    %619 = tpu.matmul %618, %15, %cst_142 {dimension_numbers = #tpu.dot_dimension_numbers<[1], [0], [0], [1], [0, 0, 1, 1], [], []>} : vector<8x32xbf16>, vector<32x32xbf16>, vector<8x32xf32> -> vector<8x32xf32>
    %620 = arith.truncf %619 : vector<8x32xf32> to vector<8x32xbf16>
    %cst_143 = arith.constant dense<0.000000e+00> : vector<8x128xf32>
    %621 = tpu.matmul %620, %6, %cst_143 {dimension_numbers = #tpu.dot_dimension_numbers<[1], [0], [0], [1], [0, 0, 1, 1], [], []>} : vector<8x32xbf16>, vector<32x128xbf16>, vector<8x128xf32> -> vector<8x128xf32>
    %622 = arith.truncf %562 : vector<8x32xf32> to vector<8x32xbf16>
    %cst_144 = arith.constant dense<0.000000e+00> : vector<8x128xf32>
    %623 = tpu.matmul %622, %8, %cst_144 {dimension_numbers = #tpu.dot_dimension_numbers<[1], [0], [0], [1], [0, 0, 1, 1], [], []>} : vector<8x32xbf16>, vector<32x128xbf16>, vector<8x128xf32> -> vector<8x128xf32>
    %624 = arith.addf %621, %623 : vector<8x128xf32>
    %625 = vector.broadcast %10 : vector<1x128xf32> to vector<8x128xf32>
    %626 = arith.addf %624, %625 : vector<8x128xf32>
    %627 = arith.addf %626, %626 : vector<8x128xf32>
    %628 = arith.select %21, %627, %626 : vector<8x128xi1>, vector<8x128xf32>
    %629 = arith.negf %628 : vector<8x128xf32>
    %630 = math.exp %629 : vector<8x128xf32>
    %cst_145 = arith.constant 1.000000e+00 : f32
    %631 = vector.broadcast %cst_145 : f32 to vector<8x128xf32>
    %632 = arith.addf %631, %630 : vector<8x128xf32>
    %633 = arith.divf %631, %632 : vector<8x128xf32>
    %634 = arith.addf %633, %633 : vector<8x128xf32>
    %cst_146 = arith.constant 1.000000e+00 : f32
    %635 = vector.broadcast %cst_146 : f32 to vector<8x128xf32>
    %636 = arith.subf %634, %635 : vector<8x128xf32>
    %637 = arith.select %21, %636, %633 : vector<8x128xi1>, vector<8x128xf32>
    %638 = vector.extract_strided_slice %637 {offsets = [0, 0], sizes = [8, 32], strides = [1, 1]} : vector<8x128xf32> to vector<8x32xf32>
    %639 = vector.extract_strided_slice %637 {offsets = [0, 32], sizes = [8, 32], strides = [1, 1]} : vector<8x128xf32> to vector<8x32xf32>
    %640 = vector.extract_strided_slice %637 {offsets = [0, 64], sizes = [8, 32], strides = [1, 1]} : vector<8x128xf32> to vector<8x32xf32>
    %641 = vector.extract_strided_slice %637 {offsets = [0, 96], sizes = [8, 32], strides = [1, 1]} : vector<8x128xf32> to vector<8x32xf32>
    %642 = arith.mulf %639, %560 : vector<8x32xf32>
    %643 = arith.mulf %638, %640 : vector<8x32xf32>
    %644 = arith.addf %642, %643 : vector<8x32xf32>
    %645 = math.tanh %644 : vector<8x32xf32>
    %646 = arith.mulf %641, %645 : vector<8x32xf32>
    %647 = arith.truncf %646 : vector<8x32xf32> to vector<8x32xbf16>
    %cst_147 = arith.constant dense<0.000000e+00> : vector<8x128xf32>
    %648 = tpu.matmul %647, %7, %cst_147 {dimension_numbers = #tpu.dot_dimension_numbers<[1], [0], [0], [1], [0, 0, 1, 1], [], []>} : vector<8x32xbf16>, vector<32x128xbf16>, vector<8x128xf32> -> vector<8x128xf32>
    %649 = arith.truncf %589 : vector<8x32xf32> to vector<8x32xbf16>
    %cst_148 = arith.constant dense<0.000000e+00> : vector<8x128xf32>
    %650 = tpu.matmul %649, %9, %cst_148 {dimension_numbers = #tpu.dot_dimension_numbers<[1], [0], [0], [1], [0, 0, 1, 1], [], []>} : vector<8x32xbf16>, vector<32x128xbf16>, vector<8x128xf32> -> vector<8x128xf32>
    %651 = arith.addf %648, %650 : vector<8x128xf32>
    %652 = vector.broadcast %11 : vector<1x128xf32> to vector<8x128xf32>
    %653 = arith.addf %651, %652 : vector<8x128xf32>
    %654 = arith.addf %653, %653 : vector<8x128xf32>
    %655 = arith.select %21, %654, %653 : vector<8x128xi1>, vector<8x128xf32>
    %656 = arith.negf %655 : vector<8x128xf32>
    %657 = math.exp %656 : vector<8x128xf32>
    %cst_149 = arith.constant 1.000000e+00 : f32
    %658 = vector.broadcast %cst_149 : f32 to vector<8x128xf32>
    %659 = arith.addf %658, %657 : vector<8x128xf32>
    %660 = arith.divf %658, %659 : vector<8x128xf32>
    %661 = arith.addf %660, %660 : vector<8x128xf32>
    %cst_150 = arith.constant 1.000000e+00 : f32
    %662 = vector.broadcast %cst_150 : f32 to vector<8x128xf32>
    %663 = arith.subf %661, %662 : vector<8x128xf32>
    %664 = arith.select %21, %663, %660 : vector<8x128xi1>, vector<8x128xf32>
    %665 = vector.extract_strided_slice %664 {offsets = [0, 0], sizes = [8, 32], strides = [1, 1]} : vector<8x128xf32> to vector<8x32xf32>
    %666 = vector.extract_strided_slice %664 {offsets = [0, 32], sizes = [8, 32], strides = [1, 1]} : vector<8x128xf32> to vector<8x32xf32>
    %667 = vector.extract_strided_slice %664 {offsets = [0, 64], sizes = [8, 32], strides = [1, 1]} : vector<8x128xf32> to vector<8x32xf32>
    %668 = vector.extract_strided_slice %664 {offsets = [0, 96], sizes = [8, 32], strides = [1, 1]} : vector<8x128xf32> to vector<8x32xf32>
    %669 = arith.mulf %666, %587 : vector<8x32xf32>
    %670 = arith.mulf %665, %667 : vector<8x32xf32>
    %671 = arith.addf %669, %670 : vector<8x32xf32>
    %672 = math.tanh %671 : vector<8x32xf32>
    %673 = arith.mulf %668, %672 : vector<8x32xf32>
    %674 = arith.truncf %673 : vector<8x32xf32> to vector<8x32xbf16>
    %cst_151 = arith.constant dense<0.000000e+00> : vector<8x128xf32>
    %675 = tpu.matmul %674, %12, %cst_151 {dimension_numbers = #tpu.dot_dimension_numbers<[1], [0], [0], [1], [0, 0, 1, 1], [], []>} : vector<8x32xbf16>, vector<32x128xbf16>, vector<8x128xf32> -> vector<8x128xf32>
    %676 = vector.broadcast %13 : vector<1x128xf32> to vector<8x128xf32>
    %677 = arith.addf %675, %676 : vector<8x128xf32>
    %c4 = arith.constant 4 : index
    %c0_152 = arith.constant 0 : index
    %c0_153 = arith.constant 0 : index
    %678 = vector.load %arg19[%c4, %c0_152, %c0_153] : memref<8x8x128xf32, #tpu.memory_space<vmem>>, vector<1x8x128xf32>
    %679 = vector.shape_cast %678 : vector<1x8x128xf32> to vector<8x128xf32>
    %680 = vector.shape_cast %677 : vector<8x128xf32> to vector<1x8x128xf32>
    tpu.vector_store %arg19[%c4, %c0_152, %c0_153], %680 {strides = array<i32>} : memref<8x8x128xf32, #tpu.memory_space<vmem>>, vector<1x8x128xf32>,
    %cst_154 = arith.constant dense<0xFF800000> : vector<8xf32>
    %681 = vector.multi_reduction <maximumf>, %677, %cst_154 [1] : vector<8x128xf32> to vector<8xf32>
    %682 = vector.shape_cast %681 : vector<8xf32> to vector<8x1xf32>
    %683 = vector.broadcast %682 : vector<8x1xf32> to vector<8x128xf32>
    %684 = arith.cmpf oeq, %677, %683 : vector<8x128xf32>
    %cst_155 = arith.constant 1.280000e+02 : f32
    %685 = vector.broadcast %cst_155 : f32 to vector<8x128xf32>
    %686 = arith.select %684, %24, %685 : vector<8x128xi1>, vector<8x128xf32>
    %cst_156 = arith.constant dense<0x7F800000> : vector<8xf32>
    %687 = vector.multi_reduction <minimumf>, %686, %cst_156 [1] : vector<8x128xf32> to vector<8xf32>
    %688 = vector.shape_cast %687 : vector<8xf32> to vector<8x1xf32>
    %689 = arith.fptosi %688 : vector<8x1xf32> to vector<8x1xi32>
    %c4_157 = arith.constant 4 : index
    %690 = memref.load %arg0[%c4_157] : memref<8xi32, #tpu.memory_space<smem>>
    %c0_158 = arith.constant 0 : index
    %c4_159 = arith.constant 4 : index
    %691 = vector.load %arg2[%c0_158, %c4_159] : memref<8x8xi32, #tpu.memory_space<vmem>>, vector<8x1xi32>
    %692 = vector.broadcast %690 : i32 to vector<8x1xi32>
    %693 = arith.muli %692, %691 : vector<8x1xi32>
    %c1_i32_160 = arith.constant 1 : i32
    %694 = arith.subi %c1_i32_160, %690 : i32
    %695 = vector.broadcast %694 : i32 to vector<8x1xi32>
    %696 = arith.muli %695, %689 : vector<8x1xi32>
    %697 = arith.addi %693, %696 : vector<8x1xi32>
    %698 = vector.broadcast %697 : vector<8x1xi32> to vector<8x32xi32>
    %699 = arith.cmpi eq, %22, %698 : vector<8x32xi32>
    %700 = arith.extui %699 : vector<8x32xi1> to vector<8x32xi32>
    %701 = arith.sitofp %700 : vector<8x32xi32> to vector<8x32xf32>
    %702 = arith.truncf %701 : vector<8x32xf32> to vector<8x32xbf16>
    %cst_161 = arith.constant dense<0.000000e+00> : vector<8x32xf32>
    %703 = tpu.matmul %702, %15, %cst_161 {dimension_numbers = #tpu.dot_dimension_numbers<[1], [0], [0], [1], [0, 0, 1, 1], [], []>} : vector<8x32xbf16>, vector<32x32xbf16>, vector<8x32xf32> -> vector<8x32xf32>
    %704 = arith.truncf %703 : vector<8x32xf32> to vector<8x32xbf16>
    %cst_162 = arith.constant dense<0.000000e+00> : vector<8x128xf32>
    %705 = tpu.matmul %704, %6, %cst_162 {dimension_numbers = #tpu.dot_dimension_numbers<[1], [0], [0], [1], [0, 0, 1, 1], [], []>} : vector<8x32xbf16>, vector<32x128xbf16>, vector<8x128xf32> -> vector<8x128xf32>
    %706 = arith.truncf %646 : vector<8x32xf32> to vector<8x32xbf16>
    %cst_163 = arith.constant dense<0.000000e+00> : vector<8x128xf32>
    %707 = tpu.matmul %706, %8, %cst_163 {dimension_numbers = #tpu.dot_dimension_numbers<[1], [0], [0], [1], [0, 0, 1, 1], [], []>} : vector<8x32xbf16>, vector<32x128xbf16>, vector<8x128xf32> -> vector<8x128xf32>
    %708 = arith.addf %705, %707 : vector<8x128xf32>
    %709 = vector.broadcast %10 : vector<1x128xf32> to vector<8x128xf32>
    %710 = arith.addf %708, %709 : vector<8x128xf32>
    %711 = arith.addf %710, %710 : vector<8x128xf32>
    %712 = arith.select %21, %711, %710 : vector<8x128xi1>, vector<8x128xf32>
    %713 = arith.negf %712 : vector<8x128xf32>
    %714 = math.exp %713 : vector<8x128xf32>
    %cst_164 = arith.constant 1.000000e+00 : f32
    %715 = vector.broadcast %cst_164 : f32 to vector<8x128xf32>
    %716 = arith.addf %715, %714 : vector<8x128xf32>
    %717 = arith.divf %715, %716 : vector<8x128xf32>
    %718 = arith.addf %717, %717 : vector<8x128xf32>
    %cst_165 = arith.constant 1.000000e+00 : f32
    %719 = vector.broadcast %cst_165 : f32 to vector<8x128xf32>
    %720 = arith.subf %718, %719 : vector<8x128xf32>
    %721 = arith.select %21, %720, %717 : vector<8x128xi1>, vector<8x128xf32>
    %722 = vector.extract_strided_slice %721 {offsets = [0, 0], sizes = [8, 32], strides = [1, 1]} : vector<8x128xf32> to vector<8x32xf32>
    %723 = vector.extract_strided_slice %721 {offsets = [0, 32], sizes = [8, 32], strides = [1, 1]} : vector<8x128xf32> to vector<8x32xf32>
    %724 = vector.extract_strided_slice %721 {offsets = [0, 64], sizes = [8, 32], strides = [1, 1]} : vector<8x128xf32> to vector<8x32xf32>
    %725 = vector.extract_strided_slice %721 {offsets = [0, 96], sizes = [8, 32], strides = [1, 1]} : vector<8x128xf32> to vector<8x32xf32>
    %726 = arith.mulf %723, %644 : vector<8x32xf32>
    %727 = arith.mulf %722, %724 : vector<8x32xf32>
    %728 = arith.addf %726, %727 : vector<8x32xf32>
    %729 = math.tanh %728 : vector<8x32xf32>
    %730 = arith.mulf %725, %729 : vector<8x32xf32>
    %731 = arith.truncf %730 : vector<8x32xf32> to vector<8x32xbf16>
    %cst_166 = arith.constant dense<0.000000e+00> : vector<8x128xf32>
    %732 = tpu.matmul %731, %7, %cst_166 {dimension_numbers = #tpu.dot_dimension_numbers<[1], [0], [0], [1], [0, 0, 1, 1], [], []>} : vector<8x32xbf16>, vector<32x128xbf16>, vector<8x128xf32> -> vector<8x128xf32>
    %733 = arith.truncf %673 : vector<8x32xf32> to vector<8x32xbf16>
    %cst_167 = arith.constant dense<0.000000e+00> : vector<8x128xf32>
    %734 = tpu.matmul %733, %9, %cst_167 {dimension_numbers = #tpu.dot_dimension_numbers<[1], [0], [0], [1], [0, 0, 1, 1], [], []>} : vector<8x32xbf16>, vector<32x128xbf16>, vector<8x128xf32> -> vector<8x128xf32>
    %735 = arith.addf %732, %734 : vector<8x128xf32>
    %736 = vector.broadcast %11 : vector<1x128xf32> to vector<8x128xf32>
    %737 = arith.addf %735, %736 : vector<8x128xf32>
    %738 = arith.addf %737, %737 : vector<8x128xf32>
    %739 = arith.select %21, %738, %737 : vector<8x128xi1>, vector<8x128xf32>
    %740 = arith.negf %739 : vector<8x128xf32>
    %741 = math.exp %740 : vector<8x128xf32>
    %cst_168 = arith.constant 1.000000e+00 : f32
    %742 = vector.broadcast %cst_168 : f32 to vector<8x128xf32>
    %743 = arith.addf %742, %741 : vector<8x128xf32>
    %744 = arith.divf %742, %743 : vector<8x128xf32>
    %745 = arith.addf %744, %744 : vector<8x128xf32>
    %cst_169 = arith.constant 1.000000e+00 : f32
    %746 = vector.broadcast %cst_169 : f32 to vector<8x128xf32>
    %747 = arith.subf %745, %746 : vector<8x128xf32>
    %748 = arith.select %21, %747, %744 : vector<8x128xi1>, vector<8x128xf32>
    %749 = vector.extract_strided_slice %748 {offsets = [0, 0], sizes = [8, 32], strides = [1, 1]} : vector<8x128xf32> to vector<8x32xf32>
    %750 = vector.extract_strided_slice %748 {offsets = [0, 32], sizes = [8, 32], strides = [1, 1]} : vector<8x128xf32> to vector<8x32xf32>
    %751 = vector.extract_strided_slice %748 {offsets = [0, 64], sizes = [8, 32], strides = [1, 1]} : vector<8x128xf32> to vector<8x32xf32>
    %752 = vector.extract_strided_slice %748 {offsets = [0, 96], sizes = [8, 32], strides = [1, 1]} : vector<8x128xf32> to vector<8x32xf32>
    %753 = arith.mulf %750, %671 : vector<8x32xf32>
    %754 = arith.mulf %749, %751 : vector<8x32xf32>
    %755 = arith.addf %753, %754 : vector<8x32xf32>
    %756 = math.tanh %755 : vector<8x32xf32>
    %757 = arith.mulf %752, %756 : vector<8x32xf32>
    %758 = arith.truncf %757 : vector<8x32xf32> to vector<8x32xbf16>
    %cst_170 = arith.constant dense<0.000000e+00> : vector<8x128xf32>
    %759 = tpu.matmul %758, %12, %cst_170 {dimension_numbers = #tpu.dot_dimension_numbers<[1], [0], [0], [1], [0, 0, 1, 1], [], []>} : vector<8x32xbf16>, vector<32x128xbf16>, vector<8x128xf32> -> vector<8x128xf32>
    %760 = vector.broadcast %13 : vector<1x128xf32> to vector<8x128xf32>
    %761 = arith.addf %759, %760 : vector<8x128xf32>
    %c5 = arith.constant 5 : index
    %c0_171 = arith.constant 0 : index
    %c0_172 = arith.constant 0 : index
    %762 = vector.load %arg19[%c5, %c0_171, %c0_172] : memref<8x8x128xf32, #tpu.memory_space<vmem>>, vector<1x8x128xf32>
    %763 = vector.shape_cast %762 : vector<1x8x128xf32> to vector<8x128xf32>
    %764 = vector.shape_cast %761 : vector<8x128xf32> to vector<1x8x128xf32>
    tpu.vector_store %arg19[%c5, %c0_171, %c0_172], %764 {strides = array<i32>} : memref<8x8x128xf32, #tpu.memory_space<vmem>>, vector<1x8x128xf32>,
    %cst_173 = arith.constant dense<0xFF800000> : vector<8xf32>
    %765 = vector.multi_reduction <maximumf>, %761, %cst_173 [1] : vector<8x128xf32> to vector<8xf32>
    %766 = vector.shape_cast %765 : vector<8xf32> to vector<8x1xf32>
    %767 = vector.broadcast %766 : vector<8x1xf32> to vector<8x128xf32>
    %768 = arith.cmpf oeq, %761, %767 : vector<8x128xf32>
    %cst_174 = arith.constant 1.280000e+02 : f32
    %769 = vector.broadcast %cst_174 : f32 to vector<8x128xf32>
    %770 = arith.select %768, %24, %769 : vector<8x128xi1>, vector<8x128xf32>
    %cst_175 = arith.constant dense<0x7F800000> : vector<8xf32>
    %771 = vector.multi_reduction <minimumf>, %770, %cst_175 [1] : vector<8x128xf32> to vector<8xf32>
    %772 = vector.shape_cast %771 : vector<8xf32> to vector<8x1xf32>
    %773 = arith.fptosi %772 : vector<8x1xf32> to vector<8x1xi32>
    %c5_176 = arith.constant 5 : index
    %774 = memref.load %arg0[%c5_176] : memref<8xi32, #tpu.memory_space<smem>>
    %c0_177 = arith.constant 0 : index
    %c5_178 = arith.constant 5 : index
    %775 = vector.load %arg2[%c0_177, %c5_178] : memref<8x8xi32, #tpu.memory_space<vmem>>, vector<8x1xi32>
    %776 = vector.broadcast %774 : i32 to vector<8x1xi32>
    %777 = arith.muli %776, %775 : vector<8x1xi32>
    %c1_i32_179 = arith.constant 1 : i32
    %778 = arith.subi %c1_i32_179, %774 : i32
    %779 = vector.broadcast %778 : i32 to vector<8x1xi32>
    %780 = arith.muli %779, %773 : vector<8x1xi32>
    %781 = arith.addi %777, %780 : vector<8x1xi32>
    %782 = vector.broadcast %781 : vector<8x1xi32> to vector<8x32xi32>
    %783 = arith.cmpi eq, %22, %782 : vector<8x32xi32>
    %784 = arith.extui %783 : vector<8x32xi1> to vector<8x32xi32>
    %785 = arith.sitofp %784 : vector<8x32xi32> to vector<8x32xf32>
    %786 = arith.truncf %785 : vector<8x32xf32> to vector<8x32xbf16>
    %cst_180 = arith.constant dense<0.000000e+00> : vector<8x32xf32>
    %787 = tpu.matmul %786, %15, %cst_180 {dimension_numbers = #tpu.dot_dimension_numbers<[1], [0], [0], [1], [0, 0, 1, 1], [], []>} : vector<8x32xbf16>, vector<32x32xbf16>, vector<8x32xf32> -> vector<8x32xf32>
    %788 = arith.truncf %787 : vector<8x32xf32> to vector<8x32xbf16>
    %cst_181 = arith.constant dense<0.000000e+00> : vector<8x128xf32>
    %789 = tpu.matmul %788, %6, %cst_181 {dimension_numbers = #tpu.dot_dimension_numbers<[1], [0], [0], [1], [0, 0, 1, 1], [], []>} : vector<8x32xbf16>, vector<32x128xbf16>, vector<8x128xf32> -> vector<8x128xf32>
    %790 = arith.truncf %730 : vector<8x32xf32> to vector<8x32xbf16>
    %cst_182 = arith.constant dense<0.000000e+00> : vector<8x128xf32>
    %791 = tpu.matmul %790, %8, %cst_182 {dimension_numbers = #tpu.dot_dimension_numbers<[1], [0], [0], [1], [0, 0, 1, 1], [], []>} : vector<8x32xbf16>, vector<32x128xbf16>, vector<8x128xf32> -> vector<8x128xf32>
    %792 = arith.addf %789, %791 : vector<8x128xf32>
    %793 = vector.broadcast %10 : vector<1x128xf32> to vector<8x128xf32>
    %794 = arith.addf %792, %793 : vector<8x128xf32>
    %795 = arith.addf %794, %794 : vector<8x128xf32>
    %796 = arith.select %21, %795, %794 : vector<8x128xi1>, vector<8x128xf32>
    %797 = arith.negf %796 : vector<8x128xf32>
    %798 = math.exp %797 : vector<8x128xf32>
    %cst_183 = arith.constant 1.000000e+00 : f32
    %799 = vector.broadcast %cst_183 : f32 to vector<8x128xf32>
    %800 = arith.addf %799, %798 : vector<8x128xf32>
    %801 = arith.divf %799, %800 : vector<8x128xf32>
    %802 = arith.addf %801, %801 : vector<8x128xf32>
    %cst_184 = arith.constant 1.000000e+00 : f32
    %803 = vector.broadcast %cst_184 : f32 to vector<8x128xf32>
    %804 = arith.subf %802, %803 : vector<8x128xf32>
    %805 = arith.select %21, %804, %801 : vector<8x128xi1>, vector<8x128xf32>
    %806 = vector.extract_strided_slice %805 {offsets = [0, 0], sizes = [8, 32], strides = [1, 1]} : vector<8x128xf32> to vector<8x32xf32>
    %807 = vector.extract_strided_slice %805 {offsets = [0, 32], sizes = [8, 32], strides = [1, 1]} : vector<8x128xf32> to vector<8x32xf32>
    %808 = vector.extract_strided_slice %805 {offsets = [0, 64], sizes = [8, 32], strides = [1, 1]} : vector<8x128xf32> to vector<8x32xf32>
    %809 = vector.extract_strided_slice %805 {offsets = [0, 96], sizes = [8, 32], strides = [1, 1]} : vector<8x128xf32> to vector<8x32xf32>
    %810 = arith.mulf %807, %728 : vector<8x32xf32>
    %811 = arith.mulf %806, %808 : vector<8x32xf32>
    %812 = arith.addf %810, %811 : vector<8x32xf32>
    %813 = math.tanh %812 : vector<8x32xf32>
    %814 = arith.mulf %809, %813 : vector<8x32xf32>
    %815 = arith.truncf %814 : vector<8x32xf32> to vector<8x32xbf16>
    %cst_185 = arith.constant dense<0.000000e+00> : vector<8x128xf32>
    %816 = tpu.matmul %815, %7, %cst_185 {dimension_numbers = #tpu.dot_dimension_numbers<[1], [0], [0], [1], [0, 0, 1, 1], [], []>} : vector<8x32xbf16>, vector<32x128xbf16>, vector<8x128xf32> -> vector<8x128xf32>
    %817 = arith.truncf %757 : vector<8x32xf32> to vector<8x32xbf16>
    %cst_186 = arith.constant dense<0.000000e+00> : vector<8x128xf32>
    %818 = tpu.matmul %817, %9, %cst_186 {dimension_numbers = #tpu.dot_dimension_numbers<[1], [0], [0], [1], [0, 0, 1, 1], [], []>} : vector<8x32xbf16>, vector<32x128xbf16>, vector<8x128xf32> -> vector<8x128xf32>
    %819 = arith.addf %816, %818 : vector<8x128xf32>
    %820 = vector.broadcast %11 : vector<1x128xf32> to vector<8x128xf32>
    %821 = arith.addf %819, %820 : vector<8x128xf32>
    %822 = arith.addf %821, %821 : vector<8x128xf32>
    %823 = arith.select %21, %822, %821 : vector<8x128xi1>, vector<8x128xf32>
    %824 = arith.negf %823 : vector<8x128xf32>
    %825 = math.exp %824 : vector<8x128xf32>
    %cst_187 = arith.constant 1.000000e+00 : f32
    %826 = vector.broadcast %cst_187 : f32 to vector<8x128xf32>
    %827 = arith.addf %826, %825 : vector<8x128xf32>
    %828 = arith.divf %826, %827 : vector<8x128xf32>
    %829 = arith.addf %828, %828 : vector<8x128xf32>
    %cst_188 = arith.constant 1.000000e+00 : f32
    %830 = vector.broadcast %cst_188 : f32 to vector<8x128xf32>
    %831 = arith.subf %829, %830 : vector<8x128xf32>
    %832 = arith.select %21, %831, %828 : vector<8x128xi1>, vector<8x128xf32>
    %833 = vector.extract_strided_slice %832 {offsets = [0, 0], sizes = [8, 32], strides = [1, 1]} : vector<8x128xf32> to vector<8x32xf32>
    %834 = vector.extract_strided_slice %832 {offsets = [0, 32], sizes = [8, 32], strides = [1, 1]} : vector<8x128xf32> to vector<8x32xf32>
    %835 = vector.extract_strided_slice %832 {offsets = [0, 64], sizes = [8, 32], strides = [1, 1]} : vector<8x128xf32> to vector<8x32xf32>
    %836 = vector.extract_strided_slice %832 {offsets = [0, 96], sizes = [8, 32], strides = [1, 1]} : vector<8x128xf32> to vector<8x32xf32>
    %837 = arith.mulf %834, %755 : vector<8x32xf32>
    %838 = arith.mulf %833, %835 : vector<8x32xf32>
    %839 = arith.addf %837, %838 : vector<8x32xf32>
    %840 = math.tanh %839 : vector<8x32xf32>
    %841 = arith.mulf %836, %840 : vector<8x32xf32>
    %842 = arith.truncf %841 : vector<8x32xf32> to vector<8x32xbf16>
    %cst_189 = arith.constant dense<0.000000e+00> : vector<8x128xf32>
    %843 = tpu.matmul %842, %12, %cst_189 {dimension_numbers = #tpu.dot_dimension_numbers<[1], [0], [0], [1], [0, 0, 1, 1], [], []>} : vector<8x32xbf16>, vector<32x128xbf16>, vector<8x128xf32> -> vector<8x128xf32>
    %844 = vector.broadcast %13 : vector<1x128xf32> to vector<8x128xf32>
    %845 = arith.addf %843, %844 : vector<8x128xf32>
    %c6 = arith.constant 6 : index
    %c0_190 = arith.constant 0 : index
    %c0_191 = arith.constant 0 : index
    %846 = vector.load %arg19[%c6, %c0_190, %c0_191] : memref<8x8x128xf32, #tpu.memory_space<vmem>>, vector<1x8x128xf32>
    %847 = vector.shape_cast %846 : vector<1x8x128xf32> to vector<8x128xf32>
    %848 = vector.shape_cast %845 : vector<8x128xf32> to vector<1x8x128xf32>
    tpu.vector_store %arg19[%c6, %c0_190, %c0_191], %848 {strides = array<i32>} : memref<8x8x128xf32, #tpu.memory_space<vmem>>, vector<1x8x128xf32>,
    %cst_192 = arith.constant dense<0xFF800000> : vector<8xf32>
    %849 = vector.multi_reduction <maximumf>, %845, %cst_192 [1] : vector<8x128xf32> to vector<8xf32>
    %850 = vector.shape_cast %849 : vector<8xf32> to vector<8x1xf32>
    %851 = vector.broadcast %850 : vector<8x1xf32> to vector<8x128xf32>
    %852 = arith.cmpf oeq, %845, %851 : vector<8x128xf32>
    %cst_193 = arith.constant 1.280000e+02 : f32
    %853 = vector.broadcast %cst_193 : f32 to vector<8x128xf32>
    %854 = arith.select %852, %24, %853 : vector<8x128xi1>, vector<8x128xf32>
    %cst_194 = arith.constant dense<0x7F800000> : vector<8xf32>
    %855 = vector.multi_reduction <minimumf>, %854, %cst_194 [1] : vector<8x128xf32> to vector<8xf32>
    %856 = vector.shape_cast %855 : vector<8xf32> to vector<8x1xf32>
    %857 = arith.fptosi %856 : vector<8x1xf32> to vector<8x1xi32>
    %c6_195 = arith.constant 6 : index
    %858 = memref.load %arg0[%c6_195] : memref<8xi32, #tpu.memory_space<smem>>
    %c0_196 = arith.constant 0 : index
    %c6_197 = arith.constant 6 : index
    %859 = vector.load %arg2[%c0_196, %c6_197] : memref<8x8xi32, #tpu.memory_space<vmem>>, vector<8x1xi32>
    %860 = vector.broadcast %858 : i32 to vector<8x1xi32>
    %861 = arith.muli %860, %859 : vector<8x1xi32>
    %c1_i32_198 = arith.constant 1 : i32
    %862 = arith.subi %c1_i32_198, %858 : i32
    %863 = vector.broadcast %862 : i32 to vector<8x1xi32>
    %864 = arith.muli %863, %857 : vector<8x1xi32>
    %865 = arith.addi %861, %864 : vector<8x1xi32>
    %866 = vector.broadcast %865 : vector<8x1xi32> to vector<8x32xi32>
    %867 = arith.cmpi eq, %22, %866 : vector<8x32xi32>
    %868 = arith.extui %867 : vector<8x32xi1> to vector<8x32xi32>
    %869 = arith.sitofp %868 : vector<8x32xi32> to vector<8x32xf32>
    %870 = arith.truncf %869 : vector<8x32xf32> to vector<8x32xbf16>
    %cst_199 = arith.constant dense<0.000000e+00> : vector<8x32xf32>
    %871 = tpu.matmul %870, %15, %cst_199 {dimension_numbers = #tpu.dot_dimension_numbers<[1], [0], [0], [1], [0, 0, 1, 1], [], []>} : vector<8x32xbf16>, vector<32x32xbf16>, vector<8x32xf32> -> vector<8x32xf32>
    %872 = arith.truncf %871 : vector<8x32xf32> to vector<8x32xbf16>
    %cst_200 = arith.constant dense<0.000000e+00> : vector<8x128xf32>
    %873 = tpu.matmul %872, %6, %cst_200 {dimension_numbers = #tpu.dot_dimension_numbers<[1], [0], [0], [1], [0, 0, 1, 1], [], []>} : vector<8x32xbf16>, vector<32x128xbf16>, vector<8x128xf32> -> vector<8x128xf32>
    %874 = arith.truncf %814 : vector<8x32xf32> to vector<8x32xbf16>
    %cst_201 = arith.constant dense<0.000000e+00> : vector<8x128xf32>
    %875 = tpu.matmul %874, %8, %cst_201 {dimension_numbers = #tpu.dot_dimension_numbers<[1], [0], [0], [1], [0, 0, 1, 1], [], []>} : vector<8x32xbf16>, vector<32x128xbf16>, vector<8x128xf32> -> vector<8x128xf32>
    %876 = arith.addf %873, %875 : vector<8x128xf32>
    %877 = vector.broadcast %10 : vector<1x128xf32> to vector<8x128xf32>
    %878 = arith.addf %876, %877 : vector<8x128xf32>
    %879 = arith.addf %878, %878 : vector<8x128xf32>
    %880 = arith.select %21, %879, %878 : vector<8x128xi1>, vector<8x128xf32>
    %881 = arith.negf %880 : vector<8x128xf32>
    %882 = math.exp %881 : vector<8x128xf32>
    %cst_202 = arith.constant 1.000000e+00 : f32
    %883 = vector.broadcast %cst_202 : f32 to vector<8x128xf32>
    %884 = arith.addf %883, %882 : vector<8x128xf32>
    %885 = arith.divf %883, %884 : vector<8x128xf32>
    %886 = arith.addf %885, %885 : vector<8x128xf32>
    %cst_203 = arith.constant 1.000000e+00 : f32
    %887 = vector.broadcast %cst_203 : f32 to vector<8x128xf32>
    %888 = arith.subf %886, %887 : vector<8x128xf32>
    %889 = arith.select %21, %888, %885 : vector<8x128xi1>, vector<8x128xf32>
    %890 = vector.extract_strided_slice %889 {offsets = [0, 0], sizes = [8, 32], strides = [1, 1]} : vector<8x128xf32> to vector<8x32xf32>
    %891 = vector.extract_strided_slice %889 {offsets = [0, 32], sizes = [8, 32], strides = [1, 1]} : vector<8x128xf32> to vector<8x32xf32>
    %892 = vector.extract_strided_slice %889 {offsets = [0, 64], sizes = [8, 32], strides = [1, 1]} : vector<8x128xf32> to vector<8x32xf32>
    %893 = vector.extract_strided_slice %889 {offsets = [0, 96], sizes = [8, 32], strides = [1, 1]} : vector<8x128xf32> to vector<8x32xf32>
    %894 = arith.mulf %891, %812 : vector<8x32xf32>
    %895 = arith.mulf %890, %892 : vector<8x32xf32>
    %896 = arith.addf %894, %895 : vector<8x32xf32>
    %897 = math.tanh %896 : vector<8x32xf32>
    %898 = arith.mulf %893, %897 : vector<8x32xf32>
    %899 = arith.truncf %898 : vector<8x32xf32> to vector<8x32xbf16>
    %cst_204 = arith.constant dense<0.000000e+00> : vector<8x128xf32>
    %900 = tpu.matmul %899, %7, %cst_204 {dimension_numbers = #tpu.dot_dimension_numbers<[1], [0], [0], [1], [0, 0, 1, 1], [], []>} : vector<8x32xbf16>, vector<32x128xbf16>, vector<8x128xf32> -> vector<8x128xf32>
    %901 = arith.truncf %841 : vector<8x32xf32> to vector<8x32xbf16>
    %cst_205 = arith.constant dense<0.000000e+00> : vector<8x128xf32>
    %902 = tpu.matmul %901, %9, %cst_205 {dimension_numbers = #tpu.dot_dimension_numbers<[1], [0], [0], [1], [0, 0, 1, 1], [], []>} : vector<8x32xbf16>, vector<32x128xbf16>, vector<8x128xf32> -> vector<8x128xf32>
    %903 = arith.addf %900, %902 : vector<8x128xf32>
    %904 = vector.broadcast %11 : vector<1x128xf32> to vector<8x128xf32>
    %905 = arith.addf %903, %904 : vector<8x128xf32>
    %906 = arith.addf %905, %905 : vector<8x128xf32>
    %907 = arith.select %21, %906, %905 : vector<8x128xi1>, vector<8x128xf32>
    %908 = arith.negf %907 : vector<8x128xf32>
    %909 = math.exp %908 : vector<8x128xf32>
    %cst_206 = arith.constant 1.000000e+00 : f32
    %910 = vector.broadcast %cst_206 : f32 to vector<8x128xf32>
    %911 = arith.addf %910, %909 : vector<8x128xf32>
    %912 = arith.divf %910, %911 : vector<8x128xf32>
    %913 = arith.addf %912, %912 : vector<8x128xf32>
    %cst_207 = arith.constant 1.000000e+00 : f32
    %914 = vector.broadcast %cst_207 : f32 to vector<8x128xf32>
    %915 = arith.subf %913, %914 : vector<8x128xf32>
    %916 = arith.select %21, %915, %912 : vector<8x128xi1>, vector<8x128xf32>
    %917 = vector.extract_strided_slice %916 {offsets = [0, 0], sizes = [8, 32], strides = [1, 1]} : vector<8x128xf32> to vector<8x32xf32>
    %918 = vector.extract_strided_slice %916 {offsets = [0, 32], sizes = [8, 32], strides = [1, 1]} : vector<8x128xf32> to vector<8x32xf32>
    %919 = vector.extract_strided_slice %916 {offsets = [0, 64], sizes = [8, 32], strides = [1, 1]} : vector<8x128xf32> to vector<8x32xf32>
    %920 = vector.extract_strided_slice %916 {offsets = [0, 96], sizes = [8, 32], strides = [1, 1]} : vector<8x128xf32> to vector<8x32xf32>
    %921 = arith.mulf %918, %839 : vector<8x32xf32>
    %922 = arith.mulf %917, %919 : vector<8x32xf32>
    %923 = arith.addf %921, %922 : vector<8x32xf32>
    %924 = math.tanh %923 : vector<8x32xf32>
    %925 = arith.mulf %920, %924 : vector<8x32xf32>
    %926 = arith.truncf %925 : vector<8x32xf32> to vector<8x32xbf16>
    %cst_208 = arith.constant dense<0.000000e+00> : vector<8x128xf32>
    %927 = tpu.matmul %926, %12, %cst_208 {dimension_numbers = #tpu.dot_dimension_numbers<[1], [0], [0], [1], [0, 0, 1, 1], [], []>} : vector<8x32xbf16>, vector<32x128xbf16>, vector<8x128xf32> -> vector<8x128xf32>
    %928 = vector.broadcast %13 : vector<1x128xf32> to vector<8x128xf32>
    %929 = arith.addf %927, %928 : vector<8x128xf32>
    %c7 = arith.constant 7 : index
    %c0_209 = arith.constant 0 : index
    %c0_210 = arith.constant 0 : index
    %930 = vector.load %arg19[%c7, %c0_209, %c0_210] : memref<8x8x128xf32, #tpu.memory_space<vmem>>, vector<1x8x128xf32>
    %931 = vector.shape_cast %930 : vector<1x8x128xf32> to vector<8x128xf32>
    %932 = vector.shape_cast %929 : vector<8x128xf32> to vector<1x8x128xf32>
    tpu.vector_store %arg19[%c7, %c0_209, %c0_210], %932 {strides = array<i32>} : memref<8x8x128xf32, #tpu.memory_space<vmem>>, vector<1x8x128xf32>,
    return
  }
}

</mosaic_0001>

<bundles_post_ra>
// kernel: _seq2seq_forward.1
= control target key start
LH: loop header
LB: loop body
LE: loop exit
PB: predicated region body
PF: predicated region fallthrough
CT: control target
= control target key end

     0   :  { %s6791_s0 = inlined_call_operand.vmem [shape: s32[8], index: 0, kind: input, shape index: {}]   ;;  %s6792_s1 = inlined_call_operand.vmem [shape: s32[48,1], index: 1, kind: input, shape index: {}]   ;;  %s6793_s2 = inlined_call_operand.vmem [shape: s32[8,8], index: 2, kind: input, shape index: {}]   ;;  %s6794_s3 = inlined_call_operand.vmem [shape: bf16[32,32], index: 3, kind: input, shape index: {}]   ;;  %s6795_s4 = inlined_call_operand.vmem [shape: bf16[32,32], index: 4, kind: input, shape index: {}]   ;;  %s6796_s5 = inlined_call_operand.vmem [shape: bf16[32,128], index: 5, kind: input, shape index: {}]   ;;  %s6797_s6 = inlined_call_operand.vmem [shape: bf16[32,128], index: 6, kind: input, shape index: {}]   ;;  %s6798_s7 = inlined_call_operand.hbm [shape: f32[1,128], index: 7, kind: input, shape index: {}]   ;;  %s6799_s8 = inlined_call_operand.vmem [shape: bf16[32,128], index: 8, kind: input, shape index: {}]   ;;  %s6800_s9 = inlined_call_operand.vmem [shape: bf16[32,128], index: 9, kind: input, shape index: {}]   ;;  %s6801_s10 = inlined_call_operand.vmem [shape: f32[1,128], index: 10, kind: input, shape index: {}]   ;;  %s6802_s11 = inlined_call_operand.hbm [shape: bf16[32,128], index: 11, kind: input, shape index: {}]   ;;  %s6803_s12 = inlined_call_operand.hbm [shape: bf16[32,128], index: 12, kind: input, shape index: {}]   ;;  %s6804_s13 = inlined_call_operand.hbm [shape: f32[1,128], index: 13, kind: input, shape index: {}]   ;;  %s6805_s14 = inlined_call_operand.hbm [shape: bf16[32,128], index: 14, kind: input, shape index: {}]   ;;  %s6806_s15 = inlined_call_operand.hbm [shape: bf16[32,128], index: 15, kind: input, shape index: {}]   ;;  %s6807_s16 = inlined_call_operand.hbm [shape: f32[1,128], index: 16, kind: input, shape index: {}]   ;;  %s6808_s17 = inlined_call_operand.hbm [shape: bf16[32,128], index: 17, kind: input, shape index: {}]   ;;  %s6809_s18 = inlined_call_operand.hbm [shape: f32[1,128], index: 18, kind: input, shape index: {}]   ;;  %s6810_s19 = inlined_call_operand.hbm [shape: f32[8,8,128], index: 19, kind: output, shape index: {}]  }
   0x1   :  { %6815 = sst [smem:[#allocation27_spill]] %s6791_s0 }
   0x2   :  { %6816 = sst [smem:[#allocation28_spill]] %s6792_s1 }
   0x3   :  { %6817 = sst [smem:[#allocation29_spill]] %s6793_s2 }
   0x4   :  { %6818 = sst [smem:[#allocation30_spill]] %s6794_s3 }
   0x5   :  { %6819 = sst [smem:[#allocation31_spill]] %s6810_s19 }
   0x6   :  { %24 = vsyncpa [#allocation5], 0 }
   0x7   :  { %25 = vsyncpa [#allocation3], 0 }
   0x8   :  { %26 = vsyncpa [#allocation8], 0 }
   0x9   :  { %27 = vsyncpa [#allocation11], 0 }
   0xa   :  { %28 = vsyncpa [#allocation14], 0 }
   0xb   :  { %29 = vsyncpa [#allocation17], 0 }
   0xc   :  { %30 = vsyncpa [#allocation4], 0  ;;  %s5510_s0 = smov [#allocation7]   ;;  %s5264_s1 = scalar_lea.hbm %s6802_s11, 256 }
   0xd   :  { %s74_s30 = sshll.u32 %s5510_s0, 4  ;;  %p5265_p0 = scmp.ne.s32.totalorder %s6802_s11, %s5264_s1  ;;  %s75_s30 = int_to_ptr.vmem [resolvable:$true] %s74_s30 }
   0xe   :  { %p5268_p1 = scmp.lt.u32.totalorder %s5264_s1, %s6802_s11 }
  0x10   :  { %p5270_p2 = pnand %p5268_p1, %p5265_p0 }
  0x12   :  { %5273 = shalt.err (!%p5270_p2)
}
  0x13   :  { %s5274_s25 = scalar_lea.vmem %s75_s30, 256  ;;  %p5279_p4 = scmp.lt.s32.totalorder %s75_s30, %s75_s30 }
  0x14   :  { %p5275_p3 = scmp.ne.s32.totalorder %s75_s30, %s5274_s25  ;;  %p5280_p5 = scmp.lt.s32.totalorder %s5274_s25, %s5274_s25 }
  0x16   :  { %p5281_p6 = por %p5280_p5, %p5279_p4 }
  0x18   :  { %p5282_p7 = pnand %p5281_p6, %p5275_p3 }
  0x1a   :  { %5285 = shalt.err (!%p5282_p7)
}
  0x1b   :  { %s5511_s3 = smov 64   ;;  %s5512_s26 = smov 4  }
  0x1c   :  { %80 = dma.hbm_to_vmem [thread:$0]  %s6802_s11, 256, %s75_s30, [#allocation8], %s5511_s3, %s5511_s3, %s5512_s26  }
  0x1d   :  { %s5513_s29 = smov [#allocation10]   ;;  %s5514_s20 = smov [#allocation13]  }
  0x1e   :  { %s99_s0 = sshll.u32 %s5513_s29, 4  ;;  %s120_s21 = sshll.u32 %s5514_s20, 4  ;;  %s100_s0 = int_to_ptr.vmem [resolvable:$true] %s99_s0  ;;  %s121_s21 = int_to_ptr.vmem [resolvable:$true] %s120_s21 }
  0x1f   :  { %s5286_s2 = scalar_lea.hbm %s6804_s13, 16 }
  0x20   :  { %p5287_p8 = scmp.ne.s32.totalorder %s6804_s13, %s5286_s2  ;;  %p5290_p9 = scmp.lt.u32.totalorder %s5286_s2, %s6804_s13 }
  0x22   :  { %p5292_p10 = pnand %p5290_p9, %p5287_p8 }
  0x24   :  { %5295 = shalt.err (!%p5292_p10)
}
  0x25   :  { %s5296_s11 = scalar_lea.vmem %s100_s0, 16  ;;  %s5300_s30 = scalar_lea.vmem %s100_s0, 32 }
  0x26   :  { %p5297_p11 = scmp.ne.s32.totalorder %s100_s0, %s5296_s11  ;;  %p5301_p12 = scmp.lt.s32.totalorder %s100_s0, %s100_s0 }
  0x27   :  { %p5302_p13 = scmp.lt.s32.totalorder %s5300_s30, %s5296_s11 }
  0x29   :  { %p5303_p0 = por %p5302_p13, %p5301_p12 }
  0x2b   :  { %p5304_p1 = pnand %p5303_p0, %p5297_p11 }
  0x2d   :  { %5307 = shalt.err (!%p5304_p1)
}
  0x2e   :  { %102 = dma.hbm_to_vmem [thread:$0]  %s6804_s13, 16, %s100_s0, [#allocation11]  }
  0x2f   :  { %s5308_s19 = scalar_lea.hbm %s6806_s15, 256 }
  0x30   :  { %p5309_p2 = scmp.ne.s32.totalorder %s6806_s15, %s5308_s19  ;;  %p5312_p3 = scmp.lt.u32.totalorder %s5308_s19, %s6806_s15 }
  0x32   :  { %p5314_p4 = pnand %p5312_p3, %p5309_p2 }
  0x34   :  { %5317 = shalt.err (!%p5314_p4)
}
  0x35   :  { %s5318_s24 = scalar_lea.vmem %s121_s21, 256  ;;  %p5323_p6 = scmp.lt.s32.totalorder %s121_s21, %s121_s21 }
  0x36   :  { %p5319_p5 = scmp.ne.s32.totalorder %s121_s21, %s5318_s24  ;;  %p5324_p7 = scmp.lt.s32.totalorder %s5318_s24, %s5318_s24 }
  0x38   :  { %p5325_p8 = por %p5324_p7, %p5323_p6 }
  0x3a   :  { %p5326_p9 = pnand %p5325_p8, %p5319_p5 }
  0x3c   :  { %5329 = shalt.err (!%p5326_p9)
}
  0x3d   :  { %126 = dma.hbm_to_vmem [thread:$0]  %s6806_s15, 256, %s121_s21, [#allocation14], %s5511_s3, %s5511_s3, %s5512_s26  }
  0x3e   :  { %s5515_s25 = smov [#allocation16]   ;;  %s6820_s28 = sld [smem:[#allocation27_spill]] }
  0x3f   :  { %s142_s11 = sshll.u32 %s5515_s25, 4  ;;  %s5330_s1 = scalar_lea.hbm %s6808_s17, 256  ;;  %s143_s11 = int_to_ptr.vmem [resolvable:$true] %s142_s11 }
  0x40   :  { %p5331_p10 = scmp.ne.s32.totalorder %s6808_s17, %s5330_s1  ;;  %p5334_p11 = scmp.lt.u32.totalorder %s5330_s1, %s6808_s17 }
  0x42   :  { %p5336_p12 = pnand %p5334_p11, %p5331_p10 }
  0x44   :  { %s37_s29 = sshll.u32 %s6820_s28, 4  ;;  %s38_s29 = int_to_ptr.vmem [resolvable:$true] %s37_s29 }
  0x45   :  { %5339 = shalt.err (!%p5336_p12)
}
  0x46   :  { %s5340_s15 = scalar_lea.vmem %s143_s11, 256  ;;  %p5345_p0 = scmp.lt.s32.totalorder %s143_s11, %s143_s11 }
  0x47   :  { %p5341_p13 = scmp.ne.s32.totalorder %s143_s11, %s5340_s15  ;;  %p5346_p1 = scmp.lt.s32.totalorder %s5340_s15, %s5340_s15 }
  0x49   :  { %p5347_p2 = por %p5346_p1, %p5345_p0 }
  0x4b   :  { %p5348_p3 = pnand %p5347_p2, %p5341_p13 }
  0x4d   :  { %5351 = shalt.err (!%p5348_p3)
}
  0x4e   :  { %148 = dma.hbm_to_vmem [thread:$0]  %s6808_s17, 256, %s143_s11, [#allocation17], %s5511_s3, %s5511_s3, %s5512_s26  }
  0x4f   :  { %s5352_s0 = scalar_lea.vmem %s38_s29, 16  ;;  %p5357_p5 = scmp.lt.s32.totalorder %s38_s29, %s38_s29 }
  0x50   :  { %p5353_p4 = scmp.ne.s32.totalorder %s38_s29, %s5352_s0  ;;  %p5358_p6 = scmp.lt.s32.totalorder %s5352_s0, %s5352_s0 }
  0x52   :  { %p5359_p7 = por %p5358_p6, %p5357_p5 }
  0x54   :  { %p5360_p8 = pnand %p5359_p7, %p5353_p4 }
  0x56   :  { %5363 = shalt.err (!%p5360_p8)
}
  0x57   :  { %s5516_s25 = smov [#allocation2]   ;;  %s5517_s30 = smov [#allocation6]  }
  0x58   :  { %40 = dma.vmem_to_smem %s38_s29, 16, %s5516_s25, [#allocation5]  }
  0x59   :  { %s59_s27 = sshll.u32 %s5517_s30, 4  ;;  %s5518_s28 = smov [#allocation9]   ;;  %s60_s27 = int_to_ptr.vmem [resolvable:$true] %s59_s27 }
  0x5a   :  { %s86_s20 = sshll.u32 %s5518_s28, 4  ;;  %s5364_s22 = scalar_lea.hbm %s6798_s7, 16  ;;  %s87_s20 = int_to_ptr.vmem [resolvable:$true] %s86_s20 }
  0x5b   :  { %p5365_p9 = scmp.ne.s32.totalorder %s6798_s7, %s5364_s22  ;;  %p5368_p10 = scmp.lt.u32.totalorder %s5364_s22, %s6798_s7 }
  0x5d   :  { %p5370_p11 = pnand %p5368_p10, %p5365_p9 }
  0x5f   :  { %5373 = shalt.err (!%p5370_p11)
}
  0x60   :  { %s5374_s29 = scalar_lea.vmem %s60_s27, 16  ;;  %s5378_s24 = scalar_lea.vmem %s60_s27, 32 }
  0x61   :  { %p5375_p12 = scmp.ne.s32.totalorder %s60_s27, %s5374_s29  ;;  %p5379_p13 = scmp.lt.s32.totalorder %s60_s27, %s60_s27 }
  0x62   :  { %p5380_p0 = scmp.lt.s32.totalorder %s5378_s24, %s5374_s29 }
  0x64   :  { %p5381_p1 = por %p5380_p0, %p5379_p13 }
  0x66   :  { %p5382_p2 = pnand %p5381_p1, %p5375_p12 }
  0x68   :  { %5385 = shalt.err (!%p5382_p2)
}
  0x69   :  { %62 = dma.hbm_to_vmem [thread:$0]  %s6798_s7, 16, %s60_s27, [#allocation3]  }
  0x6a   :  { %s5386_s25 = scalar_lea.hbm %s6803_s12, 256 }
  0x6b   :  { %p5387_p3 = scmp.ne.s32.totalorder %s6803_s12, %s5386_s25  ;;  %p5390_p4 = scmp.lt.u32.totalorder %s5386_s25, %s6803_s12 }
  0x6d   :  { %p5392_p5 = pnand %p5390_p4, %p5387_p3 }
  0x6f   :  { %5395 = shalt.err (!%p5392_p5)
}
  0x70   :  { %s5396_s22 = scalar_lea.vmem %s87_s20, 256  ;;  %p5401_p7 = scmp.lt.s32.totalorder %s87_s20, %s87_s20 }
  0x71   :  { %p5397_p6 = scmp.ne.s32.totalorder %s87_s20, %s5396_s22  ;;  %p5402_p8 = scmp.lt.s32.totalorder %s5396_s22, %s5396_s22 }
  0x73   :  { %p5403_p9 = por %p5402_p8, %p5401_p7 }
  0x75   :  { %p5404_p10 = pnand %p5403_p9, %p5397_p6 }
  0x77   :  { %5407 = shalt.err (!%p5404_p10)
}
  0x78   :  { %92 = dma.hbm_to_vmem [thread:$0]  %s6803_s12, 256, %s87_s20, [#allocation8], %s5511_s3, %s5511_s3, %s5512_s26  }
  0x79   :  { %s5519_s2 = smov [#allocation12]   ;;  %s5520_s11 = smov [#allocation15]  }
  0x7a   :  { %s108_s17 = sshll.u32 %s5519_s2, 4  ;;  %s133_s23 = sshll.u32 %s5520_s11, 4  ;;  %s109_s17 = int_to_ptr.vmem [resolvable:$true] %s108_s17  ;;  %s134_s23 = int_to_ptr.vmem [resolvable:$true] %s133_s23 }
  0x7b   :  { %s5408_s15 = scalar_lea.hbm %s6805_s14, 256 }
  0x7c   :  { %p5409_p11 = scmp.ne.s32.totalorder %s6805_s14, %s5408_s15  ;;  %p5412_p12 = scmp.lt.u32.totalorder %s5408_s15, %s6805_s14 }
  0x7e   :  { %p5414_p13 = pnand %p5412_p12, %p5409_p11 }
  0x80   :  { %5417 = shalt.err (!%p5414_p13)
}
  0x81   :  { %s5418_s12 = scalar_lea.vmem %s109_s17, 256  ;;  %p5423_p1 = scmp.lt.s32.totalorder %s109_s17, %s109_s17 }
  0x82   :  { %p5419_p0 = scmp.ne.s32.totalorder %s109_s17, %s5418_s12  ;;  %p5424_p2 = scmp.lt.s32.totalorder %s5418_s12, %s5418_s12 }
  0x84   :  { %p5425_p3 = por %p5424_p2, %p5423_p1 }
  0x86   :  { %p5426_p4 = pnand %p5425_p3, %p5419_p0 }
  0x88   :  { %5429 = shalt.err (!%p5426_p4)
}
  0x89   :  { %114 = dma.hbm_to_vmem [thread:$0]  %s6805_s14, 256, %s109_s17, [#allocation11], %s5511_s3, %s5511_s3, %s5512_s26  }
  0x8a   :  { %s5430_s1 = scalar_lea.hbm %s6807_s16, 16 }
  0x8b   :  { %p5431_p5 = scmp.ne.s32.totalorder %s6807_s16, %s5430_s1  ;;  %p5434_p6 = scmp.lt.u32.totalorder %s5430_s1, %s6807_s16 }
  0x8d   :  { %p5436_p7 = pnand %p5434_p6, %p5431_p5 }
  0x8f   :  { %5439 = shalt.err (!%p5436_p7)
}
  0x90   :  { %s5440_s11 = scalar_lea.vmem %s134_s23, 16  ;;  %s5444_s29 = scalar_lea.vmem %s134_s23, 32 }
  0x91   :  { %p5441_p8 = scmp.ne.s32.totalorder %s134_s23, %s5440_s11  ;;  %p5445_p9 = scmp.lt.s32.totalorder %s134_s23, %s134_s23 }
  0x92   :  { %p5446_p10 = scmp.lt.s32.totalorder %s5444_s29, %s5440_s11 }
  0x94   :  { %p5447_p11 = por %p5446_p10, %p5445_p9 }
  0x96   :  { %p5448_p12 = pnand %p5447_p11, %p5441_p8 }
  0x98   :  { %5451 = shalt.err (!%p5448_p12)
}
  0x99   :  { %136 = dma.hbm_to_vmem [thread:$0]  %s6807_s16, 16, %s134_s23, [#allocation14]  }
  0x9a   :  { %s5521_s17 = smov [#allocation18]   ;;  %s5452_s13 = scalar_lea.hbm %s6809_s18, 16 }
  0x9b   :  { %s155_s24 = sshll.u32 %s5521_s17, 4  ;;  %p5453_p13 = scmp.ne.s32.totalorder %s6809_s18, %s5452_s13  ;;  %s156_s24 = int_to_ptr.vmem [resolvable:$true] %s155_s24 }
  0x9c   :  { %p5456_p0 = scmp.lt.u32.totalorder %s5452_s13, %s6809_s18 }
  0x9e   :  { %p5458_p1 = pnand %p5456_p0, %p5453_p13 }
  0xa0   :  { %5461 = shalt.err (!%p5458_p1)
}
  0xa1   :  { %s5462_s30 = scalar_lea.vmem %s156_s24, 16  ;;  %s5466_s16 = scalar_lea.vmem %s156_s24, 32 }
  0xa2   :  { %p5463_p2 = scmp.ne.s32.totalorder %s156_s24, %s5462_s30  ;;  %p5467_p3 = scmp.lt.s32.totalorder %s156_s24, %s156_s24 }
  0xa3   :  { %p5468_p4 = scmp.lt.s32.totalorder %s5466_s16, %s5462_s30 }
  0xa5   :  { %p5469_p5 = por %p5468_p4, %p5467_p3 }
  0xa7   :  { %p5470_p6 = pnand %p5469_p5, %p5463_p2 }
  0xa9   :  { %5473 = shalt.err (!%p5470_p6)
}
  0xaa   :  { %158 = dma.hbm_to_vmem [thread:$0]  %s6809_s18, 16, %s156_s24, [#allocation17]  }
  0xab   :  { %5496 = dma.done.wait [#allocation5], 16  }
  0xac   :  { %5497 = vsyncadd [#allocation5], 4294967280 }
  0xad   :  { %5498 = dma.done.wait [#allocation3], 16  }
  0xae   :  { %5499 = vsyncadd [#allocation3], 4294967280 }
  0xaf   :  { %5500 = dma.done.wait [#allocation8], 512  }
  0xb0   :  { %5501 = vsyncadd [#allocation8], 4294966784 }
  0xb1   :  { %5502 = dma.done.wait [#allocation11], 272  }
  0xb2   :  { %5503 = vsyncadd [#allocation11], 4294967024 }
  0xb3   :  { %5504 = dma.done.wait [#allocation14], 272  }
  0xb4   :  { %5505 = vsyncadd [#allocation14], 4294967024 }
  0xb5   :  { %5506 = dma.done.wait [#allocation17], 272  }
  0xb6   :  { %5507 = vsyncadd [#allocation17], 4294967024 }
  0xb7   :  { %189 = sfence }
  0xb8   :  { %s6821_s22 = sld [smem:[#allocation28_spill]]  ;;  %v5522_v2 = vmov 0   ;;  %v5523_v5 = vmov 0.0   ;;  %s6822_s17 = sld [smem:[#allocation30_spill]]  ;;  %vm5524_vm0 = vmmov 0   ;;  %v5073_v10 = vld [vmem:[%s6796_s5] sm:$0xff]   ;;  %v240_v11 = vlaneseq }
  0xb9   :  { %5062 = vset.pattern.permute.xlu1 %v5522_v2  ;;  %5061 = vset.pattern.permute.xlu0 %v5522_v2  ;;  %1653 = vst [vmem:[#allocation19] sm:$0xff] %v5523_v5  ;;  %vm303_vm3 = vcmask 261120   ;;  %v5809_v19 = vld [vmem:[%s6797_s6] sm:$0xff]   ;;  %v5822_v23 = vld [vmem:[%s6797_s6 + $0x8] sm:$0xff]   ;;  %s6825_s26 = sld [smem:[#allocation29_spill]]  ;;  %s4250_s13 = sld [smem:[#allocation2 + $0x1]] }
  0xba   :  { %4512 = vmatprep.subr.bf16.mxu0 %v5523_v5  ;;  %4528 = vmatprep.subr.bf16.mxu1 %v5523_v5  ;;  %v5800_v12 = vand.u32 127, %v240_v11  ;;  %v5074_v30 = vld [vmem:[%s6796_s5 + $0x8] sm:$0xff]   ;;  %v5853_v50 = vld [vmem:[#allocation6] ss:$0 sm:$0xff]  ;;  %s5525_s5 = smov 32   ;;  %s4262_s25 = sld [smem:[#allocation2 + $0x2]] }
  0xbb   :  { %4516 = vmatprep.mubr.msk.bf16.mxu0 %vm5524_vm0, %v5523_v5  ;;  %4532 = vmatprep.mubr.msk.bf16.mxu1 %vm5524_vm0, %v5523_v5  ;;  %s4274_s20 = sld [smem:[#allocation2 + $0x3]]  ;;  %s4298_s7 = sld [smem:[#allocation2 + $0x5]] }
  0xbc   :  { %4529 = vmatpush3.bf16.msra.mxu1 %v5073_v10  ;;  %vm242_vm8 = vcmp.ge.s32.totalorder %v5800_v12, 64  ;;  %vm243_vm9 = vcmp.lt.s32.totalorder %v5800_v12, 96  ;;  %s4310_s18 = sld [smem:[#allocation2 + $0x6]]  ;;  %s5532_s11 = smov [#allocation19]  }
  0xbd   :  { %4530 = vmatprep.subr.bf16.mxu1 %v5523_v5  ;;  %vm5860_vm10 = vmand %vm242_vm8, %vm243_vm9  ;;  %s4143_s29 = sshll.u32 %s5532_s11, 4  ;;  %s4144_s29 = int_to_ptr.vmem [resolvable:$true] %s4143_s29 }
  0xbe   :  { %v248_v0 = vld [vmem:[%s6821_s22 + $0x10] sm:$0xff]  ;;  %v246_v1 = vld [vmem:[%s6821_s22] sm:$0xff]  ;;  %v249_v3 = vld [vmem:[%s6821_s22 + $0x18] sm:$0xff]  ;;  %p5479_p8 = scmp.lt.s32.totalorder %s4144_s29, %s4144_s29 }
  0xbf   :  { %v247_v4 = vld [vmem:[%s6821_s22 + $0x8] sm:$0xff]  ;;  %259 = vperm.xlu1 %5062, %v248_v0   ;;  %253 = vperm.xlu0 %5061, %v246_v1   ;;  %v5069_v6 = vld [vmem:[%s6822_s17] sm:$0xff]   ;;  %s2091_s0 = ssub.s32 1, %s4250_s13 }
  0xc0   :  { %4513 = vmatpush3.bf16.msra.mxu0 %v5069_v6  ;;  %v251_v7 = vld [vmem:[%s6821_s22 + $0x28] sm:$0xff]  ;;  %v250_v8 = vld [vmem:[%s6821_s22 + $0x20] sm:$0xff]  ;;  %4531 = vmatpush3.bf16.msra.mxu1 %v5074_v30  ;;  %s2434_s12 = ssub.s32 1, %s4262_s25 }
  0xc1   :  { %4514 = vmatprep.subr.bf16.mxu0 %v5523_v5  ;;  %v5070_v9 = vld [vmem:[%s6822_s17 + $0x8] sm:$0xff]   ;;  %4552 = vmatprep.subr.bf16.mxu1 %v5523_v5  ;;  %s2777_s30 = ssub.s32 1, %s4274_s20  ;;  %s3463_s27 = ssub.s32 1, %s4298_s7 }
  0xc2   :  { %s3806_s2 = ssub.s32 1, %s4310_s18 }
  0xc3   :  { %262 = vperm.xlu1 %5062, %v249_v3   ;;  %256 = vperm.xlu0 %5061, %v247_v4  }
  0xc4   :  { %4515 = vmatpush3.bf16.msra.mxu0 %v5070_v9 }
  0xc5   :  { %4544 = vmatprep.subr.bf16.mxu0 %v5523_v5 }
  0xc7   :  { %268 = vperm.xlu1 %5062, %v251_v7   ;;  %265 = vperm.xlu0 %5061, %v250_v8  }
 0x13e   :  { %v260_v13 = vpop.permute.xlu1 %259  ;;  %v254_v14 = vpop.permute.xlu0 %253 }
 0x13f   :  { %vm270_vm1 = vcmp.eq.s32.totalorder %v5800_v12, %v254_v14  ;;  %vm272_vm4 = vcmp.eq.s32.totalorder %v5800_v12, %v260_v13 }
 0x140   :  { %v4160_v16 = vsel %vm270_vm1, 1.0, %v5523_v5  ;;  %v4162_v21 = vsel %vm272_vm4, 1.0, %v5523_v5 }
 0x142   :  { %v257_v15 = vpop.permute.xlu0 %256  ;;  %v263_v17 = vpop.permute.xlu1 %262 }
 0x143   :  { %vm271_vm2 = vcmp.eq.s32.totalorder %v5800_v12, %v257_v15  ;;  %vm273_vm5 = vcmp.eq.s32.totalorder %v5800_v12, %v263_v17 }
 0x144   :  { %v4161_v18 = vsel %vm271_vm2, 1.0, %v5523_v5  ;;  %v4163_v22 = vsel %vm273_vm5, 1.0, %v5523_v5 }
 0x145   :  { %v288_v20 = vpack.c.bf16 %v4161_v18, %v4160_v16  ;;  %v289_v24 = vpack.c.bf16 %v4163_v22, %v4162_v21  ;;  %v5889_v21 = vld [vmem:[%s6799_s8] sm:$0xff]   ;;  %v5895_v22 = vld [vmem:[%s6800_s9 + $0x8] sm:$0xff]  }
 0x146   :  { %v269_v25 = vpop.permute.xlu1 %268  ;;  %v266_v26 = vpop.permute.xlu0 %265 }
 0x147   :  { %4517 = vmatmul.mubr.msk.bf16.vlgmr.msra.gmra.mrb[0].mxu0 %vm303_vm3, %v288_v20  ;;  %vm275_vm6 = vcmp.eq.s32.totalorder %v5800_v12, %v269_v25  ;;  %vm274_vm7 = vcmp.eq.s32.totalorder %v5800_v12, %v266_v26  ;;  %v5884_v20 = vld [vmem:[%s6800_s9] sm:$0xff]  }
 0x148   :  { %4520 = vmatprep.mubr.msk.bf16.mxu0 %vm5524_vm0, %v5523_v5  ;;  %4545 = vmatpush3.bf16.msra.mxu0 %v5809_v19  ;;  %v4165_v27 = vsel %vm275_vm6, 1.0, %v5523_v5  ;;  %v4164_v28 = vsel %vm274_vm7, 1.0, %v5523_v5 }
 0x149   :  { %4546 = vmatprep.subr.bf16.mxu0 %v5523_v5  ;;  %v290_v29 = vpack.c.bf16 %v4165_v27, %v4164_v28 }
 0x14c   :  { %4547 = vmatpush3.bf16.msra.mxu0 %v5822_v23 }
 0x14d   :  { %4560 = vmatprep.subr.bf16.mxu0 %v5523_v5 }
 0x14f   :  { %4521 = vmatmul.mubr.msk.bf16.gmra.mrb[4].mxu0 %vm303_vm3, %v289_v24  ;;  %v5901_v24 = vld [vmem:[%s6799_s8 + $0x8] sm:$0xff]   ;;  %s5474_s8 = scalar_lea.vmem %s4144_s29, 1024 }
 0x150   :  { %4524 = vmatprep.mubr.msk.bf16.mxu0 %vm5524_vm0, %v5523_v5  ;;  %p5475_p7 = scmp.ne.s32.totalorder %s4144_s29, %s5474_s8  ;;  %p5480_p9 = scmp.lt.s32.totalorder %s5474_s8, %s5474_s8 }
 0x152   :  { %p5481_p10 = por %p5480_p9, %p5479_p8 }
 0x154   :  { %p5482_p11 = pnand %p5481_p10, %p5475_p7 }
 0x157   :  { %4525 = vmatmul.mubr.msk.bf16.gmra.mrb[8].mxu0 %vm303_vm3, %v290_v29 }
 0x158   :  { %4548 = vmatprep.mubr.msk.bf16.mxu0 %vm5524_vm0, %v5523_v5 }
 0x15f   :  { %4549 = vmatmul.mubr.bf16.vlgmr.msra.gmra.mrb[12].mxu0 %v5522_v2 }
 0x160   :  { %4564 = vmatprep.mubr.msk.bf16.mxu0 %vm5524_vm0, %v5523_v5  ;;  %4561 = vmatpush3.bf16.msra.mxu0 %v5889_v21 }
 0x161   :  { %4562 = vmatprep.subr.bf16.mxu0 %v5523_v5 }
 0x164   :  { %4563 = vmatpush3.bf16.msra.mxu0 %v5901_v24 }
 0x165   :  { %4576 = vmatprep.subr.bf16.mxu0 %v5523_v5 }
 0x21a   :  { %v347_v31 = vpop.f32.mrb[0].mxu0 }
 0x21b   :  { %v4518_v32 = vpop.f32.mrb[1].mxu0 }
 0x21c   :  { %v350_v33 = vpop.f32.mrb[2].mxu0 }
 0x21d   :  { %v370_v34 = vpack.c.bf16 %v350_v33, %v347_v31  ;;  %v4519_v35 = vpop.f32.mrb[3].mxu0  ;;  %v5935_v33 = vld [vmem:[%s6801_s10] ss:$0 sm:$0xff] }
 0x21f   :  { %4533 = vmatmul.mubr.msk.bf16.vlgmr.msra.gmra.mrb[0].mxu1 %vm303_vm3, %v370_v34 }
 0x220   :  { %4536 = vmatprep.mubr.msk.bf16.mxu1 %vm5524_vm0, %v5523_v5  ;;  %4553 = vmatpush3.bf16.msra.mxu1 %v5884_v20 }
 0x221   :  { %4554 = vmatprep.subr.bf16.mxu1 %v5523_v5 }
 0x222   :  { %v355_v36 = vpop.f32.mrb[4].mxu0 }
 0x223   :  { %v4522_v37 = vpop.f32.mrb[5].mxu0 }
 0x224   :  { %v358_v38 = vpop.f32.mrb[6].mxu0  ;;  %4555 = vmatpush3.bf16.msra.mxu1 %v5895_v22 }
 0x225   :  { %v371_v39 = vpack.c.bf16 %v358_v38, %v355_v36  ;;  %v4523_v40 = vpop.f32.mrb[7].mxu0  ;;  %4568 = vmatprep.subr.bf16.mxu1 %v5523_v5 }
 0x227   :  { %4537 = vmatmul.mubr.msk.bf16.gmra.mrb[4].mxu1 %vm303_vm3, %v371_v39 }
 0x228   :  { %4540 = vmatprep.mubr.msk.bf16.mxu1 %vm5524_vm0, %v5523_v5 }
 0x22a   :  { %v363_v41 = vpop.f32.mrb[8].mxu0 }
 0x22b   :  { %v4526_v42 = vpop.f32.mrb[9].mxu0 }
 0x22c   :  { %v366_v43 = vpop.f32.mrb[10].mxu0 }
 0x22d   :  { %v372_v44 = vpack.c.bf16 %v366_v43, %v363_v41  ;;  %v4527_v45 = vpop.f32.mrb[11].mxu0 }
 0x22f   :  { %4541 = vmatmul.mubr.msk.bf16.gmra.mrb[8].mxu1 %vm303_vm3, %v372_v44 }
 0x230   :  { %4556 = vmatprep.mubr.msk.bf16.mxu1 %vm5524_vm0, %v5523_v5 }
 0x232   :  { %v500_v46 = vpop.f32.mrb[12].mxu0 }
 0x233   :  { %v4550_v47 = vpop.f32.mrb[13].mxu0 }
 0x234   :  { %v503_v48 = vpop.f32.mrb[14].mxu0 }
 0x235   :  { %v4551_v49 = vpop.f32.mrb[15].mxu0 }
 0x237   :  { %4557 = vmatmul.mubr.bf16.vlgmr.msra.gmra.mrb[12].mxu1 %v5522_v2 }
 0x238   :  { %4569 = vmatpush3.bf16.msra.mxu1 %v5809_v19  ;;  %4572 = vmatprep.mubr.msk.bf16.mxu1 %vm5524_vm0, %v5523_v5 }
 0x239   :  { %4570 = vmatprep.subr.bf16.mxu1 %v5523_v5 }
 0x23c   :  { %4571 = vmatpush3.bf16.msra.mxu1 %v5822_v23 }
 0x23d   :  { %4584 = vmatprep.subr.bf16.mxu1 %v5523_v5 }
 0x2f2   :  { %v428_v51 = vpop.f32.mrb[0].mxu1 }
 0x2f3   :  { %v506_v52 = vadd.f32 %v500_v46, %v428_v51  ;;  %v4534_v53 = vpop.f32.mrb[1].mxu1 }
 0x2f4   :  { %v5857_v54 = vpop.f32.mrb[2].mxu1 }
 0x2f5   :  { %v513_v55 = vadd.f32 %v5853_v50, %v506_v52  ;;  %v4535_v56 = vpop.f32.mrb[3].mxu1 }
 0x2f7   :  { %v514_v58 = vadd.f32 %v513_v55, %v513_v55 }
 0x2f9   :  { %v515_v59 = vsel %vm5860_vm10, %v514_v58, %v513_v55 }
 0x2fa   :  { %v4179_v60 = vmul.f32 -1.442695, %v515_v59  ;;  %v5866_v61 = vpop.f32.mrb[4].mxu1 }
 0x2fb   :  { %v4538_v62 = vpop.f32.mrb[5].mxu1 }
 0x2fc   :  { %5091 = vpow2.f32 %v4179_v60  ;;  %v5868_v63 = vpop.f32.mrb[6].mxu1 }
 0x2fd   :  { %v4539_v0 = vpop.f32.mrb[7].mxu1 }
 0x302   :  { %v5870_v1 = vpop.f32.mrb[8].mxu1 }
 0x303   :  { %v4542_v3 = vpop.f32.mrb[9].mxu1 }
 0x304   :  { %v5872_v4 = vpop.f32.mrb[10].mxu1 }
 0x305   :  { %v4543_v6 = vpop.f32.mrb[11].mxu1 }
 0x306   :  { %v5092_v7 = vpop.eup %5091 }
 0x307   :  { %v519_v8 = vadd.f32 1.0, %v5092_v7 }
 0x309   :  { %5093 = vrcp.f32 %v519_v8 }
 0x30a   :  { %v589_v29 = vpop.f32.mrb[12].mxu1 }
 0x30b   :  { %v4558_v30 = vpop.f32.mrb[13].mxu1 }
 0x30c   :  { %v592_v31 = vpop.f32.mrb[14].mxu1 }
 0x30d   :  { %v4559_v2 = vpop.f32.mrb[15].mxu1 }
 0x313   :  { %v5094_v9 = vpop.eup %5093 }
 0x314   :  { %v522_v10 = vadd.f32 %v5094_v9, %v5094_v9 }
 0x316   :  { %v4180_v11 = vadd.f32 -1.0, %v522_v10 }
 0x318   :  { %v524_v13 = vsel %vm5860_vm10, %v4180_v11, %v5094_v9 }
 0x319   :  { %527 = vrot.lane.b32.xlu0 %v524_v13, %s5511_s3  ;;  %v525_v16 = vmul.f32 0.0, %v524_v13 }
 0x38b   :  { %v528_v14 = vpop.permute.xlu0 %527 }
 0x38c   :  { %v530_v15 = vmul.f32 %v528_v14, %v524_v13 }
 0x38e   :  { %532 = vrot.lane.b32.xlu1 %v530_v15, %s5525_s5 }
 0x400   :  { %v533_v17 = vpop.permute.xlu1 %532 }
 0x401   :  { %v5878_v18 = vadd.f32 %v533_v17, %v525_v16 }
 0x403   :  { %5095 = vtanh.f32 %v5878_v18 }
 0x40d   :  { %v5096_v25 = vpop.eup %5095 }
 0x40e   :  { %538 = vrot.lane.b32.xlu0 %v5096_v25, %s5511_s3 }
 0x480   :  { %v539_v26 = vpop.permute.xlu0 %538 }
 0x481   :  { %v541_v27 = vmul.f32 %v539_v26, %v524_v13 }
 0x483   :  { %v542_v28 = vpack.c.bf16 %v541_v27, %v541_v27 }
 0x485   :  { %596 = vrot.lane.b32.xlu1 %v542_v28, %s5525_s5 }
 0x4f7   :  { %v597_v32 = vpop.permute.xlu1 %596 }
 0x4f8   :  { %4565 = vmatmul.mubr.msk.bf16.vlgmr.msra.gmra.mrb[16].mxu0 %vm303_vm3, %v597_v32  ;;  %4573 = vmatmul.mubr.msk.bf16.vlgmr.msra.gmra.mrb[16].mxu1 %vm303_vm3, %v597_v32 }
 0x4f9   :  { %4577 = vmatpush3.bf16.msra.mxu0 %v5884_v20  ;;  %4585 = vmatpush3.bf16.msra.mxu1 %v5889_v21 }
 0x4fa   :  { %4578 = vmatprep.subr.bf16.mxu0 %v5523_v5  ;;  %4586 = vmatprep.subr.bf16.mxu1 %v5523_v5 }
 0x4fb   :  { %4580 = vmatprep.mubr.msk.bf16.mxu0 %vm5524_vm0, %v5523_v5  ;;  %4588 = vmatprep.mubr.msk.bf16.mxu1 %vm5524_vm0, %v5523_v5 }
 0x4fd   :  { %4579 = vmatpush3.bf16.msra.mxu0 %v5895_v22  ;;  %4587 = vmatpush3.bf16.msra.mxu1 %v5901_v24 }
 0x4fe   :  { %4592 = vmatprep.subr.bf16.mxu0 %v5523_v5  ;;  %4600 = vmatprep.subr.bf16.mxu1 %v5523_v5 }
 0x5cb   :  { %v647_v34 = vpop.f32.mrb[16].mxu0  ;;  %v722_v35 = vpop.f32.mrb[16].mxu1 }
 0x5cc   :  { %v648_v36 = vadd.f32 %v647_v34, %v589_v29  ;;  %v728_v37 = vadd.f32 %v722_v35, %v5857_v54  ;;  %v4566_v38 = vpop.f32.mrb[17].mxu0  ;;  %v4574_v39 = vpop.f32.mrb[17].mxu1 }
 0x5cd   :  { %v650_v40 = vpop.f32.mrb[18].mxu0  ;;  %v725_v41 = vpop.f32.mrb[18].mxu1 }
 0x5ce   :  { %v659_v42 = vadd.f32 %v5935_v33, %v648_v36  ;;  %v729_v43 = vadd.f32 %v5853_v50, %v728_v37  ;;  %v4567_v44 = vpop.f32.mrb[19].mxu0  ;;  %v4575_v45 = vpop.f32.mrb[19].mxu1 }
 0x5d0   :  { %v660_v46 = vadd.f32 %v659_v42, %v659_v42  ;;  %v730_v47 = vadd.f32 %v729_v43, %v729_v43 }
 0x5d2   :  { %v661_v48 = vsel %vm5860_vm10, %v660_v46, %v659_v42  ;;  %v731_v49 = vsel %vm5860_vm10, %v730_v47, %v729_v43 }
 0x5d3   :  { %v4187_v51 = vmul.f32 -1.442695, %v661_v48  ;;  %v4190_v52 = vmul.f32 -1.442695, %v731_v49 }
 0x5d5   :  { %5097 = vpow2.f32 %v4187_v51 }
 0x5d6   :  { %5099 = vpow2.f32 %v4190_v52 }
 0x5df   :  { %v5098_v53 = vpop.eup %5097 }
 0x5e0   :  { %v5100_v54 = vpop.eup %5099  ;;  %v665_v55 = vadd.f32 1.0, %v5098_v53 }
 0x5e1   :  { %v735_v56 = vadd.f32 1.0, %v5100_v54 }
 0x5e2   :  { %5101 = vrcp.f32 %v665_v55 }
 0x5e3   :  { %5103 = vrcp.f32 %v735_v56 }
 0x5ec   :  { %v5102_v58 = vpop.eup %5101 }
 0x5ed   :  { %v5104_v59 = vpop.eup %5103  ;;  %v668_v60 = vadd.f32 %v5102_v58, %v5102_v58 }
 0x5ee   :  { %v738_v62 = vadd.f32 %v5104_v59, %v5104_v59 }
 0x5ef   :  { %v4188_v0 = vadd.f32 -1.0, %v668_v60 }
 0x5f0   :  { %v4191_v3 = vadd.f32 -1.0, %v738_v62 }
 0x5f1   :  { %v670_v6 = vsel %vm5860_vm10, %v4188_v0, %v5102_v58 }
 0x5f2   :  { %673 = vrot.lane.b32.xlu0 %v670_v6, %s5511_s3  ;;  %v740_v7 = vsel %vm5860_vm10, %v4191_v3, %v5104_v59  ;;  %v671_v13 = vmul.f32 0.0, %v670_v6 }
 0x5f3   :  { %743 = vrot.lane.b32.xlu1 %v740_v7, %s5511_s3  ;;  %v741_v15 = vmul.f32 %v740_v7, %v5878_v18 }
 0x664   :  { %v674_v8 = vpop.permute.xlu0 %673 }
 0x665   :  { %v676_v9 = vmul.f32 %v674_v8, %v670_v6  ;;  %v744_v10 = vpop.permute.xlu1 %743 }
 0x666   :  { %v746_v11 = vmul.f32 %v744_v10, %v740_v7 }
 0x667   :  { %678 = vrot.lane.b32.xlu0 %v676_v9, %s5525_s5 }
 0x668   :  { %748 = vrot.lane.b32.xlu1 %v746_v11, %s5525_s5 }
 0x6d9   :  { %v679_v14 = vpop.permute.xlu0 %678 }
 0x6da   :  { %v5953_v16 = vadd.f32 %v679_v14, %v671_v13  ;;  %v749_v17 = vpop.permute.xlu1 %748 }
 0x6db   :  { %v5955_v25 = vadd.f32 %v749_v17, %v741_v15 }
 0x6dc   :  { %5105 = vtanh.f32 %v5953_v16 }
 0x6dd   :  { %5107 = vtanh.f32 %v5955_v25 }
 0x6e6   :  { %v5106_v26 = vpop.eup %5105 }
 0x6e7   :  { %v5108_v27 = vpop.eup %5107  ;;  %684 = vrot.lane.b32.xlu0 %v5106_v26, %s5511_s3 }
 0x6e8   :  { %754 = vrot.lane.b32.xlu1 %v5108_v27, %s5511_s3 }
 0x759   :  { %v685_v28 = vpop.permute.xlu0 %684 }
 0x75a   :  { %v687_v29 = vmul.f32 %v685_v28, %v670_v6  ;;  %v755_v30 = vpop.permute.xlu1 %754 }
 0x75b   :  { %v757_v31 = vmul.f32 %v755_v30, %v740_v7 }
 0x75c   :  { %v759_v18 = vpack.c.bf16 %v687_v29, %v687_v29 }
 0x75d   :  { %v758_v2 = vpack.c.bf16 %v757_v31, %v757_v31 }
 0x75e   :  { %761 = vrot.lane.b32.xlu0 %v759_v18, %s5525_s5 }
 0x75f   :  { %807 = vrot.lane.b32.xlu1 %v758_v2, %s5525_s5 }
 0x7d0   :  { %v762_v32 = vpop.permute.xlu0 %761 }
 0x7d1   :  { %v808_v34 = vpop.permute.xlu1 %807  ;;  %4581 = vmatmul.mubr.msk.bf16.vlgmr.msra.gmra.mrb[20].mxu0 %vm303_vm3, %v762_v32 }
 0x7d2   :  { %4589 = vmatmul.mubr.msk.bf16.vlgmr.msra.gmra.mrb[20].mxu1 %vm303_vm3, %v808_v34  ;;  %4593 = vmatpush3.bf16.msra.mxu0 %v5809_v19 }
 0x7d3   :  { %4594 = vmatprep.subr.bf16.mxu0 %v5523_v5  ;;  %4596 = vmatprep.mubr.msk.bf16.mxu0 %vm5524_vm0, %v5523_v5 }
 0x7d4   :  { %4601 = vmatpush3.bf16.msra.mxu1 %v5884_v20  ;;  %4604 = vmatprep.mubr.msk.bf16.mxu1 %vm5524_vm0, %v5523_v5 }
 0x7d5   :  { %4602 = vmatprep.subr.bf16.mxu1 %v5523_v5 }
 0x7d6   :  { %4595 = vmatpush3.bf16.msra.mxu0 %v5822_v23 }
 0x7d7   :  { %4608 = vmatprep.subr.bf16.mxu0 %v5523_v5 }
 0x7d8   :  { %4603 = vmatpush3.bf16.msra.mxu1 %v5895_v22 }
 0x7d9   :  { %4597 = vmatmul.mubr.msk.bf16.vlgmr.msra.gmra.mrb[24].mxu0 %vm303_vm3, %v808_v34  ;;  %4616 = vmatprep.subr.bf16.mxu1 %v5523_v5 }
 0x7da   :  { %4609 = vmatpush3.bf16.msra.mxu0 %v5889_v21  ;;  %4612 = vmatprep.mubr.msk.bf16.mxu0 %vm5524_vm0, %v5523_v5 }
 0x7db   :  { %4610 = vmatprep.subr.bf16.mxu0 %v5523_v5 }
 0x7de   :  { %4611 = vmatpush3.bf16.msra.mxu0 %v5901_v24 }
 0x7df   :  { %4624 = vmatprep.subr.bf16.mxu0 %v5523_v5 }
 0x8a4   :  { %v800_v35 = vpop.f32.mrb[20].mxu0 }
 0x8a5   :  { %v846_v36 = vpop.f32.mrb[20].mxu1  ;;  %v4582_v37 = vpop.f32.mrb[21].mxu0 }
 0x8a6   :  { %v847_v38 = vadd.f32 %v846_v36, %v800_v35  ;;  %v4590_v39 = vpop.f32.mrb[21].mxu1  ;;  %v803_v40 = vpop.f32.mrb[22].mxu0 }
 0x8a7   :  { %v849_v41 = vpop.f32.mrb[22].mxu1  ;;  %v4583_v42 = vpop.f32.mrb[23].mxu0 }
 0x8a8   :  { %v852_v43 = vadd.f32 %v5935_v33, %v847_v38  ;;  %v4591_v44 = vpop.f32.mrb[23].mxu1 }
 0x8aa   :  { %v853_v45 = vadd.f32 %v852_v43, %v852_v43 }
 0x8ac   :  { %v854_v46 = vsel %vm5860_vm10, %v853_v45, %v852_v43  ;;  %v915_v47 = vpop.f32.mrb[24].mxu0 }
 0x8ad   :  { %v4194_v48 = vmul.f32 -1.442695, %v854_v46  ;;  %v921_v49 = vadd.f32 %v915_v47, %v5866_v61  ;;  %v4598_v51 = vpop.f32.mrb[25].mxu0 }
 0x8ae   :  { %v918_v52 = vpop.f32.mrb[26].mxu0 }
 0x8af   :  { %5109 = vpow2.f32 %v4194_v48  ;;  %v922_v53 = vadd.f32 %v5853_v50, %v921_v49  ;;  %v4599_v54 = vpop.f32.mrb[27].mxu0 }
 0x8b1   :  { %v923_v55 = vadd.f32 %v922_v53, %v922_v53 }
 0x8b3   :  { %v924_v56 = vsel %vm5860_vm10, %v923_v55, %v922_v53 }
 0x8b4   :  { %v4197_v58 = vmul.f32 -1.442695, %v924_v56 }
 0x8b6   :  { %5111 = vpow2.f32 %v4197_v58 }
 0x8b9   :  { %v5110_v59 = vpop.eup %5109 }
 0x8ba   :  { %v858_v60 = vadd.f32 1.0, %v5110_v59 }
 0x8bc   :  { %5113 = vrcp.f32 %v858_v60 }
 0x8c0   :  { %v5112_v62 = vpop.eup %5111 }
 0x8c1   :  { %v928_v0 = vadd.f32 1.0, %v5112_v62 }
 0x8c3   :  { %5115 = vrcp.f32 %v928_v0 }
 0x8c6   :  { %v5114_v3 = vpop.eup %5113 }
 0x8c7   :  { %v861_v61 = vadd.f32 %v5114_v3, %v5114_v3 }
 0x8c9   :  { %v4195_v6 = vadd.f32 -1.0, %v861_v61 }
 0x8cb   :  { %v863_v7 = vsel %vm5860_vm10, %v4195_v6, %v5114_v3 }
 0x8cc   :  { %866 = vrot.lane.b32.xlu0 %v863_v7, %s5511_s3  ;;  %v864_v26 = vmul.f32 %v863_v7, %v5953_v16 }
 0x8cd   :  { %v5116_v8 = vpop.eup %5115 }
 0x8ce   :  { %v931_v9 = vadd.f32 %v5116_v8, %v5116_v8 }
 0x8d0   :  { %v4198_v10 = vadd.f32 -1.0, %v931_v9 }
 0x8d2   :  { %v933_v11 = vsel %vm5860_vm10, %v4198_v10, %v5116_v8 }
 0x8d3   :  { %936 = vrot.lane.b32.xlu1 %v933_v11, %s5511_s3  ;;  %v934_v29 = vmul.f32 %v933_v11, %v5955_v25 }
 0x93e   :  { %v867_v13 = vpop.permute.xlu0 %866 }
 0x93f   :  { %v869_v14 = vmul.f32 %v867_v13, %v863_v7 }
 0x941   :  { %871 = vrot.lane.b32.xlu0 %v869_v14, %s5525_s5 }
 0x945   :  { %v937_v15 = vpop.permute.xlu1 %936 }
 0x946   :  { %v939_v17 = vmul.f32 %v937_v15, %v933_v11 }
 0x948   :  { %941 = vrot.lane.b32.xlu1 %v939_v17, %s5525_s5 }
 0x9b3   :  { %v872_v27 = vpop.permute.xlu0 %871 }
 0x9b4   :  { %v6000_v28 = vadd.f32 %v872_v27, %v864_v26 }
 0x9b6   :  { %5117 = vtanh.f32 %v6000_v28 }
 0x9ba   :  { %v942_v30 = vpop.permute.xlu1 %941 }
 0x9bb   :  { %v6004_v31 = vadd.f32 %v942_v30, %v934_v29 }
 0x9bd   :  { %5119 = vtanh.f32 %v6004_v31 }
 0x9c0   :  { %v5118_v18 = vpop.eup %5117 }
 0x9c1   :  { %877 = vrot.lane.b32.xlu0 %v5118_v18, %s5511_s3 }
 0x9c7   :  { %v5120_v2 = vpop.eup %5119 }
 0x9c8   :  { %947 = vrot.lane.b32.xlu1 %v5120_v2, %s5511_s3 }
 0xa33   :  { %v878_v32 = vpop.permute.xlu0 %877 }
 0xa34   :  { %v880_v16 = vmul.f32 %v878_v32, %v863_v7 }
 0xa36   :  { %v952_v34 = vpack.c.bf16 %v880_v16, %v880_v16 }
 0xa38   :  { %954 = vrot.lane.b32.xlu0 %v952_v34, %s5525_s5 }
 0xa3a   :  { %v948_v35 = vpop.permute.xlu1 %947 }
 0xa3b   :  { %v950_v36 = vmul.f32 %v948_v35, %v933_v11 }
 0xa3d   :  { %v951_v37 = vpack.c.bf16 %v950_v36, %v950_v36 }
 0xa3f   :  { %1000 = vrot.lane.b32.xlu1 %v951_v37, %s5525_s5 }
 0xaaa   :  { %v955_v25 = vpop.permute.xlu0 %954 }
 0xaab   :  { %4605 = vmatmul.mubr.msk.bf16.vlgmr.msra.gmra.mrb[24].mxu1 %vm303_vm3, %v955_v25 }
 0xaac   :  { %4617 = vmatpush3.bf16.msra.mxu1 %v5809_v19  ;;  %4620 = vmatprep.mubr.msk.bf16.mxu1 %vm5524_vm0, %v5523_v5 }
 0xaad   :  { %4618 = vmatprep.subr.bf16.mxu1 %v5523_v5 }
 0xab0   :  { %4619 = vmatpush3.bf16.msra.mxu1 %v5822_v23 }
 0xab1   :  { %v1001_v38 = vpop.permute.xlu1 %1000  ;;  %4632 = vmatprep.subr.bf16.mxu1 %v5523_v5 }
 0xab2   :  { %4613 = vmatmul.mubr.msk.bf16.vlgmr.msra.gmra.mrb[28].mxu0 %vm303_vm3, %v1001_v38 }
 0xab3   :  { %4621 = vmatmul.mubr.msk.bf16.vlgmr.msra.gmra.mrb[28].mxu1 %vm303_vm3, %v1001_v38  ;;  %4625 = vmatpush3.bf16.msra.mxu0 %v5884_v20 }
 0xab4   :  { %4633 = vmatpush3.bf16.msra.mxu1 %v5889_v21  ;;  %4626 = vmatprep.subr.bf16.mxu0 %v5523_v5 }
 0xab5   :  { %4634 = vmatprep.subr.bf16.mxu1 %v5523_v5  ;;  %4628 = vmatprep.mubr.msk.bf16.mxu0 %vm5524_vm0, %v5523_v5 }
 0xab6   :  { %4636 = vmatprep.mubr.msk.bf16.mxu1 %vm5524_vm0, %v5523_v5 }
 0xab7   :  { %4627 = vmatpush3.bf16.msra.mxu0 %v5895_v22 }
 0xab8   :  { %4635 = vmatpush3.bf16.msra.mxu1 %v5901_v24  ;;  %4640 = vmatprep.subr.bf16.mxu0 %v5523_v5 }
 0xab9   :  { %4648 = vmatprep.subr.bf16.mxu1 %v5523_v5 }
 0xb7e   :  { %v993_v39 = vpop.f32.mrb[24].mxu1 }
 0xb7f   :  { %v4606_v40 = vpop.f32.mrb[25].mxu1 }
 0xb80   :  { %v996_v41 = vpop.f32.mrb[26].mxu1 }
 0xb81   :  { %v4607_v42 = vpop.f32.mrb[27].mxu1 }
 0xb85   :  { %v1039_v43 = vpop.f32.mrb[28].mxu0 }
 0xb86   :  { %v1040_v44 = vadd.f32 %v1039_v43, %v993_v39  ;;  %v1108_v45 = vpop.f32.mrb[28].mxu1  ;;  %v4614_v46 = vpop.f32.mrb[29].mxu0 }
 0xb87   :  { %v1114_v47 = vadd.f32 %v1108_v45, %v5868_v63  ;;  %v4622_v48 = vpop.f32.mrb[29].mxu1  ;;  %v1042_v49 = vpop.f32.mrb[30].mxu0 }
 0xb88   :  { %v1045_v51 = vadd.f32 %v5935_v33, %v1040_v44  ;;  %v1111_v52 = vpop.f32.mrb[30].mxu1  ;;  %v4615_v53 = vpop.f32.mrb[31].mxu0 }
 0xb89   :  { %v1115_v54 = vadd.f32 %v5853_v50, %v1114_v47  ;;  %v4623_v55 = vpop.f32.mrb[31].mxu1 }
 0xb8a   :  { %v1046_v56 = vadd.f32 %v1045_v51, %v1045_v51 }
 0xb8b   :  { %v1116_v58 = vadd.f32 %v1115_v54, %v1115_v54 }
 0xb8c   :  { %v1047_v59 = vsel %vm5860_vm10, %v1046_v56, %v1045_v51 }
 0xb8d   :  { %v4201_v60 = vmul.f32 -1.442695, %v1047_v59  ;;  %v1117_v62 = vsel %vm5860_vm10, %v1116_v58, %v1115_v54 }
 0xb8e   :  { %v4204_v0 = vmul.f32 -1.442695, %v1117_v62 }
 0xb8f   :  { %5121 = vpow2.f32 %v4201_v60 }
 0xb90   :  { %5123 = vpow2.f32 %v4204_v0 }
 0xb99   :  { %v5122_v63 = vpop.eup %5121 }
 0xb9a   :  { %v5124_v3 = vpop.eup %5123  ;;  %v1051_v61 = vadd.f32 1.0, %v5122_v63 }
 0xb9b   :  { %v1121_v6 = vadd.f32 1.0, %v5124_v3 }
 0xb9c   :  { %5125 = vrcp.f32 %v1051_v61 }
 0xb9d   :  { %5127 = vrcp.f32 %v1121_v6 }
 0xba6   :  { %v5126_v7 = vpop.eup %5125 }
 0xba7   :  { %v5128_v8 = vpop.eup %5127  ;;  %v1054_v9 = vadd.f32 %v5126_v7, %v5126_v7 }
 0xba8   :  { %v1124_v10 = vadd.f32 %v5128_v8, %v5128_v8 }
 0xba9   :  { %v4202_v11 = vadd.f32 -1.0, %v1054_v9 }
 0xbaa   :  { %v4205_v13 = vadd.f32 -1.0, %v1124_v10 }
 0xbab   :  { %v1056_v14 = vsel %vm5860_vm10, %v4202_v11, %v5126_v7 }
 0xbac   :  { %1059 = vrot.lane.b32.xlu0 %v1056_v14, %s5511_s3  ;;  %v1126_v15 = vsel %vm5860_vm10, %v4205_v13, %v5128_v8  ;;  %v1057_v30 = vmul.f32 %v1056_v14, %v6000_v28 }
 0xbad   :  { %1129 = vrot.lane.b32.xlu1 %v1126_v15, %s5511_s3  ;;  %v1127_v2 = vmul.f32 %v1126_v15, %v6004_v31 }
 0xc1e   :  { %v1060_v17 = vpop.permute.xlu0 %1059 }
 0xc1f   :  { %v1062_v26 = vmul.f32 %v1060_v17, %v1056_v14  ;;  %v1130_v27 = vpop.permute.xlu1 %1129 }
 0xc20   :  { %v1132_v29 = vmul.f32 %v1130_v27, %v1126_v15 }
 0xc21   :  { %1064 = vrot.lane.b32.xlu0 %v1062_v26, %s5525_s5 }
 0xc22   :  { %1134 = vrot.lane.b32.xlu1 %v1132_v29, %s5525_s5 }
 0xc93   :  { %v1065_v18 = vpop.permute.xlu0 %1064 }
 0xc94   :  { %v6049_v32 = vadd.f32 %v1065_v18, %v1057_v30  ;;  %v1135_v16 = vpop.permute.xlu1 %1134 }
 0xc95   :  { %v6051_v34 = vadd.f32 %v1135_v16, %v1127_v2 }
 0xc96   :  { %5129 = vtanh.f32 %v6049_v32 }
 0xc97   :  { %5131 = vtanh.f32 %v6051_v34 }
 0xca0   :  { %v5130_v35 = vpop.eup %5129 }
 0xca1   :  { %v5132_v36 = vpop.eup %5131  ;;  %1070 = vrot.lane.b32.xlu0 %v5130_v35, %s5511_s3 }
 0xca2   :  { %1140 = vrot.lane.b32.xlu1 %v5132_v36, %s5511_s3 }
 0xd13   :  { %v1071_v37 = vpop.permute.xlu0 %1070 }
 0xd14   :  { %v1073_v28 = vmul.f32 %v1071_v37, %v1056_v14  ;;  %v1141_v25 = vpop.permute.xlu1 %1140 }
 0xd15   :  { %v1143_v38 = vmul.f32 %v1141_v25, %v1126_v15 }
 0xd16   :  { %v1145_v31 = vpack.c.bf16 %v1073_v28, %v1073_v28 }
 0xd17   :  { %v1144_v39 = vpack.c.bf16 %v1143_v38, %v1143_v38 }
 0xd18   :  { %1147 = vrot.lane.b32.xlu0 %v1145_v31, %s5525_s5 }
 0xd19   :  { %1193 = vrot.lane.b32.xlu1 %v1144_v39, %s5525_s5 }
 0xd8a   :  { %v1148_v40 = vpop.permute.xlu0 %1147 }
 0xd8b   :  { %v1194_v41 = vpop.permute.xlu1 %1193  ;;  %4629 = vmatmul.mubr.msk.bf16.vlgmr.msra.gmra.mrb[32].mxu0 %vm303_vm3, %v1148_v40 }
 0xd8c   :  { %4637 = vmatmul.mubr.msk.bf16.vlgmr.msra.gmra.mrb[32].mxu1 %vm303_vm3, %v1194_v41  ;;  %4641 = vmatpush3.bf16.msra.mxu0 %v5809_v19 }
 0xd8d   :  { %4642 = vmatprep.subr.bf16.mxu0 %v5523_v5  ;;  %4644 = vmatprep.mubr.msk.bf16.mxu0 %vm5524_vm0, %v5523_v5 }
 0xd8e   :  { %4649 = vmatpush3.bf16.msra.mxu1 %v5884_v20  ;;  %4652 = vmatprep.mubr.msk.bf16.mxu1 %vm5524_vm0, %v5523_v5 }
 0xd8f   :  { %4650 = vmatprep.subr.bf16.mxu1 %v5523_v5 }
 0xd90   :  { %4643 = vmatpush3.bf16.msra.mxu0 %v5822_v23 }
 0xd91   :  { %4656 = vmatprep.subr.bf16.mxu0 %v5523_v5 }
 0xd92   :  { %4651 = vmatpush3.bf16.msra.mxu1 %v5895_v22 }
 0xd93   :  { %4645 = vmatmul.mubr.msk.bf16.vlgmr.msra.gmra.mrb[36].mxu0 %vm303_vm3, %v1194_v41  ;;  %4664 = vmatprep.subr.bf16.mxu1 %v5523_v5 }
 0xd94   :  { %4657 = vmatpush3.bf16.msra.mxu0 %v5889_v21  ;;  %4660 = vmatprep.mubr.msk.bf16.mxu0 %vm5524_vm0, %v5523_v5 }
 0xd95   :  { %4658 = vmatprep.subr.bf16.mxu0 %v5523_v5 }
 0xd98   :  { %4659 = vmatpush3.bf16.msra.mxu0 %v5901_v24 }
 0xd99   :  { %4672 = vmatprep.subr.bf16.mxu0 %v5523_v5 }
 0xe5e   :  { %v1186_v42 = vpop.f32.mrb[32].mxu0 }
 0xe5f   :  { %v1232_v43 = vpop.f32.mrb[32].mxu1  ;;  %v4630_v44 = vpop.f32.mrb[33].mxu0 }
 0xe60   :  { %v1233_v45 = vadd.f32 %v1232_v43, %v1186_v42  ;;  %v4638_v46 = vpop.f32.mrb[33].mxu1  ;;  %v1189_v47 = vpop.f32.mrb[34].mxu0  ;;  %v6109_v42 = vld [vmem:[#allocation19] sm:$0xff] }
 0xe61   :  { %v1235_v48 = vpop.f32.mrb[34].mxu1  ;;  %v4631_v49 = vpop.f32.mrb[35].mxu0 }
 0xe62   :  { %v1238_v51 = vadd.f32 %v5935_v33, %v1233_v45  ;;  %v4639_v52 = vpop.f32.mrb[35].mxu1 }
 0xe64   :  { %v1239_v53 = vadd.f32 %v1238_v51, %v1238_v51 }
 0xe66   :  { %v1240_v54 = vsel %vm5860_vm10, %v1239_v53, %v1238_v51  ;;  %v1301_v55 = vpop.f32.mrb[36].mxu0 }
 0xe67   :  { %v4208_v56 = vmul.f32 -1.442695, %v1240_v54  ;;  %v1307_v58 = vadd.f32 %v1301_v55, %v5870_v1  ;;  %v4646_v5 = vpop.f32.mrb[37].mxu0 }
 0xe68   :  { %v1304_v59 = vpop.f32.mrb[38].mxu0 }
 0xe69   :  { %5133 = vpow2.f32 %v4208_v56  ;;  %v1308_v60 = vadd.f32 %v5853_v50, %v1307_v58  ;;  %v4647_v62 = vpop.f32.mrb[39].mxu0 }
 0xe6b   :  { %v1309_v0 = vadd.f32 %v1308_v60, %v1308_v60 }
 0xe6d   :  { %v1310_v63 = vsel %vm5860_vm10, %v1309_v0, %v1308_v60 }
 0xe6e   :  { %v4211_v3 = vmul.f32 -1.442695, %v1310_v63 }
 0xe70   :  { %5135 = vpow2.f32 %v4211_v3 }
 0xe73   :  { %v5134_v61 = vpop.eup %5133 }
 0xe74   :  { %v1244_v6 = vadd.f32 1.0, %v5134_v61 }
 0xe76   :  { %5137 = vrcp.f32 %v1244_v6 }
 0xe7a   :  { %v5136_v7 = vpop.eup %5135 }
 0xe7b   :  { %v1314_v8 = vadd.f32 1.0, %v5136_v7 }
 0xe7d   :  { %5139 = vrcp.f32 %v1314_v8 }
 0xe80   :  { %v5138_v9 = vpop.eup %5137 }
 0xe81   :  { %v1247_v1 = vadd.f32 %v5138_v9, %v5138_v9 }
 0xe83   :  { %v4209_v10 = vadd.f32 -1.0, %v1247_v1 }
 0xe85   :  { %v1249_v11 = vsel %vm5860_vm10, %v4209_v10, %v5138_v9 }
 0xe86   :  { %1252 = vrot.lane.b32.xlu0 %v1249_v11, %s5511_s3  ;;  %v1250_v18 = vmul.f32 %v1249_v11, %v6049_v32 }
 0xe87   :  { %v5140_v13 = vpop.eup %5139 }
 0xe88   :  { %v1317_v14 = vadd.f32 %v5140_v13, %v5140_v13 }
 0xe8a   :  { %v4212_v15 = vadd.f32 -1.0, %v1317_v14 }
 0xe8c   :  { %v1319_v17 = vsel %vm5860_vm10, %v4212_v15, %v5140_v13 }
 0xe8d   :  { %1322 = vrot.lane.b32.xlu1 %v1319_v17, %s5511_s3  ;;  %v1320_v35 = vmul.f32 %v1319_v17, %v6051_v34 }
 0xef8   :  { %v1253_v26 = vpop.permute.xlu0 %1252 }
 0xef9   :  { %v1255_v27 = vmul.f32 %v1253_v26, %v1249_v11 }
 0xefb   :  { %1257 = vrot.lane.b32.xlu0 %v1255_v27, %s5525_s5 }
 0xeff   :  { %v1323_v29 = vpop.permute.xlu1 %1322 }
 0xf00   :  { %v1325_v30 = vmul.f32 %v1323_v29, %v1319_v17 }
 0xf02   :  { %1327 = vrot.lane.b32.xlu1 %v1325_v30, %s5525_s5 }
 0xf6d   :  { %v1258_v2 = vpop.permute.xlu0 %1257 }
 0xf6e   :  { %v6096_v16 = vadd.f32 %v1258_v2, %v1250_v18 }
 0xf70   :  { %5141 = vtanh.f32 %v6096_v16 }
 0xf74   :  { %v1328_v36 = vpop.permute.xlu1 %1327 }
 0xf75   :  { %v6100_v37 = vadd.f32 %v1328_v36, %v1320_v35 }
 0xf77   :  { %5143 = vtanh.f32 %v6100_v37 }
 0xf7a   :  { %v5142_v28 = vpop.eup %5141 }
 0xf7b   :  { %1263 = vrot.lane.b32.xlu0 %v5142_v28, %s5511_s3  ;;  %v6168_v28 = vld [vmem:[%s6795_s4 + $0x8] sm:$0xff]  }
 0xf81   :  { %v5144_v25 = vpop.eup %5143 }
 0xf82   :  { %1333 = vrot.lane.b32.xlu1 %v5144_v25, %s5511_s3 }
 0xfed   :  { %v1264_v38 = vpop.permute.xlu0 %1263 }
 0xfee   :  { %v1266_v32 = vmul.f32 %v1264_v38, %v1249_v11  ;;  %v6144_v11 = vld [vmem:[%s6825_s26] sm:$0xff] }
 0xff0   :  { %v1338_v31 = vpack.c.bf16 %v1266_v32, %v1266_v32 }
 0xff2   :  { %1340 = vrot.lane.b32.xlu0 %v1338_v31, %s5525_s5 }
 0xff4   :  { %v1334_v39 = vpop.permute.xlu1 %1333 }
 0xff5   :  { %v1336_v40 = vmul.f32 %v1334_v39, %v1319_v17 }
 0xff7   :  { %v1337_v41 = vpack.c.bf16 %v1336_v40, %v1336_v40  ;;  %v6184_v40 = vld [vmem:[#allocation7] sm:$0xff]  }
 0xff9   :  { %1386 = vrot.lane.b32.xlu1 %v1337_v41, %s5525_s5  ;;  %v6188_v41 = vld [vmem:[#allocation7 + $0x8] sm:$0xff]  }
0x1064   :  { %v1341_v34 = vpop.permute.xlu0 %1340 }
0x1065   :  { %4653 = vmatmul.mubr.msk.bf16.vlgmr.msra.gmra.mrb[36].mxu1 %vm303_vm3, %v1341_v34 }
0x1066   :  { %4665 = vmatpush3.bf16.msra.mxu1 %v5809_v19  ;;  %4668 = vmatprep.mubr.msk.bf16.mxu1 %vm5524_vm0, %v6109_v42 }
0x1067   :  { %4666 = vmatprep.subr.bf16.mxu1 %v6109_v42 }
0x106a   :  { %4667 = vmatpush3.bf16.msra.mxu1 %v5822_v23 }
0x106b   :  { %v1387_v43 = vpop.permute.xlu1 %1386  ;;  %4680 = vmatprep.subr.bf16.mxu1 %v6109_v42 }
0x106c   :  { %4661 = vmatmul.mubr.msk.bf16.vlgmr.msra.gmra.mrb[40].mxu0 %vm303_vm3, %v1387_v43 }
0x106d   :  { %4669 = vmatmul.mubr.msk.bf16.vlgmr.msra.gmra.mrb[40].mxu1 %vm303_vm3, %v1387_v43  ;;  %4673 = vmatpush3.bf16.msra.mxu0 %v5884_v20 }
0x106e   :  { %4674 = vmatprep.subr.bf16.mxu0 %v6109_v42  ;;  %4676 = vmatprep.mubr.msk.bf16.mxu0 %vm5524_vm0, %v6109_v42 }
0x106f   :  { %4681 = vmatpush3.bf16.msra.mxu1 %v5889_v21  ;;  %4684 = vmatprep.mubr.msk.bf16.mxu1 %vm5524_vm0, %v6109_v42 }
0x1070   :  { %4682 = vmatprep.subr.bf16.mxu1 %v6109_v42 }
0x1071   :  { %4675 = vmatpush3.bf16.msra.mxu0 %v5895_v22 }
0x1072   :  { %4688 = vmatprep.subr.bf16.mxu0 %v6109_v42 }
0x1073   :  { %4683 = vmatpush3.bf16.msra.mxu1 %v5901_v24 }
0x1074   :  { %4696 = vmatprep.subr.bf16.mxu1 %v6109_v42 }
0x1138   :  { %v1379_v19 = vpop.f32.mrb[36].mxu1 }
0x1139   :  { %v4654_v23 = vpop.f32.mrb[37].mxu1 }
0x113a   :  { %v1382_v20 = vpop.f32.mrb[38].mxu1 }
0x113b   :  { %v4655_v44 = vpop.f32.mrb[39].mxu1 }
0x113f   :  { %v1425_v45 = vpop.f32.mrb[40].mxu0 }
0x1140   :  { %v1426_v46 = vadd.f32 %v1425_v45, %v1379_v19  ;;  %v1494_v21 = vpop.f32.mrb[40].mxu1  ;;  %v4662_v47 = vpop.f32.mrb[41].mxu0 }
0x1141   :  { %v1500_v48 = vadd.f32 %v1494_v21, %v5872_v4  ;;  %v4670_v49 = vpop.f32.mrb[41].mxu1  ;;  %v1428_v51 = vpop.f32.mrb[42].mxu0 }
0x1142   :  { %v1431_v22 = vadd.f32 %v5935_v33, %v1426_v46  ;;  %v1497_v52 = vpop.f32.mrb[42].mxu1  ;;  %v4663_v53 = vpop.f32.mrb[43].mxu0  ;;  %v6196_v51 = vld [vmem:[#allocation9] sm:$0xff]  }
0x1143   :  { %v4671_v54 = vpop.f32.mrb[43].mxu1  ;;  %v1501_v0 = vadd.f32 %v5853_v50, %v1500_v48  ;;  %v6200_v52 = vld [vmem:[#allocation9 + $0x8] sm:$0xff]  }
0x1144   :  { %v1432_v24 = vadd.f32 %v1431_v22, %v1431_v22 }
0x1145   :  { %v1502_v63 = vadd.f32 %v1501_v0, %v1501_v0 }
0x1146   :  { %v1433_v55 = vsel %vm5860_vm10, %v1432_v24, %v1431_v22 }
0x1147   :  { %v4215_v56 = vmul.f32 -1.442695, %v1433_v55  ;;  %v1503_v3 = vsel %vm5860_vm10, %v1502_v63, %v1501_v0 }
0x1148   :  { %v4218_v61 = vmul.f32 -1.442695, %v1503_v3  ;;  %v6213_v3 = vld [vmem:[#allocation10] ss:$0 sm:$0xff] }
0x1149   :  { %5145 = vpow2.f32 %v4215_v56 }
0x1153   :  { %v5146_v58 = vpop.eup %5145 }
0x1154   :  { %v1437_v5 = vadd.f32 1.0, %v5146_v58 }
0x1156   :  { %5147 = vrcp.f32 %v1437_v5 }
0x1157   :  { %5149 = vpow2.f32 %v4218_v61 }
0x1160   :  { %v5148_v59 = vpop.eup %5147 }
0x1161   :  { %v1440_v60 = vadd.f32 %v5148_v59, %v5148_v59  ;;  %v5150_v6 = vpop.eup %5149 }
0x1162   :  { %v1507_v7 = vadd.f32 1.0, %v5150_v6 }
0x1163   :  { %v4216_v62 = vadd.f32 -1.0, %v1440_v60 }
0x1164   :  { %5151 = vrcp.f32 %v1507_v7 }
0x1165   :  { %v1442_v4 = vsel %vm5860_vm10, %v4216_v62, %v5148_v59 }
0x1166   :  { %1445 = vrot.lane.b32.xlu0 %v1442_v4, %s5511_s3  ;;  %v1443_v14 = vmul.f32 %v1442_v4, %v6096_v16  ;;  %v6160_v16 = vld [vmem:[%s6795_s4] sm:$0xff]  }
0x116e   :  { %v5152_v8 = vpop.eup %5151 }
0x116f   :  { %v1510_v10 = vadd.f32 %v5152_v8, %v5152_v8 }
0x1171   :  { %v4219_v50 = vadd.f32 -1.0, %v1510_v10 }
0x1173   :  { %v1512_v13 = vsel %vm5860_vm10, %v4219_v50, %v5152_v8 }
0x1174   :  { %v1513_v25 = vmul.f32 %v1512_v13, %v6100_v37 }
0x11d8   :  { %v1446_v9 = vpop.permute.xlu0 %1445 }
0x11d9   :  { %v1448_v1 = vmul.f32 %v1446_v9, %v1442_v4 }
0x11db   :  { %1450 = vrot.lane.b32.xlu1 %v1448_v1, %s5525_s5 }
0x11df   :  { %1656 = vperm.xlu1 %5062, %v6144_v11  }
0x11e3   :  { %1515 = vrot.lane.b32.xlu1 %v1512_v13, %s5511_s3 }
0x124d   :  { %v1451_v15 = vpop.permute.xlu1 %1450 }
0x124e   :  { %v6151_v17 = vadd.f32 %v1451_v15, %v1443_v14 }
0x1250   :  { %5153 = vtanh.f32 %v6151_v17 }
0x125a   :  { %v5154_v26 = vpop.eup %5153 }
0x125b   :  { %1456 = vrot.lane.b32.xlu0 %v5154_v26, %s5511_s3 }
0x125e   :  { %v1657_v27 = vpop.permute.xlu1 %1656 }
0x125f   :  { %vm1658_vm11 = vcmp.eq.s32.totalorder %v5800_v12, %v1657_v27 }
0x1260   :  { %v4224_v38 = vsel %vm1658_vm11, 1.0, %v6109_v42 }
0x1261   :  { %v1661_v39 = vpack.c.bf16 %v4224_v38, %v4224_v38 }
0x1262   :  { %v1516_v2 = vpop.permute.xlu1 %1515 }
0x1263   :  { %v1518_v35 = vmul.f32 %v1516_v2, %v1512_v13 }
0x12cd   :  { %v1457_v29 = vpop.permute.xlu0 %1456 }
0x12ce   :  { %v1459_v30 = vmul.f32 %v1457_v29, %v1442_v4 }
0x12d0   :  { %v1531_v18 = vpack.c.bf16 %v1459_v30, %v1459_v30 }
0x12d2   :  { %1533 = vrot.lane.b32.xlu0 %v1531_v18, %s5525_s5 }
0x12d6   :  { %1520 = vrot.lane.b32.xlu0 %v1518_v35, %s5525_s5 }
0x1344   :  { %v1534_v36 = vpop.permute.xlu0 %1533 }
0x1345   :  { %4677 = vmatmul.mubr.msk.bf16.vlgmr.msra.gmra.mrb[44].mxu0 %vm303_vm3, %v1534_v36 }
0x1346   :  { %4689 = vmatpush3.bf16.msra.mxu0 %v6160_v16  ;;  %4692 = vmatprep.mubr.msk.bf16.mxu0 %vm5524_vm0, %v6109_v42 }
0x1347   :  { %4690 = vmatprep.subr.bf16.mxu0 %v6109_v42 }
0x1348   :  { %v1521_v32 = vpop.permute.xlu0 %1520 }
0x1349   :  { %v6175_v31 = vadd.f32 %v1521_v32, %v1513_v25 }
0x134a   :  { %4691 = vmatpush3.bf16.msra.mxu0 %v6168_v28 }
0x134b   :  { %5155 = vtanh.f32 %v6175_v31  ;;  %4704 = vmatprep.subr.bf16.mxu0 %v6109_v42 }
0x134d   :  { %4693 = vmatmul.mubr.msk.bf16.vlgmr.msra.gmra.mrb[48].mxu0 %vm303_vm3, %v1661_v39 }
0x134e   :  { %4708 = vmatprep.mubr.msk.bf16.mxu0 %vm5524_vm0, %v6109_v42  ;;  %4705 = vmatpush3.bf16.msra.mxu0 %v6184_v40 }
0x134f   :  { %4706 = vmatprep.subr.bf16.mxu0 %v6109_v42 }
0x1352   :  { %4707 = vmatpush3.bf16.msra.mxu0 %v6188_v41 }
0x1353   :  { %4720 = vmatprep.subr.bf16.mxu0 %v6109_v42 }
0x1355   :  { %v5156_v37 = vpop.eup %5155 }
0x1356   :  { %1526 = vrot.lane.b32.xlu1 %v5156_v37, %s5511_s3 }
0x13c8   :  { %v1527_v34 = vpop.permute.xlu1 %1526 }
0x13c9   :  { %v1529_v43 = vmul.f32 %v1527_v34, %v1512_v13 }
0x13cb   :  { %v1530_v19 = vpack.c.bf16 %v1529_v43, %v1529_v43 }
0x13cd   :  { %1579 = vrot.lane.b32.xlu0 %v1530_v19, %s5525_s5 }
0x1418   :  { %v1572_v23 = vpop.f32.mrb[44].mxu0 }
0x1419   :  { %v4678_v20 = vpop.f32.mrb[45].mxu0 }
0x141a   :  { %v1575_v44 = vpop.f32.mrb[46].mxu0 }
0x141b   :  { %v4679_v45 = vpop.f32.mrb[47].mxu0 }
0x1420   :  { %v1711_v46 = vpop.f32.mrb[48].mxu0 }
0x1421   :  { %v1717_v21 = vpack.c.bf16 %v1711_v46, %v1711_v46  ;;  %v4694_v47 = vpop.f32.mrb[49].mxu0  ;;  %v6234_v46 = vld [vmem:[#allocation13] sm:$0xff]  }
0x1422   :  { %v1714_v48 = vpop.f32.mrb[50].mxu0  ;;  %v6247_v47 = vld [vmem:[#allocation12 + $0x8] sm:$0xff]  }
0x1423   :  { %v4695_v49 = vpop.f32.mrb[51].mxu0  ;;  %4709 = vmatmul.mubr.msk.bf16.vlgmr.msra.gmra.mrb[52].mxu0 %vm303_vm3, %v1717_v21  ;;  %v6244_v21 = vld [vmem:[#allocation12] sm:$0xff]  }
0x1424   :  { %4724 = vmatprep.mubr.msk.bf16.mxu0 %vm5524_vm0, %v6109_v42  ;;  %4721 = vmatpush3.bf16.msra.mxu0 %v6244_v21 }
0x1425   :  { %4722 = vmatprep.subr.bf16.mxu0 %v6109_v42 }
0x1428   :  { %4723 = vmatpush3.bf16.msra.mxu0 %v6247_v47 }
0x1429   :  { %4736 = vmatprep.subr.bf16.mxu0 %v6109_v42 }
0x143f   :  { %v1580_v22 = vpop.permute.xlu0 %1579 }
0x1440   :  { %4685 = vmatmul.mubr.msk.bf16.vlgmr.msra.gmra.mrb[44].mxu1 %vm303_vm3, %v1580_v22 }
0x1441   :  { %4697 = vmatpush3.bf16.msra.mxu1 %v6196_v51  ;;  %4700 = vmatprep.mubr.msk.bf16.mxu1 %vm5524_vm0, %v6109_v42 }
0x1442   :  { %4698 = vmatprep.subr.bf16.mxu1 %v6109_v42 }
0x1445   :  { %4699 = vmatpush3.bf16.msra.mxu1 %v6200_v52 }
0x1446   :  { %4712 = vmatprep.subr.bf16.mxu1 %v6109_v42 }
0x1448   :  { %4701 = vmatmul.mubr.msk.bf16.vlgmr.msra.gmra.mrb[48].mxu1 %vm303_vm3, %v1580_v22 }
0x1449   :  { %4716 = vmatprep.mubr.msk.bf16.mxu1 %vm5524_vm0, %v6109_v42  ;;  %4713 = vmatpush3.bf16.msra.mxu1 %v6234_v46 }
0x144a   :  { %4714 = vmatprep.subr.bf16.mxu1 %v6109_v42 }
0x14f6   :  { %v1819_v53 = vpop.f32.mrb[52].mxu0 }
0x14f7   :  { %v4710_v54 = vpop.f32.mrb[53].mxu0 }
0x14f8   :  { %v1822_v24 = vpop.f32.mrb[54].mxu0 }
0x14f9   :  { %v4711_v55 = vpop.f32.mrb[55].mxu0 }
0x1513   :  { %v1618_v56 = vpop.f32.mrb[44].mxu1 }
0x1514   :  { %v1619_v58 = vadd.f32 %v1618_v56, %v1572_v23  ;;  %v4686_v5 = vpop.f32.mrb[45].mxu1 }
0x1515   :  { %v1621_v59 = vpop.f32.mrb[46].mxu1 }
0x1516   :  { %v1624_v60 = vadd.f32 %v5935_v33, %v1619_v58  ;;  %v4687_v62 = vpop.f32.mrb[47].mxu1 }
0x1517   :  { %v6264_v62 = vld [vmem:[#allocation15] ss:$0 sm:$0xff] }
0x1518   :  { %v1625_v4 = vadd.f32 %v1624_v60, %v1624_v60 }
0x151a   :  { %v1626_v0 = vsel %vm5860_vm10, %v1625_v4, %v1624_v60 }
0x151b   :  { %v4222_v63 = vmul.f32 -1.442695, %v1626_v0  ;;  %v1764_v61 = vpop.f32.mrb[48].mxu1 }
0x151c   :  { %v1820_v6 = vadd.f32 %v1819_v53, %v1764_v61  ;;  %v4702_v7 = vpop.f32.mrb[49].mxu1 }
0x151d   :  { %5157 = vpow2.f32 %v4222_v63  ;;  %v1767_v8 = vpop.f32.mrb[50].mxu1 }
0x151e   :  { %v1831_v9 = vadd.f32 %v6213_v3, %v1820_v6  ;;  %v4703_v1 = vpop.f32.mrb[51].mxu1 }
0x1520   :  { %v1832_v10 = vadd.f32 %v1831_v9, %v1831_v9 }
0x1522   :  { %v1833_v33 = vsel %vm5860_vm10, %v1832_v10, %v1831_v9 }
0x1523   :  { %v4235_v50 = vmul.f32 -1.442695, %v1833_v33 }
0x1525   :  { %5159 = vpow2.f32 %v4235_v50 }
0x1527   :  { %v5158_v13 = vpop.eup %5157 }
0x1528   :  { %v1630_v14 = vadd.f32 1.0, %v5158_v13 }
0x152a   :  { %5161 = vrcp.f32 %v1630_v14 }
0x152f   :  { %v5160_v15 = vpop.eup %5159 }
0x1530   :  { %v1837_v26 = vadd.f32 1.0, %v5160_v15 }
0x1532   :  { %5163 = vrcp.f32 %v1837_v26 }
0x1534   :  { %v5162_v27 = vpop.eup %5161 }
0x1535   :  { %v1633_v29 = vadd.f32 %v5162_v27, %v5162_v27 }
0x1537   :  { %v4223_v30 = vadd.f32 -1.0, %v1633_v29 }
0x1539   :  { %v1635_v18 = vsel %vm5860_vm10, %v4223_v30, %v5162_v27 }
0x153a   :  { %1638 = vrot.lane.b32.xlu1 %v1635_v18, %s5511_s3  ;;  %v1636_v34 = vmul.f32 %v1635_v18, %v6151_v17  ;;  %v6238_v17 = vld [vmem:[#allocation13 + $0x8] sm:$0xff]  }
0x153b   :  { %4715 = vmatpush3.bf16.msra.mxu1 %v6238_v17 }
0x153c   :  { %v5164_v2 = vpop.eup %5163  ;;  %4728 = vmatprep.subr.bf16.mxu1 %v6109_v42 }
0x153d   :  { %v1840_v35 = vadd.f32 %v5164_v2, %v5164_v2 }
0x153f   :  { %v4236_v36 = vadd.f32 -1.0, %v1840_v35  ;;  %v6280_v35 = vld [vmem:[#allocation16 + $0x8] sm:$0xff]  }
0x1541   :  { %v1842_v25 = vsel %vm5860_vm10, %v4236_v36, %v5164_v2  ;;  %v6277_v2 = vld [vmem:[#allocation16] sm:$0xff]  }
0x1542   :  { %1845 = vrot.lane.b32.xlu0 %v1842_v25, %s5511_s3  ;;  %v1843_v23 = vmul.f32 %v1842_v25, %v6175_v31 }
0x15ac   :  { %v1639_v38 = vpop.permute.xlu1 %1638 }
0x15ad   :  { %v1641_v32 = vmul.f32 %v1639_v38, %v1635_v18 }
0x15af   :  { %1643 = vrot.lane.b32.xlu1 %v1641_v32, %s5525_s5 }
0x15b4   :  { %v1846_v39 = vpop.permute.xlu0 %1845 }
0x15b5   :  { %v1848_v37 = vmul.f32 %v1846_v39, %v1842_v25 }
0x15b7   :  { %1850 = vrot.lane.b32.xlu0 %v1848_v37, %s5525_s5  ;;  %v6308_v37 = vld [vmem:[#allocation18] ss:$0 sm:$0xff] }
0x1621   :  { %v1644_v43 = vpop.permute.xlu1 %1643 }
0x1622   :  { %v6227_v19 = vadd.f32 %v1644_v43, %v1636_v34 }
0x1624   :  { %5165 = vtanh.f32 %v6227_v19 }
0x1629   :  { %v1851_v20 = vpop.permute.xlu0 %1850 }
0x162a   :  { %v6231_v44 = vadd.f32 %v1851_v20, %v1843_v23 }
0x162c   :  { %5167 = vtanh.f32 %v6231_v44 }
0x162e   :  { %v5166_v45 = vpop.eup %5165 }
0x162f   :  { %1649 = vrot.lane.b32.xlu1 %v5166_v45, %s5511_s3 }
0x1636   :  { %v5168_v31 = vpop.eup %5167 }
0x1637   :  { %1856 = vrot.lane.b32.xlu0 %v5168_v31, %s5511_s3 }
0x16a1   :  { %v1650_v48 = vpop.permute.xlu1 %1649 }
0x16a2   :  { %v1652_v49 = vmul.f32 %v1650_v48, %v1635_v18 }
0x16a4   :  { %v1861_v22 = vpack.c.bf16 %v1652_v49, %v1652_v49 }
0x16a6   :  { %1863 = vrot.lane.b32.xlu1 %v1861_v22, %s5525_s5 }
0x16a9   :  { %v1857_v53 = vpop.permute.xlu0 %1856 }
0x16aa   :  { %v1859_v54 = vmul.f32 %v1857_v53, %v1842_v25 }
0x16ac   :  { %v1860_v24 = vpack.c.bf16 %v1859_v54, %v1859_v54 }
0x16ae   :  { %1921 = vrot.lane.b32.xlu0 %v1860_v24, %s5525_s5 }
0x1718   :  { %v1864_v55 = vpop.permute.xlu1 %1863 }
0x1719   :  { %4717 = vmatmul.mubr.msk.bf16.vlgmr.msra.gmra.mrb[52].mxu1 %vm303_vm3, %v1864_v55  ;;  %v6314_v55 = vcvt.s32.f32 %v5800_v12 }
0x171a   :  { %4732 = vmatprep.mubr.msk.bf16.mxu1 %vm5524_vm0, %v6109_v42  ;;  %4729 = vmatpush3.bf16.msra.mxu1 %v6277_v2 }
0x171b   :  { %4730 = vmatprep.subr.bf16.mxu1 %v6109_v42 }
0x171e   :  { %4731 = vmatpush3.bf16.msra.mxu1 %v6280_v35 }
0x171f   :  { %4744 = vmatprep.subr.bf16.mxu1 %v6109_v42 }
0x1720   :  { %v1922_v56 = vpop.permute.xlu0 %1921 }
0x1721   :  { %4725 = vmatmul.mubr.msk.bf16.vlgmr.msra.gmra.mrb[56].mxu0 %vm303_vm3, %v1922_v56 }
0x1722   :  { %4737 = vmatpush3.bf16.msra.mxu0 %v6160_v16  ;;  %4740 = vmatprep.mubr.msk.bf16.mxu0 %vm5524_vm0, %v6109_v42 }
0x1723   :  { %4738 = vmatprep.subr.bf16.mxu0 %v6109_v42 }
0x1726   :  { %4739 = vmatpush3.bf16.msra.mxu0 %v6168_v28 }
0x1727   :  { %4752 = vmatprep.subr.bf16.mxu0 %v6109_v42 }
0x17ec   :  { %v1914_v58 = vpop.f32.mrb[52].mxu1 }
0x17ed   :  { %v4718_v5 = vpop.f32.mrb[53].mxu1 }
0x17ee   :  { %v1917_v59 = vpop.f32.mrb[54].mxu1  ;;  %v5526_v5 = vmov 1  }
0x17ef   :  { %v4719_v60 = vpop.f32.mrb[55].mxu1  ;;  %5063 = vset.pattern.permute.xlu0 %v5526_v5 }
0x17f0   :  { %v2089_v60 = vstv %s4250_s13 }
0x17f4   :  { %v1972_v4 = vpop.f32.mrb[56].mxu0 }
0x17f5   :  { %v1973_v0 = vadd.f32 %v1972_v4, %v1914_v58  ;;  %v4726_v63 = vpop.f32.mrb[57].mxu0 }
0x17f6   :  { %v1975_v61 = vpop.f32.mrb[58].mxu0 }
0x17f7   :  { %v1984_v6 = vadd.f32 %v6264_v62, %v1973_v0  ;;  %v4727_v7 = vpop.f32.mrb[59].mxu0  ;;  %v2092_v0 = vstv %s2091_s0  ;;  %v2090_v61 = vmul.u32 %v2089_v60, %v6144_v11 }
0x17f9   :  { %v1985_v8 = vadd.f32 %v1984_v6, %v1984_v6 }
0x17fb   :  { %v1986_v9 = vsel %vm5860_vm10, %v1985_v8, %v1984_v6 }
0x17fc   :  { %v4244_v1 = vmul.f32 -1.442695, %v1986_v9 }
0x17fe   :  { %5169 = vpow2.f32 %v4244_v1 }
0x1808   :  { %v5170_v10 = vpop.eup %5169 }
0x1809   :  { %v1990_v33 = vadd.f32 1.0, %v5170_v10 }
0x180b   :  { %5171 = vrcp.f32 %v1990_v33 }
0x1815   :  { %v5172_v50 = vpop.eup %5171 }
0x1816   :  { %v1993_v13 = vadd.f32 %v5172_v50, %v5172_v50 }
0x1818   :  { %v4245_v14 = vadd.f32 -1.0, %v1993_v13 }
0x181a   :  { %v1995_v15 = vsel %vm5860_vm10, %v4245_v14, %v5172_v50 }
0x181b   :  { %1998 = vrot.lane.b32.xlu1 %v1995_v15, %s5511_s3  ;;  %v1996_v29 = vmul.f32 %v1995_v15, %v6227_v19 }
0x188d   :  { %v1999_v26 = vpop.permute.xlu1 %1998 }
0x188e   :  { %v2001_v27 = vmul.f32 %v1999_v26, %v1995_v15 }
0x1890   :  { %2003 = vrot.lane.b32.xlu0 %v2001_v27, %s5525_s5 }
0x1902   :  { %v2004_v30 = vpop.permute.xlu0 %2003 }
0x1903   :  { %v6274_v18 = vadd.f32 %v2004_v30, %v1996_v29 }
0x1905   :  { %5173 = vtanh.f32 %v6274_v18 }
0x190f   :  { %v5174_v36 = vpop.eup %5173 }
0x1910   :  { %2009 = vrot.lane.b32.xlu1 %v5174_v36, %s5511_s3 }
0x1982   :  { %v2010_v25 = vpop.permute.xlu1 %2009 }
0x1983   :  { %v2012_v38 = vmul.f32 %v2010_v25, %v1995_v15 }
0x1985   :  { %v2013_v32 = vpack.c.bf16 %v2012_v38, %v2012_v38 }
0x1987   :  { %2021 = vrot.lane.b32.xlu0 %v2013_v32, %s5525_s5 }
0x19f9   :  { %v2022_v39 = vpop.permute.xlu0 %2021 }
0x19fa   :  { %4733 = vmatmul.mubr.msk.bf16.vlgmr.msra.gmra.mrb[56].mxu1 %vm303_vm3, %v2022_v39 }
0x19fb   :  { %4745 = vmatpush3.bf16.msra.mxu1 %v6196_v51  ;;  %4748 = vmatprep.mubr.msk.bf16.mxu1 %vm5524_vm0, %v6109_v42 }
0x19fc   :  { %4746 = vmatprep.subr.bf16.mxu1 %v6109_v42 }
0x19ff   :  { %4747 = vmatpush3.bf16.msra.mxu1 %v6200_v52 }
0x1a00   :  { %4760 = vmatprep.subr.bf16.mxu1 %v6109_v42 }
0x1a02   :  { %4749 = vmatmul.mubr.msk.bf16.vlgmr.msra.gmra.mrb[60].mxu1 %vm303_vm3, %v1922_v56 }
0x1a03   :  { %4761 = vmatpush3.bf16.msra.mxu1 %v6234_v46  ;;  %4764 = vmatprep.mubr.msk.bf16.mxu1 %vm5524_vm0, %v6109_v42 }
0x1a04   :  { %4762 = vmatprep.subr.bf16.mxu1 %v6109_v42 }
0x1a07   :  { %4763 = vmatpush3.bf16.msra.mxu1 %v6238_v17 }
0x1a08   :  { %4776 = vmatprep.subr.bf16.mxu1 %v6109_v42 }
0x1a0a   :  { %4765 = vmatmul.mubr.msk.bf16.vlgmr.msra.gmra.mrb[64].mxu1 %vm303_vm3, %v2022_v39 }
0x1a0b   :  { %4777 = vmatpush3.bf16.msra.mxu1 %v6277_v2  ;;  %4780 = vmatprep.mubr.msk.bf16.mxu1 %vm5524_vm0, %v6109_v42 }
0x1a0c   :  { %4778 = vmatprep.subr.bf16.mxu1 %v6109_v42 }
0x1a0f   :  { %4779 = vmatpush3.bf16.msra.mxu1 %v6280_v35 }
0x1a10   :  { %4792 = vmatprep.subr.bf16.mxu1 %v6109_v42 }
0x1acd   :  { %v2072_v34 = vpop.f32.mrb[56].mxu1 }
0x1ace   :  { %v2073_v43 = vadd.f32 %v6308_v37, %v2072_v34  ;;  %v4734_v19 = vpop.f32.mrb[57].mxu1 }
0x1acf   :  { %v2075_v23 = vpop.f32.mrb[58].mxu1 }
0x1ad0   :  { %2079 = vst [vmem:[#allocation19 + $0x8] sm:$0xff] %v2073_v43  ;;  %2080 = vmax.xlane.f32.xlu1 %v2073_v43  ;;  %v4735_v20 = vpop.f32.mrb[59].mxu1 }
0x1ad5   :  { %v2180_v45 = vpop.f32.mrb[60].mxu1 }
0x1ad6   :  { %v4750_v31 = vpop.f32.mrb[61].mxu1 }
0x1ad7   :  { %v2183_v48 = vpop.f32.mrb[62].mxu1 }
0x1ad8   :  { %v4751_v49 = vpop.f32.mrb[63].mxu1 }
0x1add   :  { %v6311_v22 = vpop.f32.mrb[64].mxu1 }
0x1ade   :  { %v4766_v53 = vpop.f32.mrb[65].mxu1 }
0x1adf   :  { %v2296_v54 = vpop.f32.mrb[66].mxu1 }
0x1ae0   :  { %v4767_v24 = vpop.f32.mrb[67].mxu1 }
0x1b5d   :  { %v2081_v56 = vpop.xlane.xlu1 %2080 }
0x1b5e   :  { %vm2082_vm12 = vcmp.eq.f32.partialorder %v2073_v43, %v2081_v56 }
0x1b5f   :  { %v2083_v58 = vsel %vm2082_vm12, %v6314_v55, 128.0 }
0x1b60   :  { %2084 = vmin.xlane.f32.xlu0 %v2083_v58 }
0x1bed   :  { %v2085_v59 = vpop.xlane.xlu0 %2084 }
0x1bee   :  { %v5024_v4 = vtrunc.f32 %v2085_v59 }
0x1bf0   :  { %v5025_v63 = vcvt.f32.s32 %v5024_v4 }
0x1bf2   :  { %v2093_v6 = vmul.u32 %v5025_v63, %v2092_v0 }
0x1bf4   :  { %v2094_v7 = vadd.s32 %v2093_v6, %v2090_v61 }
0x1bf6   :  { %2096 = vperm.xlu0 %5063, %v2094_v7  }
0x1c75   :  { %v2097_v8 = vpop.permute.xlu0 %2096 }
0x1c76   :  { %vm2098_vm13 = vcmp.eq.s32.totalorder %v5800_v12, %v2097_v8 }
0x1c77   :  { %v4251_v9 = vsel %vm2098_vm13, 1.0, %v6109_v42 }
0x1c78   :  { %v2101_v1 = vpack.c.bf16 %v4251_v9, %v4251_v9 }
0x1c7a   :  { %4741 = vmatmul.mubr.msk.bf16.vlgmr.msra.gmra.mrb[60].mxu0 %vm303_vm3, %v2101_v1 }
0x1c7b   :  { %4753 = vmatpush3.bf16.msra.mxu0 %v6184_v40  ;;  %4756 = vmatprep.mubr.msk.bf16.mxu0 %vm5524_vm0, %v6109_v42 }
0x1c7c   :  { %4754 = vmatprep.subr.bf16.mxu0 %v6109_v42 }
0x1c7f   :  { %4755 = vmatpush3.bf16.msra.mxu0 %v6188_v41 }
0x1c80   :  { %4768 = vmatprep.subr.bf16.mxu0 %v6109_v42 }
0x1d4d   :  { %v2139_v10 = vpop.f32.mrb[60].mxu0 }
0x1d4e   :  { %v2145_v33 = vpack.c.bf16 %v2139_v10, %v2139_v10  ;;  %v4742_v50 = vpop.f32.mrb[61].mxu0 }
0x1d4f   :  { %v2142_v13 = vpop.f32.mrb[62].mxu0 }
0x1d50   :  { %v4743_v14 = vpop.f32.mrb[63].mxu0  ;;  %4757 = vmatmul.mubr.msk.bf16.vlgmr.msra.gmra.mrb[64].mxu0 %vm303_vm3, %v2145_v33 }
0x1d51   :  { %4769 = vmatpush3.bf16.msra.mxu0 %v6244_v21  ;;  %4772 = vmatprep.mubr.msk.bf16.mxu0 %vm5524_vm0, %v6109_v42 }
0x1d52   :  { %4770 = vmatprep.subr.bf16.mxu0 %v6109_v42 }
0x1d55   :  { %4771 = vmatpush3.bf16.msra.mxu0 %v6247_v47 }
0x1d56   :  { %4784 = vmatprep.subr.bf16.mxu0 %v6109_v42 }
0x1e23   :  { %v2223_v15 = vpop.f32.mrb[64].mxu0 }
0x1e24   :  { %v2224_v26 = vadd.f32 %v2223_v15, %v2180_v45  ;;  %v4758_v27 = vpop.f32.mrb[65].mxu0 }
0x1e25   :  { %v2226_v29 = vpop.f32.mrb[66].mxu0 }
0x1e26   :  { %v2229_v30 = vadd.f32 %v6213_v3, %v2224_v26  ;;  %v4759_v36 = vpop.f32.mrb[67].mxu0 }
0x1e28   :  { %v2230_v25 = vadd.f32 %v2229_v30, %v2229_v30 }
0x1e2a   :  { %v2231_v38 = vsel %vm5860_vm10, %v2230_v25, %v2229_v30 }
0x1e2b   :  { %v4255_v32 = vmul.f32 -1.442695, %v2231_v38 }
0x1e2d   :  { %5175 = vpow2.f32 %v4255_v32 }
0x1e37   :  { %v5176_v39 = vpop.eup %5175 }
0x1e38   :  { %v2235_v34 = vadd.f32 1.0, %v5176_v39 }
0x1e3a   :  { %5177 = vrcp.f32 %v2235_v34 }
0x1e44   :  { %v5178_v43 = vpop.eup %5177 }
0x1e45   :  { %v2238_v19 = vadd.f32 %v5178_v43, %v5178_v43 }
0x1e47   :  { %v4256_v23 = vadd.f32 -1.0, %v2238_v19 }
0x1e49   :  { %v2240_v20 = vsel %vm5860_vm10, %v4256_v23, %v5178_v43 }
0x1e4a   :  { %2243 = vrot.lane.b32.xlu1 %v2240_v20, %s5511_s3  ;;  %v2241_v48 = vmul.f32 %v2240_v20, %v6231_v44 }
0x1ebc   :  { %v2244_v45 = vpop.permute.xlu1 %2243 }
0x1ebd   :  { %v2246_v31 = vmul.f32 %v2244_v45, %v2240_v20 }
0x1ebf   :  { %2248 = vrot.lane.b32.xlu1 %v2246_v31, %s5525_s5 }
0x1f31   :  { %v2249_v49 = vpop.permute.xlu1 %2248 }
0x1f32   :  { %v6342_v53 = vadd.f32 %v2249_v49, %v2241_v48 }
0x1f34   :  { %5179 = vtanh.f32 %v6342_v53 }
0x1f3e   :  { %v5180_v54 = vpop.eup %5179 }
0x1f3f   :  { %2254 = vrot.lane.b32.xlu1 %v5180_v54, %s5511_s3 }
0x1fb1   :  { %v2255_v24 = vpop.permute.xlu1 %2254 }
0x1fb2   :  { %v2257_v56 = vmul.f32 %v2255_v24, %v2240_v20 }
0x1fb4   :  { %v2258_v58 = vpack.c.bf16 %v2257_v56, %v2257_v56  ;;  %v5527_v56 = vmov 2  }
0x1fb5   :  { %5064 = vset.pattern.permute.xlu0 %v5527_v56 }
0x1fb6   :  { %2300 = vrot.lane.b32.xlu1 %v2258_v58, %s5525_s5 }
0x2028   :  { %v2301_v5 = vpop.permute.xlu1 %2300 }
0x2029   :  { %4773 = vmatmul.mubr.msk.bf16.vlgmr.msra.gmra.mrb[68].mxu0 %vm303_vm3, %v2301_v5 }
0x202a   :  { %4785 = vmatpush3.bf16.msra.mxu0 %v6160_v16  ;;  %4788 = vmatprep.mubr.msk.bf16.mxu0 %vm5524_vm0, %v6109_v42 }
0x202b   :  { %4786 = vmatprep.subr.bf16.mxu0 %v6109_v42 }
0x202e   :  { %4787 = vmatpush3.bf16.msra.mxu0 %v6168_v28 }
0x202f   :  { %4800 = vmatprep.subr.bf16.mxu0 %v6109_v42 }
0x20fc   :  { %v2339_v44 = vpop.f32.mrb[68].mxu0 }
0x20fd   :  { %v2340_v59 = vadd.f32 %v2339_v44, %v6311_v22  ;;  %v4774_v60 = vpop.f32.mrb[69].mxu0 }
0x20fe   :  { %v2342_v4 = vpop.f32.mrb[70].mxu0 }
0x20ff   :  { %v2345_v0 = vadd.f32 %v6264_v62, %v2340_v59  ;;  %v4775_v63 = vpop.f32.mrb[71].mxu0  ;;  %v2435_v59 = vstv %s2434_s12 }
0x2101   :  { %v2346_v61 = vadd.f32 %v2345_v0, %v2345_v0 }
0x2103   :  { %v2347_v6 = vsel %vm5860_vm10, %v2346_v61, %v2345_v0 }
0x2104   :  { %v4259_v7 = vmul.f32 -1.442695, %v2347_v6 }
0x2106   :  { %5181 = vpow2.f32 %v4259_v7 }
0x2110   :  { %v5182_v8 = vpop.eup %5181 }
0x2111   :  { %v2351_v9 = vadd.f32 1.0, %v5182_v8 }
0x2113   :  { %5183 = vrcp.f32 %v2351_v9 }
0x211d   :  { %v5184_v1 = vpop.eup %5183 }
0x211e   :  { %v2354_v10 = vadd.f32 %v5184_v1, %v5184_v1 }
0x2120   :  { %v4260_v33 = vadd.f32 -1.0, %v2354_v10 }
0x2122   :  { %v2356_v22 = vsel %vm5860_vm10, %v4260_v33, %v5184_v1 }
0x2123   :  { %2359 = vrot.lane.b32.xlu1 %v2356_v22, %s5511_s3  ;;  %v2357_v14 = vmul.f32 %v2356_v22, %v6274_v18 }
0x2195   :  { %v2360_v50 = vpop.permute.xlu1 %2359 }
0x2196   :  { %v2362_v13 = vmul.f32 %v2360_v50, %v2356_v22 }
0x2198   :  { %2364 = vrot.lane.b32.xlu1 %v2362_v13, %s5525_s5 }
0x220a   :  { %v2365_v15 = vpop.permute.xlu1 %2364 }
0x220b   :  { %v6363_v26 = vadd.f32 %v2365_v15, %v2357_v14 }
0x220d   :  { %5185 = vtanh.f32 %v6363_v26 }
0x2217   :  { %v5186_v27 = vpop.eup %5185 }
0x2218   :  { %2370 = vrot.lane.b32.xlu1 %v5186_v27, %s5511_s3 }
0x228a   :  { %v2371_v29 = vpop.permute.xlu1 %2370 }
0x228b   :  { %v2373_v30 = vmul.f32 %v2371_v29, %v2356_v22 }
0x228d   :  { %v2374_v36 = vpack.c.bf16 %v2373_v30, %v2373_v30 }
0x228f   :  { %2376 = vrot.lane.b32.xlu1 %v2374_v36, %s5525_s5 }
0x2301   :  { %v2377_v25 = vpop.permute.xlu1 %2376 }
0x2302   :  { %4781 = vmatmul.mubr.msk.bf16.vlgmr.msra.gmra.mrb[68].mxu1 %vm303_vm3, %v2377_v25 }
0x2303   :  { %4793 = vmatpush3.bf16.msra.mxu1 %v6196_v51  ;;  %4796 = vmatprep.mubr.msk.bf16.mxu1 %vm5524_vm0, %v6109_v42 }
0x2304   :  { %4794 = vmatprep.subr.bf16.mxu1 %v6109_v42 }
0x2307   :  { %4795 = vmatpush3.bf16.msra.mxu1 %v6200_v52 }
0x2308   :  { %4808 = vmatprep.subr.bf16.mxu1 %v6109_v42 }
0x230a   :  { %4797 = vmatmul.mubr.msk.bf16.vlgmr.msra.gmra.mrb[72].mxu1 %vm303_vm3, %v2301_v5  ;;  %v2432_v5 = vstv %s4262_s25 }
0x230b   :  { %4809 = vmatpush3.bf16.msra.mxu1 %v6234_v46  ;;  %4812 = vmatprep.mubr.msk.bf16.mxu1 %vm5524_vm0, %v6109_v42  ;;  %v2433_v4 = vmul.u32 %v2432_v5, %v6144_v11 }
0x230c   :  { %4810 = vmatprep.subr.bf16.mxu1 %v6109_v42 }
0x230f   :  { %4811 = vmatpush3.bf16.msra.mxu1 %v6238_v17 }
0x2310   :  { %4824 = vmatprep.subr.bf16.mxu1 %v6109_v42 }
0x2312   :  { %4813 = vmatmul.mubr.msk.bf16.vlgmr.msra.gmra.mrb[76].mxu1 %vm303_vm3, %v2377_v25 }
0x2313   :  { %4825 = vmatpush3.bf16.msra.mxu1 %v6277_v2  ;;  %4828 = vmatprep.mubr.msk.bf16.mxu1 %vm5524_vm0, %v6109_v42 }
0x2314   :  { %4826 = vmatprep.subr.bf16.mxu1 %v6109_v42 }
0x2317   :  { %4827 = vmatpush3.bf16.msra.mxu1 %v6280_v35 }
0x2318   :  { %4840 = vmatprep.subr.bf16.mxu1 %v6109_v42 }
0x23d5   :  { %v2415_v18 = vpop.f32.mrb[68].mxu1 }
0x23d6   :  { %v2416_v38 = vadd.f32 %v6308_v37, %v2415_v18  ;;  %v4782_v32 = vpop.f32.mrb[69].mxu1 }
0x23d7   :  { %v2418_v39 = vpop.f32.mrb[70].mxu1 }
0x23d8   :  { %2422 = vst [vmem:[#allocation19 + $0x10] sm:$0xff] %v2416_v38  ;;  %2423 = vmax.xlane.f32.xlu0 %v2416_v38  ;;  %v4783_v34 = vpop.f32.mrb[71].mxu1 }
0x23dd   :  { %v2523_v43 = vpop.f32.mrb[72].mxu1 }
0x23de   :  { %v4798_v19 = vpop.f32.mrb[73].mxu1 }
0x23df   :  { %v2526_v23 = vpop.f32.mrb[74].mxu1 }
0x23e0   :  { %v4799_v20 = vpop.f32.mrb[75].mxu1 }
0x23e5   :  { %v6390_v45 = vpop.f32.mrb[76].mxu1 }
0x23e6   :  { %v4814_v31 = vpop.f32.mrb[77].mxu1 }
0x23e7   :  { %v2639_v48 = vpop.f32.mrb[78].mxu1 }
0x23e8   :  { %v4815_v49 = vpop.f32.mrb[79].mxu1 }
0x2465   :  { %v2424_v54 = vpop.xlane.xlu0 %2423 }
0x2466   :  { %vm2425_vm14 = vcmp.eq.f32.partialorder %v2416_v38, %v2424_v54 }
0x2467   :  { %v2426_v24 = vsel %vm2425_vm14, %v6314_v55, 128.0 }
0x2468   :  { %2427 = vmin.xlane.f32.xlu1 %v2426_v24 }
0x24f5   :  { %v2428_v58 = vpop.xlane.xlu1 %2427 }
0x24f6   :  { %v5026_v44 = vtrunc.f32 %v2428_v58 }
0x24f8   :  { %v5027_v60 = vcvt.f32.s32 %v5026_v44 }
0x24fa   :  { %v2436_v0 = vmul.u32 %v5027_v60, %v2435_v59 }
0x24fc   :  { %v2437_v63 = vadd.s32 %v2436_v0, %v2433_v4 }
0x24fe   :  { %2439 = vperm.xlu0 %5064, %v2437_v63  }
0x257d   :  { %v2440_v61 = vpop.permute.xlu0 %2439 }
0x257e   :  { %vm2441_vm15 = vcmp.eq.s32.totalorder %v5800_v12, %v2440_v61 }
0x257f   :  { %v4263_v6 = vsel %vm2441_vm15, 1.0, %v6109_v42 }
0x2580   :  { %v2444_v7 = vpack.c.bf16 %v4263_v6, %v4263_v6 }
0x2582   :  { %4789 = vmatmul.mubr.msk.bf16.vlgmr.msra.gmra.mrb[72].mxu0 %vm303_vm3, %v2444_v7 }
0x2583   :  { %4801 = vmatpush3.bf16.msra.mxu0 %v6184_v40  ;;  %4804 = vmatprep.mubr.msk.bf16.mxu0 %vm5524_vm0, %v6109_v42 }
0x2584   :  { %4802 = vmatprep.subr.bf16.mxu0 %v6109_v42 }
0x2587   :  { %4803 = vmatpush3.bf16.msra.mxu0 %v6188_v41 }
0x2588   :  { %4816 = vmatprep.subr.bf16.mxu0 %v6109_v42 }
0x2655   :  { %v2482_v11 = vpop.f32.mrb[72].mxu0 }
0x2656   :  { %v2488_v8 = vpack.c.bf16 %v2482_v11, %v2482_v11  ;;  %v4790_v9 = vpop.f32.mrb[73].mxu0 }
0x2657   :  { %v2485_v1 = vpop.f32.mrb[74].mxu0 }
0x2658   :  { %v4791_v10 = vpop.f32.mrb[75].mxu0  ;;  %4805 = vmatmul.mubr.msk.bf16.vlgmr.msra.gmra.mrb[76].mxu0 %vm303_vm3, %v2488_v8 }
0x2659   :  { %4817 = vmatpush3.bf16.msra.mxu0 %v6244_v21  ;;  %4820 = vmatprep.mubr.msk.bf16.mxu0 %vm5524_vm0, %v6109_v42 }
0x265a   :  { %4818 = vmatprep.subr.bf16.mxu0 %v6109_v42 }
0x265d   :  { %4819 = vmatpush3.bf16.msra.mxu0 %v6247_v47 }
0x265e   :  { %4832 = vmatprep.subr.bf16.mxu0 %v6109_v42 }
0x272b   :  { %v2566_v33 = vpop.f32.mrb[76].mxu0 }
0x272c   :  { %v2567_v22 = vadd.f32 %v2566_v33, %v2523_v43  ;;  %v4806_v50 = vpop.f32.mrb[77].mxu0 }
0x272d   :  { %v2569_v13 = vpop.f32.mrb[78].mxu0 }
0x272e   :  { %v2572_v14 = vadd.f32 %v6213_v3, %v2567_v22  ;;  %v4807_v15 = vpop.f32.mrb[79].mxu0  ;;  %v6446_v13 = vld [vmem:[#allocation19] sm:$0xff] }
0x2730   :  { %v2573_v27 = vadd.f32 %v2572_v14, %v2572_v14 }
0x2732   :  { %v2574_v29 = vsel %vm5860_vm10, %v2573_v27, %v2572_v14 }
0x2733   :  { %v4267_v30 = vmul.f32 -1.442695, %v2574_v29 }
0x2735   :  { %5187 = vpow2.f32 %v4267_v30 }
0x273f   :  { %v5188_v36 = vpop.eup %5187 }
0x2740   :  { %v2578_v25 = vadd.f32 1.0, %v5188_v36 }
0x2742   :  { %5189 = vrcp.f32 %v2578_v25 }
0x274c   :  { %v5190_v18 = vpop.eup %5189 }
0x274d   :  { %v2581_v38 = vadd.f32 %v5190_v18, %v5190_v18 }
0x274f   :  { %v4268_v32 = vadd.f32 -1.0, %v2581_v38 }
0x2751   :  { %v2583_v39 = vsel %vm5860_vm10, %v4268_v32, %v5190_v18 }
0x2752   :  { %2586 = vrot.lane.b32.xlu1 %v2583_v39, %s5511_s3  ;;  %v2584_v19 = vmul.f32 %v2583_v39, %v6342_v53 }
0x27c4   :  { %v2587_v34 = vpop.permute.xlu1 %2586 }
0x27c5   :  { %v2589_v43 = vmul.f32 %v2587_v34, %v2583_v39 }
0x27c7   :  { %2591 = vrot.lane.b32.xlu1 %v2589_v43, %s5525_s5  ;;  %v5528_v43 = vmov 3  }
0x27c8   :  { %5065 = vset.pattern.permute.xlu0 %v5528_v43 }
0x2839   :  { %v2592_v23 = vpop.permute.xlu1 %2591 }
0x283a   :  { %v6418_v20 = vadd.f32 %v2592_v23, %v2584_v19  ;;  %v6474_v23 = vld [vmem:[%s6825_s26] sm:$0xff] }
0x283c   :  { %5191 = vtanh.f32 %v6418_v20 }
0x2846   :  { %v5192_v31 = vpop.eup %5191 }
0x2847   :  { %2597 = vrot.lane.b32.xlu1 %v5192_v31, %s5511_s3  ;;  %v2775_v31 = vstv %s4274_s20 }
0x28b9   :  { %v2598_v48 = vpop.permute.xlu1 %2597 }
0x28ba   :  { %v2600_v49 = vmul.f32 %v2598_v48, %v2583_v39 }
0x28bc   :  { %v2601_v54 = vpack.c.bf16 %v2600_v49, %v2600_v49  ;;  %v2778_v49 = vstv %s2777_s30 }
0x28be   :  { %2643 = vrot.lane.b32.xlu1 %v2601_v54, %s5525_s5 }
0x2930   :  { %v2644_v24 = vpop.permute.xlu1 %2643 }
0x2931   :  { %4821 = vmatmul.mubr.msk.bf16.vlgmr.msra.gmra.mrb[80].mxu0 %vm303_vm3, %v2644_v24 }
0x2932   :  { %4833 = vmatpush3.bf16.msra.mxu0 %v6160_v16  ;;  %4836 = vmatprep.mubr.msk.bf16.mxu0 %vm5524_vm0, %v6109_v42 }
0x2933   :  { %4834 = vmatprep.subr.bf16.mxu0 %v6109_v42 }
0x2936   :  { %4835 = vmatpush3.bf16.msra.mxu0 %v6168_v28 }
0x2937   :  { %4848 = vmatprep.subr.bf16.mxu0 %v6109_v42 }
0x2a04   :  { %v2682_v53 = vpop.f32.mrb[80].mxu0 }
0x2a05   :  { %v2683_v56 = vadd.f32 %v2682_v53, %v6390_v45  ;;  %v4822_v58 = vpop.f32.mrb[81].mxu0 }
0x2a06   :  { %v2685_v5 = vpop.f32.mrb[82].mxu0 }
0x2a07   :  { %v2688_v44 = vadd.f32 %v6264_v62, %v2683_v56  ;;  %v4823_v59 = vpop.f32.mrb[83].mxu0 }
0x2a09   :  { %v2689_v60 = vadd.f32 %v2688_v44, %v2688_v44 }
0x2a0b   :  { %v2690_v16 = vsel %vm5860_vm10, %v2689_v60, %v2688_v44 }
0x2a0c   :  { %v4271_v4 = vmul.f32 -1.442695, %v2690_v16 }
0x2a0e   :  { %5193 = vpow2.f32 %v4271_v4 }
0x2a18   :  { %v5194_v0 = vpop.eup %5193 }
0x2a19   :  { %v2694_v63 = vadd.f32 1.0, %v5194_v0 }
0x2a1b   :  { %5195 = vrcp.f32 %v2694_v63 }
0x2a25   :  { %v5196_v28 = vpop.eup %5195 }
0x2a26   :  { %v2697_v61 = vadd.f32 %v5196_v28, %v5196_v28 }
0x2a28   :  { %v4272_v42 = vadd.f32 -1.0, %v2697_v61 }
0x2a2a   :  { %v2699_v45 = vsel %vm5860_vm10, %v4272_v42, %v5196_v28 }
0x2a2b   :  { %2702 = vrot.lane.b32.xlu1 %v2699_v45, %s5511_s3  ;;  %v2700_v11 = vmul.f32 %v2699_v45, %v6363_v26 }
0x2a9d   :  { %v2703_v6 = vpop.permute.xlu1 %2702 }
0x2a9e   :  { %v2705_v7 = vmul.f32 %v2703_v6, %v2699_v45 }
0x2aa0   :  { %2707 = vrot.lane.b32.xlu1 %v2705_v7, %s5525_s5 }
0x2b12   :  { %v2708_v8 = vpop.permute.xlu1 %2707 }
0x2b13   :  { %v6439_v9 = vadd.f32 %v2708_v8, %v2700_v11 }
0x2b15   :  { %5197 = vtanh.f32 %v6439_v9 }
0x2b1f   :  { %v5198_v1 = vpop.eup %5197 }
0x2b20   :  { %2713 = vrot.lane.b32.xlu0 %v5198_v1, %s5511_s3 }
0x2b92   :  { %v2714_v10 = vpop.permute.xlu0 %2713 }
0x2b93   :  { %v2716_v33 = vmul.f32 %v2714_v10, %v2699_v45 }
0x2b95   :  { %v2717_v22 = vpack.c.bf16 %v2716_v33, %v2716_v33 }
0x2b97   :  { %2719 = vrot.lane.b32.xlu1 %v2717_v22, %s5525_s5 }
0x2c09   :  { %v2720_v50 = vpop.permute.xlu1 %2719 }
0x2c0a   :  { %4829 = vmatmul.mubr.msk.bf16.vlgmr.msra.gmra.mrb[80].mxu1 %vm303_vm3, %v2720_v50 }
0x2c0b   :  { %4841 = vmatpush3.bf16.msra.mxu1 %v6196_v51  ;;  %4844 = vmatprep.mubr.msk.bf16.mxu1 %vm5524_vm0, %v6446_v13 }
0x2c0c   :  { %4842 = vmatprep.subr.bf16.mxu1 %v6446_v13 }
0x2c0f   :  { %4843 = vmatpush3.bf16.msra.mxu1 %v6200_v52 }
0x2c10   :  { %4856 = vmatprep.subr.bf16.mxu1 %v6446_v13 }
0x2c12   :  { %4845 = vmatmul.mubr.msk.bf16.vlgmr.msra.gmra.mrb[84].mxu1 %vm303_vm3, %v2644_v24  ;;  %v2776_v24 = vmul.u32 %v2775_v31, %v6474_v23 }
0x2c13   :  { %4857 = vmatpush3.bf16.msra.mxu1 %v6234_v46  ;;  %4860 = vmatprep.mubr.msk.bf16.mxu1 %vm5524_vm0, %v6446_v13 }
0x2c14   :  { %4858 = vmatprep.subr.bf16.mxu1 %v6446_v13 }
0x2c17   :  { %4859 = vmatpush3.bf16.msra.mxu1 %v6238_v17 }
0x2c18   :  { %4872 = vmatprep.subr.bf16.mxu1 %v6446_v13 }
0x2c1a   :  { %4861 = vmatmul.mubr.msk.bf16.vlgmr.msra.gmra.mrb[88].mxu1 %vm303_vm3, %v2720_v50 }
0x2c1b   :  { %4873 = vmatpush3.bf16.msra.mxu1 %v6277_v2  ;;  %4876 = vmatprep.mubr.msk.bf16.mxu1 %vm5524_vm0, %v6446_v13 }
0x2c1c   :  { %4874 = vmatprep.subr.bf16.mxu1 %v6446_v13 }
0x2c1f   :  { %4875 = vmatpush3.bf16.msra.mxu1 %v6280_v35 }
0x2c20   :  { %4888 = vmatprep.subr.bf16.mxu1 %v6446_v13 }
0x2cdd   :  { %v2758_v51 = vpop.f32.mrb[80].mxu1 }
0x2cde   :  { %v2759_v52 = vadd.f32 %v6308_v37, %v2758_v51  ;;  %v4830_v26 = vpop.f32.mrb[81].mxu1 }
0x2cdf   :  { %v2761_v14 = vpop.f32.mrb[82].mxu1 }
0x2ce0   :  { %2765 = vst [vmem:[#allocation19 + $0x18] sm:$0xff] %v2759_v52  ;;  %2766 = vmax.xlane.f32.xlu0 %v2759_v52  ;;  %v4831_v15 = vpop.f32.mrb[83].mxu1 }
0x2ce5   :  { %v2866_v27 = vpop.f32.mrb[84].mxu1 }
0x2ce6   :  { %v4846_v29 = vpop.f32.mrb[85].mxu1 }
0x2ce7   :  { %v2869_v30 = vpop.f32.mrb[86].mxu1  ;;  %v6519_v29 = vld [vmem:[%s6795_s4 + $0x8] sm:$0xff]  }
0x2ce8   :  { %v4847_v36 = vpop.f32.mrb[87].mxu1 }
0x2ced   :  { %v6468_v25 = vpop.f32.mrb[88].mxu1 }
0x2cee   :  { %v4862_v18 = vpop.f32.mrb[89].mxu1 }
0x2cef   :  { %v2982_v38 = vpop.f32.mrb[90].mxu1 }
0x2cf0   :  { %v4863_v32 = vpop.f32.mrb[91].mxu1 }
0x2d6d   :  { %v2767_v39 = vpop.xlane.xlu0 %2766 }
0x2d6e   :  { %vm2768_vm1 = vcmp.eq.f32.partialorder %v2759_v52, %v2767_v39 }
0x2d6f   :  { %v2769_v34 = vsel %vm2768_vm1, %v6314_v55, 128.0 }
0x2d70   :  { %2770 = vmin.xlane.f32.xlu1 %v2769_v34 }
0x2dfd   :  { %v2771_v19 = vpop.xlane.xlu1 %2770 }
0x2dfe   :  { %v5028_v48 = vtrunc.f32 %v2771_v19 }
0x2e00   :  { %v5029_v54 = vcvt.f32.s32 %v5028_v48 }
0x2e02   :  { %v2779_v53 = vmul.u32 %v5029_v54, %v2778_v49 }
0x2e04   :  { %v2780_v56 = vadd.s32 %v2779_v53, %v2776_v24 }
0x2e06   :  { %2782 = vperm.xlu0 %5065, %v2780_v56  }
0x2e85   :  { %v2783_v58 = vpop.permute.xlu0 %2782 }
0x2e86   :  { %vm2784_vm2 = vcmp.eq.s32.totalorder %v5800_v12, %v2783_v58 }
0x2e87   :  { %v4275_v5 = vsel %vm2784_vm2, 1.0, %v6446_v13 }
0x2e88   :  { %v2787_v44 = vpack.c.bf16 %v4275_v5, %v4275_v5 }
0x2e8a   :  { %4837 = vmatmul.mubr.msk.bf16.vlgmr.msra.gmra.mrb[84].mxu0 %vm303_vm3, %v2787_v44 }
0x2e8b   :  { %4849 = vmatpush3.bf16.msra.mxu0 %v6184_v40  ;;  %4852 = vmatprep.mubr.msk.bf16.mxu0 %vm5524_vm0, %v6446_v13 }
0x2e8c   :  { %4850 = vmatprep.subr.bf16.mxu0 %v6446_v13 }
0x2e8f   :  { %4851 = vmatpush3.bf16.msra.mxu0 %v6188_v41 }
0x2e90   :  { %4864 = vmatprep.subr.bf16.mxu0 %v6446_v13 }
0x2f5d   :  { %v2825_v59 = vpop.f32.mrb[84].mxu0 }
0x2f5e   :  { %v2831_v60 = vpack.c.bf16 %v2825_v59, %v2825_v59  ;;  %v4838_v16 = vpop.f32.mrb[85].mxu0 }
0x2f5f   :  { %v2828_v4 = vpop.f32.mrb[86].mxu0 }
0x2f60   :  { %v4839_v0 = vpop.f32.mrb[87].mxu0  ;;  %4853 = vmatmul.mubr.msk.bf16.vlgmr.msra.gmra.mrb[88].mxu0 %vm303_vm3, %v2831_v60 }
0x2f61   :  { %4865 = vmatpush3.bf16.msra.mxu0 %v6244_v21  ;;  %4868 = vmatprep.mubr.msk.bf16.mxu0 %vm5524_vm0, %v6446_v13  ;;  %v6538_v0 = vld [vmem:[#allocation9] sm:$0xff]  }
0x2f62   :  { %4866 = vmatprep.subr.bf16.mxu0 %v6446_v13 }
0x2f65   :  { %4867 = vmatpush3.bf16.msra.mxu0 %v6247_v47 }
0x2f66   :  { %4880 = vmatprep.subr.bf16.mxu0 %v6446_v13 }
0x3033   :  { %v2909_v40 = vpop.f32.mrb[88].mxu0 }
0x3034   :  { %v2910_v41 = vadd.f32 %v2909_v40, %v2866_v27  ;;  %v4854_v63 = vpop.f32.mrb[89].mxu0 }
0x3035   :  { %v2912_v28 = vpop.f32.mrb[90].mxu0 }
0x3036   :  { %v2915_v61 = vadd.f32 %v6213_v3, %v2910_v41  ;;  %v4855_v42 = vpop.f32.mrb[91].mxu0 }
0x3038   :  { %v2916_v45 = vadd.f32 %v2915_v61, %v2915_v61 }
0x303a   :  { %v2917_v21 = vsel %vm5860_vm10, %v2916_v45, %v2915_v61 }
0x303b   :  { %v4279_v6 = vmul.f32 -1.442695, %v2917_v21 }
0x303d   :  { %5199 = vpow2.f32 %v4279_v6 }
0x3047   :  { %v5200_v7 = vpop.eup %5199 }
0x3048   :  { %v2921_v11 = vadd.f32 1.0, %v5200_v7 }
0x304a   :  { %5201 = vrcp.f32 %v2921_v11 }
0x3054   :  { %v5202_v8 = vpop.eup %5201 }
0x3055   :  { %v2924_v47 = vadd.f32 %v5202_v8, %v5202_v8 }
0x3057   :  { %v4280_v1 = vadd.f32 -1.0, %v2924_v47 }
0x3059   :  { %v2926_v10 = vsel %vm5860_vm10, %v4280_v1, %v5202_v8 }
0x305a   :  { %2929 = vrot.lane.b32.xlu1 %v2926_v10, %s5511_s3  ;;  %v2927_v22 = vmul.f32 %v2926_v10, %v6418_v20  ;;  %v6510_v20 = vld [vmem:[%s6795_s4] sm:$0xff]   ;;  %s4286_s4 = sld [smem:[#allocation2 + $0x4]] }
0x3060   :  { %s3120_s22 = ssub.s32 1, %s4286_s4  ;;  %v3118_v47 = vstv %s4286_s4 }
0x30cc   :  { %v2930_v33 = vpop.permute.xlu1 %2929 }
0x30cd   :  { %v2932_v3 = vmul.f32 %v2930_v33, %v2926_v10 }
0x30cf   :  { %2934 = vrot.lane.b32.xlu1 %v2932_v3, %s5525_s5  ;;  %v3119_v3 = vmul.u32 %v3118_v47, %v6474_v23 }
0x3141   :  { %v2935_v50 = vpop.permute.xlu1 %2934 }
0x3142   :  { %v6501_v51 = vadd.f32 %v2935_v50, %v2927_v22 }
0x3144   :  { %5203 = vtanh.f32 %v6501_v51 }
0x314e   :  { %v5204_v52 = vpop.eup %5203 }
0x314f   :  { %2940 = vrot.lane.b32.xlu1 %v5204_v52, %s5511_s3 }
0x31c1   :  { %v2941_v26 = vpop.permute.xlu1 %2940 }
0x31c2   :  { %v2943_v14 = vmul.f32 %v2941_v26, %v2926_v10  ;;  %v3121_v10 = vstv %s3120_s22 }
0x31c4   :  { %v2944_v15 = vpack.c.bf16 %v2943_v14, %v2943_v14 }
0x31c6   :  { %2986 = vrot.lane.b32.xlu1 %v2944_v15, %s5525_s5  ;;  %v6570_v15 = vld [vmem:[#allocation7] sm:$0xff]  }
0x3238   :  { %v2987_v27 = vpop.permute.xlu1 %2986 }
0x3239   :  { %4869 = vmatmul.mubr.msk.bf16.vlgmr.msra.gmra.mrb[92].mxu0 %vm303_vm3, %v2987_v27 }
0x323a   :  { %4881 = vmatpush3.bf16.msra.mxu0 %v6510_v20  ;;  %4884 = vmatprep.mubr.msk.bf16.mxu0 %vm5524_vm0, %v6446_v13 }
0x323b   :  { %4882 = vmatprep.subr.bf16.mxu0 %v6446_v13 }
0x323e   :  { %4883 = vmatpush3.bf16.msra.mxu0 %v6519_v29 }
0x323f   :  { %4896 = vmatprep.subr.bf16.mxu0 %v6446_v13 }
0x330c   :  { %v3025_v30 = vpop.f32.mrb[92].mxu0 }
0x330d   :  { %v3026_v36 = vadd.f32 %v3025_v30, %v6468_v25  ;;  %v4870_v18 = vpop.f32.mrb[93].mxu0 }
0x330e   :  { %v3028_v38 = vpop.f32.mrb[94].mxu0 }
0x330f   :  { %v3031_v32 = vadd.f32 %v6264_v62, %v3026_v36  ;;  %v4871_v39 = vpop.f32.mrb[95].mxu0 }
0x3310   :  { %v6581_v39 = vld [vmem:[#allocation12] sm:$0xff]  }
0x3311   :  { %v3032_v34 = vadd.f32 %v3031_v32, %v3031_v32 }
0x3313   :  { %v3033_v43 = vsel %vm5860_vm10, %v3032_v34, %v3031_v32  ;;  %v6587_v34 = vld [vmem:[#allocation12 + $0x8] sm:$0xff]  }
0x3314   :  { %v4283_v19 = vmul.f32 -1.442695, %v3033_v43 }
0x3316   :  { %5205 = vpow2.f32 %v4283_v19 }
0x3320   :  { %v5206_v31 = vpop.eup %5205 }
0x3321   :  { %v3037_v48 = vadd.f32 1.0, %v5206_v31 }
0x3323   :  { %5207 = vrcp.f32 %v3037_v48 }
0x332d   :  { %v5208_v49 = vpop.eup %5207 }
0x332e   :  { %v3040_v54 = vadd.f32 %v5208_v49, %v5208_v49 }
0x3330   :  { %v4284_v24 = vadd.f32 -1.0, %v3040_v54 }
0x3332   :  { %v3042_v25 = vsel %vm5860_vm10, %v4284_v24, %v5208_v49  ;;  %v6591_v49 = vld [vmem:[#allocation10] ss:$0 sm:$0xff] }
0x3333   :  { %3045 = vrot.lane.b32.xlu1 %v3042_v25, %s5511_s3  ;;  %v3043_v56 = vmul.f32 %v3042_v25, %v6439_v9  ;;  %v6544_v9 = vld [vmem:[#allocation9 + $0x8] sm:$0xff]  }
0x33a5   :  { %v3046_v53 = vpop.permute.xlu1 %3045 }
0x33a6   :  { %v3048_v62 = vmul.f32 %v3046_v53, %v3042_v25 }
0x33a8   :  { %3050 = vrot.lane.b32.xlu1 %v3048_v62, %s5525_s5 }
0x341a   :  { %v3051_v58 = vpop.permute.xlu1 %3050 }
0x341b   :  { %v6532_v5 = vadd.f32 %v3051_v58, %v3043_v56 }
0x341d   :  { %5209 = vtanh.f32 %v6532_v5 }
0x3427   :  { %v5210_v44 = vpop.eup %5209 }
0x3428   :  { %3056 = vrot.lane.b32.xlu1 %v5210_v44, %s5511_s3 }
0x349a   :  { %v3057_v59 = vpop.permute.xlu1 %3056 }
0x349b   :  { %v3059_v60 = vmul.f32 %v3057_v59, %v3042_v25 }
0x349d   :  { %v3060_v16 = vpack.c.bf16 %v3059_v60, %v3059_v60 }
0x349f   :  { %3062 = vrot.lane.b32.xlu0 %v3060_v16, %s5525_s5 }
0x3511   :  { %v3063_v4 = vpop.permute.xlu0 %3062 }
0x3512   :  { %4877 = vmatmul.mubr.msk.bf16.vlgmr.msra.gmra.mrb[92].mxu1 %vm303_vm3, %v3063_v4 }
0x3513   :  { %4889 = vmatpush3.bf16.msra.mxu1 %v6538_v0  ;;  %4892 = vmatprep.mubr.msk.bf16.mxu1 %vm5524_vm0, %v6446_v13 }
0x3514   :  { %4890 = vmatprep.subr.bf16.mxu1 %v6446_v13 }
0x3517   :  { %4891 = vmatpush3.bf16.msra.mxu1 %v6544_v9 }
0x3518   :  { %4904 = vmatprep.subr.bf16.mxu1 %v6446_v13 }
0x351a   :  { %4893 = vmatmul.mubr.msk.bf16.vlgmr.msra.gmra.mrb[96].mxu1 %vm303_vm3, %v2987_v27  ;;  %v6576_v27 = vld [vmem:[#allocation7 + $0x8] sm:$0xff]  }
0x351b   :  { %4905 = vmatpush3.bf16.msra.mxu1 %v6234_v46  ;;  %4908 = vmatprep.mubr.msk.bf16.mxu1 %vm5524_vm0, %v6446_v13 }
0x351c   :  { %4906 = vmatprep.subr.bf16.mxu1 %v6446_v13 }
0x351f   :  { %4907 = vmatpush3.bf16.msra.mxu1 %v6238_v17 }
0x3520   :  { %4920 = vmatprep.subr.bf16.mxu1 %v6446_v13 }
0x3522   :  { %4909 = vmatmul.mubr.msk.bf16.vlgmr.msra.gmra.mrb[100].mxu1 %vm303_vm3, %v3063_v4 }
0x3523   :  { %4921 = vmatpush3.bf16.msra.mxu1 %v6277_v2  ;;  %4924 = vmatprep.mubr.msk.bf16.mxu1 %vm5524_vm0, %v6446_v13 }
0x3524   :  { %4922 = vmatprep.subr.bf16.mxu1 %v6446_v13 }
0x3527   :  { %4923 = vmatpush3.bf16.msra.mxu1 %v6280_v35 }
0x3528   :  { %4936 = vmatprep.subr.bf16.mxu1 %v6446_v13 }
0x35e5   :  { %v3101_v46 = vpop.f32.mrb[92].mxu1 }
0x35e6   :  { %v3102_v40 = vadd.f32 %v6308_v37, %v3101_v46  ;;  %v4878_v41 = vpop.f32.mrb[93].mxu1  ;;  %v5529_v37 = vmov 4  }
0x35e7   :  { %v3104_v17 = vpop.f32.mrb[94].mxu1  ;;  %5066 = vset.pattern.permute.xlu0 %v5529_v37 }
0x35e8   :  { %3108 = vst [vmem:[#allocation19 + $0x20] sm:$0xff] %v3102_v40  ;;  %3109 = vmax.xlane.f32.xlu1 %v3102_v40  ;;  %v4879_v63 = vpop.f32.mrb[95].mxu1 }
0x35ed   :  { %v3209_v28 = vpop.f32.mrb[96].mxu1 }
0x35ee   :  { %v4894_v61 = vpop.f32.mrb[97].mxu1 }
0x35ef   :  { %v3212_v2 = vpop.f32.mrb[98].mxu1 }
0x35f0   :  { %v4895_v42 = vpop.f32.mrb[99].mxu1 }
0x35f5   :  { %v6563_v45 = vpop.f32.mrb[100].mxu1 }
0x35f6   :  { %v4910_v21 = vpop.f32.mrb[101].mxu1 }
0x35f7   :  { %v3325_v6 = vpop.f32.mrb[102].mxu1 }
0x35f8   :  { %v4911_v7 = vpop.f32.mrb[103].mxu1 }
0x3675   :  { %v3110_v35 = vpop.xlane.xlu1 %3109 }
0x3676   :  { %vm3111_vm4 = vcmp.eq.f32.partialorder %v3102_v40, %v3110_v35  ;;  %v6614_v35 = vld [vmem:[#allocation15] ss:$0 sm:$0xff] }
0x3677   :  { %v3112_v11 = vsel %vm3111_vm4, %v6314_v55, 128.0 }
0x3678   :  { %3113 = vmin.xlane.f32.xlu0 %v3112_v11 }
0x3705   :  { %v3114_v8 = vpop.xlane.xlu0 %3113 }
0x3706   :  { %v5030_v1 = vtrunc.f32 %v3114_v8 }
0x3708   :  { %v5031_v33 = vcvt.f32.s32 %v5030_v1 }
0x370a   :  { %v3122_v22 = vmul.u32 %v5031_v33, %v3121_v10 }
0x370c   :  { %v3123_v50 = vadd.s32 %v3122_v22, %v3119_v3 }
0x370e   :  { %3125 = vperm.xlu0 %5066, %v3123_v50  }
0x378d   :  { %v3126_v52 = vpop.permute.xlu0 %3125 }
0x378e   :  { %vm3127_vm5 = vcmp.eq.s32.totalorder %v5800_v12, %v3126_v52 }
0x378f   :  { %v4287_v26 = vsel %vm3127_vm5, 1.0, %v6446_v13 }
0x3790   :  { %v3130_v14 = vpack.c.bf16 %v4287_v26, %v4287_v26 }
0x3792   :  { %4885 = vmatmul.mubr.msk.bf16.vlgmr.msra.gmra.mrb[96].mxu0 %vm303_vm3, %v3130_v14 }
0x3793   :  { %4897 = vmatpush3.bf16.msra.mxu0 %v6570_v15  ;;  %4900 = vmatprep.mubr.msk.bf16.mxu0 %vm5524_vm0, %v6446_v13 }
0x3794   :  { %4898 = vmatprep.subr.bf16.mxu0 %v6446_v13 }
0x3797   :  { %4899 = vmatpush3.bf16.msra.mxu0 %v6576_v27 }
0x3798   :  { %4912 = vmatprep.subr.bf16.mxu0 %v6446_v13 }
0x3865   :  { %v3168_v30 = vpop.f32.mrb[96].mxu0 }
0x3866   :  { %v3174_v36 = vpack.c.bf16 %v3168_v30, %v3168_v30  ;;  %v4886_v18 = vpop.f32.mrb[97].mxu0 }
0x3867   :  { %v3171_v38 = vpop.f32.mrb[98].mxu0 }
0x3868   :  { %v4887_v32 = vpop.f32.mrb[99].mxu0  ;;  %4901 = vmatmul.mubr.msk.bf16.vlgmr.msra.gmra.mrb[100].mxu0 %vm303_vm3, %v3174_v36 }
0x3869   :  { %4913 = vmatpush3.bf16.msra.mxu0 %v6581_v39  ;;  %4916 = vmatprep.mubr.msk.bf16.mxu0 %vm5524_vm0, %v6446_v13 }
0x386a   :  { %4914 = vmatprep.subr.bf16.mxu0 %v6446_v13 }
0x386d   :  { %4915 = vmatpush3.bf16.msra.mxu0 %v6587_v34 }
0x386e   :  { %4928 = vmatprep.subr.bf16.mxu0 %v6446_v13 }
0x393b   :  { %v3252_v43 = vpop.f32.mrb[100].mxu0 }
0x393c   :  { %v3253_v19 = vadd.f32 %v3252_v43, %v3209_v28  ;;  %v4902_v31 = vpop.f32.mrb[101].mxu0 }
0x393d   :  { %v3255_v48 = vpop.f32.mrb[102].mxu0  ;;  %v6643_v31 = vld [vmem:[#allocation13 + $0x8] sm:$0xff]  }
0x393e   :  { %v3258_v54 = vadd.f32 %v6591_v49, %v3253_v19  ;;  %v4903_v24 = vpop.f32.mrb[103].mxu0  ;;  %v6648_v48 = vld [vmem:[#allocation16] sm:$0xff]  }
0x3940   :  { %v3259_v25 = vadd.f32 %v3258_v54, %v3258_v54 }
0x3942   :  { %v3260_v53 = vsel %vm5860_vm10, %v3259_v25, %v3258_v54  ;;  %v6654_v54 = vld [vmem:[#allocation16 + $0x8] sm:$0xff]   ;;  %v6658_v25 = vld [vmem:[#allocation18] ss:$0 sm:$0xff] }
0x3943   :  { %v4291_v62 = vmul.f32 -1.442695, %v3260_v53 }
0x3945   :  { %5211 = vpow2.f32 %v4291_v62 }
0x394f   :  { %v5212_v56 = vpop.eup %5211 }
0x3950   :  { %v3264_v58 = vadd.f32 1.0, %v5212_v56 }
0x3952   :  { %5213 = vrcp.f32 %v3264_v58 }
0x395c   :  { %v5214_v44 = vpop.eup %5213 }
0x395d   :  { %v3267_v59 = vadd.f32 %v5214_v44, %v5214_v44 }
0x395f   :  { %v4292_v60 = vadd.f32 -1.0, %v3267_v59 }
0x3961   :  { %v3269_v16 = vsel %vm5860_vm10, %v4292_v60, %v5214_v44 }
0x3962   :  { %3272 = vrot.lane.b32.xlu1 %v3269_v16, %s5511_s3  ;;  %v3270_v40 = vmul.f32 %v3269_v16, %v6501_v51 }
0x39d4   :  { %v3273_v4 = vpop.permute.xlu1 %3272 }
0x39d5   :  { %v3275_v46 = vmul.f32 %v3273_v4, %v3269_v16 }
0x39d7   :  { %3277 = vrot.lane.b32.xlu1 %v3275_v46, %s5525_s5 }
0x3a49   :  { %v3278_v41 = vpop.permute.xlu1 %3277 }
0x3a4a   :  { %v6601_v17 = vadd.f32 %v3278_v41, %v3270_v40 }
0x3a4c   :  { %5215 = vtanh.f32 %v6601_v17 }
0x3a56   :  { %v5216_v63 = vpop.eup %5215 }
0x3a57   :  { %3283 = vrot.lane.b32.xlu1 %v5216_v63, %s5511_s3 }
0x3ac9   :  { %v3284_v28 = vpop.permute.xlu1 %3283 }
0x3aca   :  { %v3286_v61 = vmul.f32 %v3284_v28, %v3269_v16 }
0x3acc   :  { %v3287_v2 = vpack.c.bf16 %v3286_v61, %v3286_v61  ;;  %v5530_v61 = vmov 5  }
0x3acd   :  { %5067 = vset.pattern.permute.xlu0 %v5530_v61 }
0x3ace   :  { %3329 = vrot.lane.b32.xlu1 %v3287_v2, %s5525_s5 }
0x3b40   :  { %v3330_v42 = vpop.permute.xlu1 %3329 }
0x3b41   :  { %4917 = vmatmul.mubr.msk.bf16.vlgmr.msra.gmra.mrb[104].mxu0 %vm303_vm3, %v3330_v42 }
0x3b42   :  { %4929 = vmatpush3.bf16.msra.mxu0 %v6510_v20  ;;  %4932 = vmatprep.mubr.msk.bf16.mxu0 %vm5524_vm0, %v6446_v13 }
0x3b43   :  { %4930 = vmatprep.subr.bf16.mxu0 %v6446_v13 }
0x3b46   :  { %4931 = vmatpush3.bf16.msra.mxu0 %v6519_v29 }
0x3b47   :  { %4944 = vmatprep.subr.bf16.mxu0 %v6446_v13 }
0x3c14   :  { %v3368_v51 = vpop.f32.mrb[104].mxu0 }
0x3c15   :  { %v3369_v21 = vadd.f32 %v3368_v51, %v6563_v45  ;;  %v4918_v6 = vpop.f32.mrb[105].mxu0 }
0x3c16   :  { %v3371_v7 = vpop.f32.mrb[106].mxu0 }
0x3c17   :  { %v3374_v11 = vadd.f32 %v6614_v35, %v3369_v21  ;;  %v4919_v37 = vpop.f32.mrb[107].mxu0  ;;  %v3464_v21 = vstv %s3463_s27 }
0x3c19   :  { %v3375_v8 = vadd.f32 %v3374_v11, %v3374_v11 }
0x3c1b   :  { %v3376_v47 = vsel %vm5860_vm10, %v3375_v8, %v3374_v11 }
0x3c1c   :  { %v4295_v1 = vmul.f32 -1.442695, %v3376_v47 }
0x3c1e   :  { %5217 = vpow2.f32 %v4295_v1 }
0x3c28   :  { %v5218_v10 = vpop.eup %5217 }
0x3c29   :  { %v3380_v33 = vadd.f32 1.0, %v5218_v10 }
0x3c2b   :  { %5219 = vrcp.f32 %v3380_v33 }
0x3c35   :  { %v5220_v3 = vpop.eup %5219 }
0x3c36   :  { %v3383_v22 = vadd.f32 %v5220_v3, %v5220_v3 }
0x3c38   :  { %v4296_v50 = vadd.f32 -1.0, %v3383_v22 }
0x3c3a   :  { %v3385_v45 = vsel %vm5860_vm10, %v4296_v50, %v5220_v3 }
0x3c3b   :  { %3388 = vrot.lane.b32.xlu1 %v3385_v45, %s5511_s3  ;;  %v3386_v14 = vmul.f32 %v3385_v45, %v6532_v5  ;;  %v6637_v5 = vld [vmem:[#allocation13] sm:$0xff]  }
0x3cad   :  { %v3389_v52 = vpop.permute.xlu1 %3388 }
0x3cae   :  { %v3391_v26 = vmul.f32 %v3389_v52, %v3385_v45 }
0x3cb0   :  { %3393 = vrot.lane.b32.xlu1 %v3391_v26, %s5525_s5 }
0x3d22   :  { %v3394_v30 = vpop.permute.xlu1 %3393 }
0x3d23   :  { %v6624_v36 = vadd.f32 %v3394_v30, %v3386_v14 }
0x3d25   :  { %5221 = vtanh.f32 %v6624_v36 }
0x3d2f   :  { %v5222_v18 = vpop.eup %5221 }
0x3d30   :  { %3399 = vrot.lane.b32.xlu1 %v5222_v18, %s5511_s3 }
0x3da2   :  { %v3400_v38 = vpop.permute.xlu1 %3399 }
0x3da3   :  { %v3402_v32 = vmul.f32 %v3400_v38, %v3385_v45 }
0x3da5   :  { %v3403_v43 = vpack.c.bf16 %v3402_v32, %v3402_v32 }
0x3da7   :  { %3405 = vrot.lane.b32.xlu0 %v3403_v43, %s5525_s5 }
0x3e19   :  { %v3406_v19 = vpop.permute.xlu0 %3405 }
0x3e1a   :  { %4925 = vmatmul.mubr.msk.bf16.vlgmr.msra.gmra.mrb[104].mxu1 %vm303_vm3, %v3406_v19 }
0x3e1b   :  { %4937 = vmatpush3.bf16.msra.mxu1 %v6538_v0  ;;  %4940 = vmatprep.mubr.msk.bf16.mxu1 %vm5524_vm0, %v6446_v13 }
0x3e1c   :  { %4938 = vmatprep.subr.bf16.mxu1 %v6446_v13 }
0x3e1f   :  { %4939 = vmatpush3.bf16.msra.mxu1 %v6544_v9 }
0x3e20   :  { %4952 = vmatprep.subr.bf16.mxu1 %v6446_v13 }
0x3e22   :  { %4941 = vmatmul.mubr.msk.bf16.vlgmr.msra.gmra.mrb[108].mxu1 %vm303_vm3, %v3330_v42  ;;  %v3461_v42 = vstv %s4298_s7 }
0x3e23   :  { %4953 = vmatpush3.bf16.msra.mxu1 %v6637_v5  ;;  %4956 = vmatprep.mubr.msk.bf16.mxu1 %vm5524_vm0, %v6446_v13  ;;  %v3462_v7 = vmul.u32 %v3461_v42, %v6474_v23 }
0x3e24   :  { %4954 = vmatprep.subr.bf16.mxu1 %v6446_v13 }
0x3e27   :  { %4955 = vmatpush3.bf16.msra.mxu1 %v6643_v31 }
0x3e28   :  { %4968 = vmatprep.subr.bf16.mxu1 %v6446_v13 }
0x3e2a   :  { %4957 = vmatmul.mubr.msk.bf16.vlgmr.msra.gmra.mrb[112].mxu1 %vm303_vm3, %v3406_v19 }
0x3e2b   :  { %4969 = vmatpush3.bf16.msra.mxu1 %v6648_v48  ;;  %4972 = vmatprep.mubr.msk.bf16.mxu1 %vm5524_vm0, %v6446_v13 }
0x3e2c   :  { %4970 = vmatprep.subr.bf16.mxu1 %v6446_v13 }
0x3e2f   :  { %4971 = vmatpush3.bf16.msra.mxu1 %v6654_v54 }
0x3e30   :  { %4984 = vmatprep.subr.bf16.mxu1 %v6446_v13 }
0x3eed   :  { %v3444_v24 = vpop.f32.mrb[104].mxu1 }
0x3eee   :  { %v3445_v53 = vadd.f32 %v6658_v25, %v3444_v24  ;;  %v4926_v62 = vpop.f32.mrb[105].mxu1 }
0x3eef   :  { %v3447_v56 = vpop.f32.mrb[106].mxu1 }
0x3ef0   :  { %3451 = vst [vmem:[#allocation19 + $0x28] sm:$0xff] %v3445_v53  ;;  %3452 = vmax.xlane.f32.xlu1 %v3445_v53  ;;  %v4927_v58 = vpop.f32.mrb[107].mxu1 }
0x3ef5   :  { %v3552_v44 = vpop.f32.mrb[108].mxu1 }
0x3ef6   :  { %v4942_v59 = vpop.f32.mrb[109].mxu1 }
0x3ef7   :  { %v3555_v60 = vpop.f32.mrb[110].mxu1 }
0x3ef8   :  { %v4943_v16 = vpop.f32.mrb[111].mxu1 }
0x3efd   :  { %v6661_v4 = vpop.f32.mrb[112].mxu1 }
0x3efe   :  { %v4958_v46 = vpop.f32.mrb[113].mxu1 }
0x3eff   :  { %v3668_v40 = vpop.f32.mrb[114].mxu1 }
0x3f00   :  { %v4959_v41 = vpop.f32.mrb[115].mxu1 }
0x3f7d   :  { %v3453_v63 = vpop.xlane.xlu1 %3452 }
0x3f7e   :  { %vm3454_vm6 = vcmp.eq.f32.partialorder %v3445_v53, %v3453_v63 }
0x3f7f   :  { %v3455_v28 = vsel %vm3454_vm6, %v6314_v55, 128.0 }
0x3f80   :  { %3456 = vmin.xlane.f32.xlu0 %v3455_v28 }
0x400d   :  { %v3457_v2 = vpop.xlane.xlu0 %3456 }
0x400e   :  { %v5032_v51 = vtrunc.f32 %v3457_v2 }
0x4010   :  { %v5033_v6 = vcvt.f32.s32 %v5032_v51 }
0x4012   :  { %v3465_v11 = vmul.u32 %v5033_v6, %v3464_v21 }
0x4014   :  { %v3466_v37 = vadd.s32 %v3465_v11, %v3462_v7 }
0x4016   :  { %3468 = vperm.xlu0 %5067, %v3466_v37  }
0x4095   :  { %v3469_v8 = vpop.permute.xlu0 %3468 }
0x4096   :  { %vm3470_vm7 = vcmp.eq.s32.totalorder %v5800_v12, %v3469_v8 }
0x4097   :  { %v4299_v47 = vsel %vm3470_vm7, 1.0, %v6446_v13 }
0x4098   :  { %v3473_v1 = vpack.c.bf16 %v4299_v47, %v4299_v47 }
0x409a   :  { %4933 = vmatmul.mubr.msk.bf16.vlgmr.msra.gmra.mrb[108].mxu0 %vm303_vm3, %v3473_v1 }
0x409b   :  { %4945 = vmatpush3.bf16.msra.mxu0 %v6570_v15  ;;  %4948 = vmatprep.mubr.msk.bf16.mxu0 %vm5524_vm0, %v6446_v13 }
0x409c   :  { %4946 = vmatprep.subr.bf16.mxu0 %v6446_v13 }
0x409f   :  { %4947 = vmatpush3.bf16.msra.mxu0 %v6576_v27 }
0x40a0   :  { %4960 = vmatprep.subr.bf16.mxu0 %v6446_v13 }
0x416d   :  { %v3511_v10 = vpop.f32.mrb[108].mxu0 }
0x416e   :  { %v3517_v33 = vpack.c.bf16 %v3511_v10, %v3511_v10  ;;  %v4934_v3 = vpop.f32.mrb[109].mxu0 }
0x416f   :  { %v3514_v22 = vpop.f32.mrb[110].mxu0 }
0x4170   :  { %v4935_v50 = vpop.f32.mrb[111].mxu0  ;;  %4949 = vmatmul.mubr.msk.bf16.vlgmr.msra.gmra.mrb[112].mxu0 %vm303_vm3, %v3517_v33 }
0x4171   :  { %4961 = vmatpush3.bf16.msra.mxu0 %v6581_v39  ;;  %4964 = vmatprep.mubr.msk.bf16.mxu0 %vm5524_vm0, %v6446_v13 }
0x4172   :  { %4962 = vmatprep.subr.bf16.mxu0 %v6446_v13 }
0x4175   :  { %4963 = vmatpush3.bf16.msra.mxu0 %v6587_v34 }
0x4176   :  { %4976 = vmatprep.subr.bf16.mxu0 %v6446_v13 }
0x4243   :  { %v3595_v45 = vpop.f32.mrb[112].mxu0 }
0x4244   :  { %v3596_v52 = vadd.f32 %v3595_v45, %v3552_v44  ;;  %v4950_v26 = vpop.f32.mrb[113].mxu0 }
0x4245   :  { %v3598_v14 = vpop.f32.mrb[114].mxu0 }
0x4246   :  { %v3601_v30 = vadd.f32 %v6591_v49, %v3596_v52  ;;  %v4951_v18 = vpop.f32.mrb[115].mxu0 }
0x4248   :  { %v3602_v38 = vadd.f32 %v3601_v30, %v3601_v30 }
0x424a   :  { %v3603_v32 = vsel %vm5860_vm10, %v3602_v38, %v3601_v30 }
0x424b   :  { %v4303_v43 = vmul.f32 -1.442695, %v3603_v32 }
0x424d   :  { %5223 = vpow2.f32 %v4303_v43 }
0x4257   :  { %v5224_v19 = vpop.eup %5223 }
0x4258   :  { %v3607_v24 = vadd.f32 1.0, %v5224_v19 }
0x425a   :  { %5225 = vrcp.f32 %v3607_v24 }
0x4264   :  { %v5226_v53 = vpop.eup %5225 }
0x4265   :  { %v3610_v62 = vadd.f32 %v5226_v53, %v5226_v53 }
0x4267   :  { %v4304_v56 = vadd.f32 -1.0, %v3610_v62 }
0x4269   :  { %v3612_v58 = vsel %vm5860_vm10, %v4304_v56, %v5226_v53  ;;  %v5531_v56 = vmov 6  }
0x426a   :  { %3615 = vrot.lane.b32.xlu1 %v3612_v58, %s5511_s3  ;;  %v3613_v60 = vmul.f32 %v3612_v58, %v6601_v17  ;;  %5068 = vset.pattern.permute.xlu0 %v5531_v56 }
0x42dc   :  { %v3616_v44 = vpop.permute.xlu1 %3615 }
0x42dd   :  { %v3618_v59 = vmul.f32 %v3616_v44, %v3612_v58  ;;  %v3804_v44 = vstv %s4310_s18 }
0x42df   :  { %3620 = vrot.lane.b32.xlu1 %v3618_v59, %s5525_s5 }
0x4351   :  { %v3621_v16 = vpop.permute.xlu1 %3620 }
0x4352   :  { %v6689_v46 = vadd.f32 %v3621_v16, %v3613_v60  ;;  %v3807_v60 = vstv %s3806_s2 }
0x4354   :  { %5227 = vtanh.f32 %v6689_v46 }
0x435e   :  { %v5228_v40 = vpop.eup %5227 }
0x435f   :  { %3626 = vrot.lane.b32.xlu1 %v5228_v40, %s5511_s3  ;;  %v3805_v40 = vmul.u32 %v3804_v44, %v6474_v23 }
0x43d1   :  { %v3627_v41 = vpop.permute.xlu1 %3626 }
0x43d2   :  { %v3629_v63 = vmul.f32 %v3627_v41, %v3612_v58 }
0x43d4   :  { %v3630_v28 = vpack.c.bf16 %v3629_v63, %v3629_v63 }
0x43d6   :  { %3672 = vrot.lane.b32.xlu1 %v3630_v28, %s5525_s5 }
0x4448   :  { %v3673_v61 = vpop.permute.xlu1 %3672 }
0x4449   :  { %4965 = vmatmul.mubr.msk.bf16.vlgmr.msra.gmra.mrb[116].mxu0 %vm303_vm3, %v3673_v61 }
0x444a   :  { %4977 = vmatpush3.bf16.msra.mxu0 %v6510_v20  ;;  %4980 = vmatprep.mubr.msk.bf16.mxu0 %vm5524_vm0, %v6446_v13 }
0x444b   :  { %4978 = vmatprep.subr.bf16.mxu0 %v6446_v13 }
0x444e   :  { %4979 = vmatpush3.bf16.msra.mxu0 %v6519_v29 }
0x444f   :  { %4992 = vmatprep.subr.bf16.mxu0 %v6446_v13 }
0x451c   :  { %v3711_v17 = vpop.f32.mrb[116].mxu0 }
0x451d   :  { %v3712_v2 = vadd.f32 %v3711_v17, %v6661_v4  ;;  %v4966_v42 = vpop.f32.mrb[117].mxu0 }
0x451e   :  { %v3714_v51 = vpop.f32.mrb[118].mxu0 }
0x451f   :  { %v3717_v21 = vadd.f32 %v6614_v35, %v3712_v2  ;;  %v4967_v6 = vpop.f32.mrb[119].mxu0 }
0x4521   :  { %v3718_v7 = vadd.f32 %v3717_v21, %v3717_v21 }
0x4523   :  { %v3719_v20 = vsel %vm5860_vm10, %v3718_v7, %v3717_v21 }
0x4524   :  { %v4307_v11 = vmul.f32 -1.442695, %v3719_v20 }
0x4526   :  { %5229 = vpow2.f32 %v4307_v11 }
0x4530   :  { %v5230_v37 = vpop.eup %5229 }
0x4531   :  { %v3723_v8 = vadd.f32 1.0, %v5230_v37 }
0x4533   :  { %5231 = vrcp.f32 %v3723_v8 }
0x453d   :  { %v5232_v29 = vpop.eup %5231 }
0x453e   :  { %v3726_v47 = vadd.f32 %v5232_v29, %v5232_v29 }
0x4540   :  { %v4308_v1 = vadd.f32 -1.0, %v3726_v47 }
0x4542   :  { %v3728_v4 = vsel %vm5860_vm10, %v4308_v1, %v5232_v29 }
0x4543   :  { %3731 = vrot.lane.b32.xlu1 %v3728_v4, %s5511_s3  ;;  %v3729_v3 = vmul.f32 %v3728_v4, %v6624_v36 }
0x45b5   :  { %v3732_v10 = vpop.permute.xlu1 %3731 }
0x45b6   :  { %v3734_v33 = vmul.f32 %v3732_v10, %v3728_v4 }
0x45b8   :  { %3736 = vrot.lane.b32.xlu1 %v3734_v33, %s5525_s5 }
0x462a   :  { %v3737_v22 = vpop.permute.xlu1 %3736 }
0x462b   :  { %v6710_v50 = vadd.f32 %v3737_v22, %v3729_v3 }
0x462d   :  { %5233 = vtanh.f32 %v6710_v50 }
0x4637   :  { %v5234_v45 = vpop.eup %5233 }
0x4638   :  { %3742 = vrot.lane.b32.xlu1 %v5234_v45, %s5511_s3 }
0x46aa   :  { %v3743_v52 = vpop.permute.xlu1 %3742 }
0x46ab   :  { %v3745_v26 = vmul.f32 %v3743_v52, %v3728_v4 }
0x46ad   :  { %v3746_v14 = vpack.c.bf16 %v3745_v26, %v3745_v26 }
0x46af   :  { %3748 = vrot.lane.b32.xlu1 %v3746_v14, %s5525_s5 }
0x4721   :  { %v3749_v30 = vpop.permute.xlu1 %3748 }
0x4722   :  { %4973 = vmatmul.mubr.msk.bf16.vlgmr.msra.gmra.mrb[116].mxu1 %vm303_vm3, %v3749_v30 }
0x4723   :  { %4985 = vmatpush3.bf16.msra.mxu1 %v6538_v0  ;;  %4988 = vmatprep.mubr.msk.bf16.mxu1 %vm5524_vm0, %v6446_v13 }
0x4724   :  { %4986 = vmatprep.subr.bf16.mxu1 %v6446_v13 }
0x4727   :  { %4987 = vmatpush3.bf16.msra.mxu1 %v6544_v9 }
0x4728   :  { %5000 = vmatprep.subr.bf16.mxu1 %v6446_v13 }
0x472a   :  { %4989 = vmatmul.mubr.msk.bf16.vlgmr.msra.gmra.mrb[120].mxu1 %vm303_vm3, %v3673_v61 }
0x472b   :  { %5001 = vmatpush3.bf16.msra.mxu1 %v6637_v5  ;;  %5004 = vmatprep.mubr.msk.bf16.mxu1 %vm5524_vm0, %v6446_v13 }
0x472c   :  { %5002 = vmatprep.subr.bf16.mxu1 %v6446_v13 }
0x472f   :  { %5003 = vmatpush3.bf16.msra.mxu1 %v6643_v31 }
0x4730   :  { %5016 = vmatprep.subr.bf16.mxu1 %v6446_v13 }
0x4732   :  { %5005 = vmatmul.mubr.msk.bf16.vlgmr.msra.gmra.mrb[124].mxu1 %vm303_vm3, %v3749_v30 }
0x4733   :  { %5017 = vmatpush3.bf16.msra.mxu1 %v6648_v48  ;;  %5020 = vmatprep.mubr.msk.bf16.mxu1 %vm5524_vm0, %v6446_v13 }
0x4734   :  { %5018 = vmatprep.subr.bf16.mxu1 %v6446_v13 }
0x4737   :  { %5019 = vmatpush3.bf16.msra.mxu1 %v6654_v54 }
0x47f5   :  { %v3787_v0 = vpop.f32.mrb[116].mxu1 }
0x47f6   :  { %v3788_v9 = vadd.f32 %v6658_v25, %v3787_v0  ;;  %v4974_v36 = vpop.f32.mrb[117].mxu1 }
0x47f7   :  { %v3790_v5 = vpop.f32.mrb[118].mxu1 }
0x47f8   :  { %3794 = vst [vmem:[#allocation19 + $0x30] sm:$0xff] %v3788_v9  ;;  %3795 = vmax.xlane.f32.xlu0 %v3788_v9  ;;  %v4975_v31 = vpop.f32.mrb[119].mxu1 }
0x47fd   :  { %v3895_v18 = vpop.f32.mrb[120].mxu1 }
0x47fe   :  { %v4990_v38 = vpop.f32.mrb[121].mxu1 }
0x47ff   :  { %v3898_v32 = vpop.f32.mrb[122].mxu1 }
0x4800   :  { %v4991_v43 = vpop.f32.mrb[123].mxu1 }
0x4805   :  { %v6736_v48 = vpop.f32.mrb[124].mxu1 }
0x4806   :  { %v5006_v19 = vpop.f32.mrb[125].mxu1 }
0x4807   :  { %v4011_v24 = vpop.f32.mrb[126].mxu1 }
0x4808   :  { %v5007_v53 = vpop.f32.mrb[127].mxu1 }
0x4885   :  { %v3796_v62 = vpop.xlane.xlu0 %3795 }
0x4886   :  { %vm3797_vm8 = vcmp.eq.f32.partialorder %v3788_v9, %v3796_v62 }
0x4887   :  { %v3798_v54 = vsel %vm3797_vm8, %v6314_v55, 128.0 }
0x4888   :  { %3799 = vmin.xlane.f32.xlu1 %v3798_v54 }
0x4915   :  { %v3800_v58 = vpop.xlane.xlu1 %3799 }
0x4916   :  { %v5034_v59 = vtrunc.f32 %v3800_v58 }
0x4918   :  { %v5035_v16 = vcvt.f32.s32 %v5034_v59 }
0x491a   :  { %v3808_v41 = vmul.u32 %v5035_v16, %v3807_v60 }
0x491c   :  { %v3809_v63 = vadd.s32 %v3808_v41, %v3805_v40 }
0x491e   :  { %3811 = vperm.xlu0 %5068, %v3809_v63  }
0x499d   :  { %v3812_v28 = vpop.permute.xlu0 %3811 }
0x499e   :  { %vm3813_vm9 = vcmp.eq.s32.totalorder %v5800_v12, %v3812_v28 }
0x499f   :  { %v4311_v55 = vsel %vm3813_vm9, 1.0, %v6446_v13 }
0x49a0   :  { %v3816_v61 = vpack.c.bf16 %v4311_v55, %v4311_v55 }
0x49a2   :  { %4981 = vmatmul.mubr.msk.bf16.vlgmr.msra.gmra.mrb[120].mxu0 %vm303_vm3, %v3816_v61 }
0x49a3   :  { %4993 = vmatpush3.bf16.msra.mxu0 %v6570_v15  ;;  %4996 = vmatprep.mubr.msk.bf16.mxu0 %vm5524_vm0, %v6446_v13 }
0x49a4   :  { %4994 = vmatprep.subr.bf16.mxu0 %v6446_v13 }
0x49a7   :  { %4995 = vmatpush3.bf16.msra.mxu0 %v6576_v27 }
0x49a8   :  { %5008 = vmatprep.subr.bf16.mxu0 %v6446_v13 }
0x4a75   :  { %v3854_v23 = vpop.f32.mrb[120].mxu0 }
0x4a76   :  { %v3860_v17 = vpack.c.bf16 %v3854_v23, %v3854_v23  ;;  %v4982_v2 = vpop.f32.mrb[121].mxu0 }
0x4a77   :  { %v3857_v12 = vpop.f32.mrb[122].mxu0 }
0x4a78   :  { %v4983_v42 = vpop.f32.mrb[123].mxu0  ;;  %4997 = vmatmul.mubr.msk.bf16.vlgmr.msra.gmra.mrb[124].mxu0 %vm303_vm3, %v3860_v17 }
0x4a79   :  { %5009 = vmatpush3.bf16.msra.mxu0 %v6581_v39  ;;  %5012 = vmatprep.mubr.msk.bf16.mxu0 %vm5524_vm0, %v6446_v13 }
0x4a7a   :  { %5010 = vmatprep.subr.bf16.mxu0 %v6446_v13 }
0x4a7d   :  { %5011 = vmatpush3.bf16.msra.mxu0 %v6587_v34 }
0x4b4b   :  { %v3938_v15 = vpop.f32.mrb[124].mxu0 }
0x4b4c   :  { %v3939_v27 = vadd.f32 %v3938_v15, %v3895_v18  ;;  %v4998_v51 = vpop.f32.mrb[125].mxu0 }
0x4b4d   :  { %v3941_v21 = vpop.f32.mrb[126].mxu0 }
0x4b4e   :  { %v3944_v6 = vadd.f32 %v6591_v49, %v3939_v27  ;;  %v4999_v7 = vpop.f32.mrb[127].mxu0 }
0x4b50   :  { %v3945_v20 = vadd.f32 %v3944_v6, %v3944_v6 }
0x4b52   :  { %v3946_v11 = vsel %vm5860_vm10, %v3945_v20, %v3944_v6 }
0x4b53   :  { %v4315_v37 = vmul.f32 -1.442695, %v3946_v11 }
0x4b55   :  { %5235 = vpow2.f32 %v4315_v37 }
0x4b5f   :  { %v5236_v39 = vpop.eup %5235 }
0x4b60   :  { %v3950_v8 = vadd.f32 1.0, %v5236_v39 }
0x4b62   :  { %5237 = vrcp.f32 %v3950_v8 }
0x4b6c   :  { %v5238_v29 = vpop.eup %5237 }
0x4b6d   :  { %v3953_v13 = vadd.f32 %v5238_v29, %v5238_v29 }
0x4b6f   :  { %v4316_v47 = vadd.f32 -1.0, %v3953_v13 }
0x4b71   :  { %v3955_v34 = vsel %vm5860_vm10, %v4316_v47, %v5238_v29 }
0x4b72   :  { %3958 = vrot.lane.b32.xlu1 %v3955_v34, %s5511_s3  ;;  %v3956_v4 = vmul.f32 %v3955_v34, %v6689_v46 }
0x4be4   :  { %v3959_v1 = vpop.permute.xlu1 %3958 }
0x4be5   :  { %v3961_v49 = vmul.f32 %v3959_v1, %v3955_v34 }
0x4be7   :  { %3963 = vrot.lane.b32.xlu1 %v3961_v49, %s5525_s5 }
0x4c59   :  { %v3964_v10 = vpop.permute.xlu1 %3963 }
0x4c5a   :  { %v3966_v33 = vadd.f32 %v3964_v10, %v3956_v4 }
0x4c5c   :  { %5239 = vtanh.f32 %v3966_v33 }
0x4c66   :  { %v5240_v3 = vpop.eup %5239 }
0x4c67   :  { %3969 = vrot.lane.b32.xlu1 %v5240_v3, %s5511_s3 }
0x4cd9   :  { %v3970_v22 = vpop.permute.xlu1 %3969 }
0x4cda   :  { %v3972_v45 = vmul.f32 %v3970_v22, %v3955_v34 }
0x4cdc   :  { %v3973_v52 = vpack.c.bf16 %v3972_v45, %v3972_v45 }
0x4cde   :  { %4015 = vrot.lane.b32.xlu1 %v3973_v52, %s5525_s5 }
0x4d50   :  { %v4016_v26 = vpop.permute.xlu1 %4015 }
0x4d51   :  { %5013 = vmatmul.mubr.msk.bf16.vlgmr.msra.gmra.mrb[128].mxu0 %vm303_vm3, %v4016_v26 }
0x4e24   :  { %v4054_v14 = vpop.f32.mrb[128].mxu0 }
0x4e25   :  { %v4055_v30 = vadd.f32 %v4054_v14, %v6736_v48  ;;  %v5014_v0 = vpop.f32.mrb[129].mxu0 }
0x4e26   :  { %v4057_v9 = vpop.f32.mrb[130].mxu0 }
0x4e27   :  { %v4060_v46 = vadd.f32 %v6614_v35, %v4055_v30  ;;  %v5015_v36 = vpop.f32.mrb[131].mxu0 }
0x4e29   :  { %v4061_v5 = vadd.f32 %v4060_v46, %v4060_v46 }
0x4e2b   :  { %v4062_v31 = vsel %vm5860_vm10, %v4061_v5, %v4060_v46 }
0x4e2c   :  { %v4319_v18 = vmul.f32 -1.442695, %v4062_v31 }
0x4e2e   :  { %5241 = vpow2.f32 %v4319_v18 }
0x4e38   :  { %v5242_v38 = vpop.eup %5241 }
0x4e39   :  { %v4066_v32 = vadd.f32 1.0, %v5242_v38 }
0x4e3b   :  { %5243 = vrcp.f32 %v4066_v32 }
0x4e45   :  { %v5244_v43 = vpop.eup %5243 }
0x4e46   :  { %v4069_v19 = vadd.f32 %v5244_v43, %v5244_v43 }
0x4e48   :  { %v4320_v24 = vadd.f32 -1.0, %v4069_v19 }
0x4e4a   :  { %v4071_v48 = vsel %vm5860_vm10, %v4320_v24, %v5244_v43 }
0x4e4b   :  { %4074 = vrot.lane.b32.xlu1 %v4071_v48, %s5511_s3  ;;  %v4072_v62 = vmul.f32 %v4071_v48, %v6710_v50 }
0x4ebd   :  { %v4075_v53 = vpop.permute.xlu1 %4074 }
0x4ebe   :  { %v4077_v35 = vmul.f32 %v4075_v53, %v4071_v48 }
0x4ec0   :  { %4079 = vrot.lane.b32.xlu1 %v4077_v35, %s5525_s5 }
0x4f32   :  { %v4080_v54 = vpop.permute.xlu1 %4079 }
0x4f33   :  { %v4082_v56 = vadd.f32 %v4080_v54, %v4072_v62 }
0x4f35   :  { %5245 = vtanh.f32 %v4082_v56 }
0x4f3f   :  { %v5246_v58 = vpop.eup %5245 }
0x4f40   :  { %4085 = vrot.lane.b32.xlu0 %v5246_v58, %s5511_s3 }
0x4fb2   :  { %v4086_v44 = vpop.permute.xlu0 %4085 }
0x4fb3   :  { %v4088_v59 = vmul.f32 %v4086_v44, %v4071_v48 }
0x4fb5   :  { %v4089_v60 = vpack.c.bf16 %v4088_v59, %v4088_v59 }
0x4fb7   :  { %4091 = vrot.lane.b32.xlu1 %v4089_v60, %s5525_s5 }
0x5029   :  { %v4092_v57 = vpop.permute.xlu1 %4091 }
0x502a   :  { %5021 = vmatmul.mubr.msk.bf16.vlgmr.msra.gmra.mrb[128].mxu1 %vm303_vm3, %v4092_v57 }
0x50fd   :  { %v4130_v16 = vpop.f32.mrb[128].mxu1 }
0x50fe   :  { %v4131_v40 = vadd.f32 %v6658_v25, %v4130_v16  ;;  %v5022_v50 = vpop.f32.mrb[129].mxu1 }
0x50ff   :  { %v4133_v41 = vpop.f32.mrb[130].mxu1 }
0x5100   :  { %4137 = vst [vmem:[#allocation19 + $0x38] sm:$0xff] %v4131_v40  ;;  %v5023_v63 = vpop.f32.mrb[131].mxu1 }
0x5101   :  { %5485 = shalt.err (!%p5482_p11)
}
0x5102   :  { %s6826_s9 = sld [smem:[#allocation31_spill]] }
0x5108   :  { %s5486_s10 = scalar_lea.hbm %s6826_s9, 1024 }
0x5109   :  { %p5487_p12 = scmp.ne.s32.totalorder %s6826_s9, %s5486_s10  ;;  %p5490_p13 = scmp.lt.u32.totalorder %s5486_s10, %s6826_s9 }
0x510b   :  { %p5492_p0 = pnand %p5490_p13, %p5487_p12 }
0x510d   :  { %5495 = shalt.err (!%p5492_p0)
}
0x510e   :  { %s5533_s15 = smov 128   ;;  %s5534_s21 = smov 8  }
0x510f   :  { %4149 = dma.vmem_to_hbm [thread:$0]  %s4144_s29, 1024, %s6826_s9, [#allocation4], %s5533_s15, %s5533_s15, %s5534_s21  }
0x5110   :  { %5508 = dma.done.wait [#allocation4], 1024  }
0x5111   :  { %5509 = vsyncadd [#allocation4], 4294966272 }
0x5112   :  { %4153 = vsyncpa [#allocation3], 1 }
0x5113   :  { %4154 = vsyncpa [#allocation8], 1 }
0x5114   :  { %4155 = vsyncpa [#allocation11], 1 }
0x5115   :  { %4156 = vsyncpa [#allocation14], 1 }
0x5116   :  { %4157 = vsyncpa [#allocation17], 1 }
0x5117   :  { %4158 = vsyncpa [#allocation4], 1 }
0x5118   :  { %4159 = vsyncpa [#allocation5], 1 }

</bundles_post_ra>
